<compile_context>
chip_gen: v6e
topology: v6e:2x2x1
jax: 0.10.0
libtpu: 0.0.40
codegen_flags: <defaults>
</compile_context>

<pallas_src>
import functools
import math

import jax
import jax.numpy as jnp
from jax.experimental import pallas as pl
from jax.experimental.pallas import tpu as pltpu

_CPARAMS = pltpu.CompilerParams(dimension_semantics=("parallel",),
                                vmem_limit_bytes=32 * 1024 * 1024)


# ----------------------------- BlockSpec helpers ----------------------------

def _bspec(shape):
    """Per-batch block: leading dim squeezed, rest full extent."""
    nd = len(shape)

    def imap(b):
        return (b,) + (0,) * (nd - 1)

    return pl.BlockSpec((None,) + tuple(shape[1:]), imap)


def _const_spec(shape):
    """Full-extent constant block (same block for every grid step)."""
    nd = len(shape)

    def imap(b):
        return (0,) * nd

    return pl.BlockSpec(tuple(shape), imap)


# ----------------------------- in-kernel helpers -----------------------------

def _lin(x_bf16, wt_ref, b_ref):
    # y = x @ wt + b ; bf16 operands, f32 MXU accumulation, f32 bias add.
    return jnp.dot(x_bf16, wt_ref[...],
                   preferred_element_type=jnp.float32) + b_ref[...]


def _layernorm_rows(x, gamma, beta, eps=1e-5):
    mean = jnp.mean(x, axis=-1, keepdims=True)
    var = jnp.mean(jnp.square(x - mean), axis=-1, keepdims=True)
    return (x - mean) * jax.lax.rsqrt(var + eps) * gamma + beta


def _mha(q, k, v, nheads, scale, exact=False, want_probs=False):
    """q:[Lq,D] k/v:[Lk,D] f32.  Heads split/merged in-kernel; returns [Lq,D]
    (and head-averaged probs [Lq,Lk] if want_probs)."""
    D = q.shape[-1]
    dh = D // nheads
    outs = []
    probs_acc = None
    for h in range(nheads):
        sl = slice(h * dh, (h + 1) * dh)
        qh = q[:, sl].astype(jnp.bfloat16)
        kh = k[:, sl].astype(jnp.bfloat16)
        vh = v[:, sl].astype(jnp.bfloat16)
        s = jax.lax.dot_general(qh, kh, (((1,), (1,)), ((), ())),
                                preferred_element_type=jnp.float32) * scale
        m = jnp.max(s, axis=-1, keepdims=True)
        e = jnp.exp(s - m)
        denom = jnp.sum(e, axis=-1, keepdims=True)
        if exact:
            p = e / denom                               # user-visible probs: exact
        else:
            p = e * pl.reciprocal(denom, approx=True)   # internal: EUP approx
        outs.append(jnp.dot(p.astype(jnp.bfloat16), vh,
                            preferred_element_type=jnp.float32))
        if want_probs:
            probs_acc = p if probs_acc is None else probs_acc + p
    o = outs[0] if nheads == 1 else jnp.concatenate(outs, axis=-1)
    if want_probs:
        return o, probs_acc * (1.0 / nheads)
    return o


# ----------------------------- Pallas kernels --------------------------------

def _input_kernel(x_ref, pw_ref, pe_ref, g_ref, b_ref, o_ref):
    # x + pos_weight * pe  ->  LayerNorm
    x = x_ref[...] + pw_ref[...] * pe_ref[...]
    o_ref[...] = _layernorm_rows(x, g_ref[...], b_ref[...])


def _encoder_layer_kernel(x_ref,
                          qkv_wt, qkv_b, ow, ob,
                          g1, be1,
                          w1, b1, w2, b2,
                          g2, be2,
                          o_ref, *, nheads, scale):
    # Fused nn.TransformerEncoderLayer (post-norm, ReLU, dropout=0).
    x = x_ref[...]                                   # [N, D] f32
    D = x.shape[-1]
    qkv = _lin(x.astype(jnp.bfloat16), qkv_wt, qkv_b)          # [N, 3D]
    attn_o = _mha(qkv[:, :D], qkv[:, D:2 * D], qkv[:, 2 * D:], nheads, scale)
    sa = _lin(attn_o.astype(jnp.bfloat16), ow, ob)
    h = _layernorm_rows(x + sa, g1[...], be1[...])             # f32 residual/LN
    hh = jnp.maximum(_lin(h.astype(jnp.bfloat16), w1, b1), 0.0).astype(jnp.bfloat16)
    ff = _lin(hh, w2, b2)
    o_ref[...] = _layernorm_rows(h + ff, g2[...], be2[...])


def _query_block_kernel(q_ref, x_ref,
                        qp_wt, qp_b,
                        sa_qkv_wt, sa_qkv_b, sa_ow, sa_ob,
                        gq, bq,
                        ca_q_wt, ca_q_b, ca_kv_wt, ca_kv_b, ca_ow, ca_ob,
                        go, bo,
                        a1_wt, a1_b, a2_wt, a2_b,
                        out_ref, wout_ref, attn_ref, qn_ref,
                        *, nheads, scale):
    # Fused: query proj -> self-attn -> residual+LN_q -> cross-attn (+probs)
    #        -> out proj -> LN_out -> adaptive-fusion gate weight.
    q_in = q_ref[...]                                # [Lq, D] f32
    x = x_ref[...].astype(jnp.bfloat16)              # [N, D]
    D = q_in.shape[-1]

    # query_projection
    q = _lin(q_in.astype(jnp.bfloat16), qp_wt, qp_b)

    # self-attention on queries (fused QKV)
    qkv = _lin(q.astype(jnp.bfloat16), sa_qkv_wt, sa_qkv_b)
    ao = _mha(qkv[:, :D], qkv[:, D:2 * D], qkv[:, 2 * D:], nheads, scale)
    sa = _lin(ao.astype(jnp.bfloat16), sa_ow, sa_ob)
    q_normed = _layernorm_rows(q + sa, gq[...], bq[...])
    qn_ref[...] = q_normed

    # cross-attention: query = q_normed, key = value = encoder output x
    cq = _lin(q_normed.astype(jnp.bfloat16), ca_q_wt, ca_q_b)
    kv = _lin(x, ca_kv_wt, ca_kv_b)                  # fused K/V projection
    co, probs = _mha(cq, kv[:, :D], kv[:, D:], nheads, scale,
                     exact=True, want_probs=True)
    attn_ref[...] = probs
    o = _lin(co.astype(jnp.bfloat16), ca_ow, ca_ob)
    out = _layernorm_rows(o, go[...], bo[...])
    out_ref[...] = out

    # adaptive-fusion gate (shared attention_net) computed in-kernel so the
    # width-16 / width-1 MLP outputs never hit HBM.
    gf = jnp.mean(out, axis=0, keepdims=True)        # [1, D]
    hfc = jnp.maximum(_lin(gf.astype(jnp.bfloat16), a1_wt, a1_b), 0.0)
    w = jax.nn.sigmoid(_lin(hfc.astype(jnp.bfloat16), a2_wt, a2_b))   # [1, 1]
    wout_ref[...] = out * w


# ------------------------------ kernel wrappers -------------------------------

def input_block(params, x):
    B, N, D = x.shape
    args = (x, params["pos_weight"], params["pe"],
            params["norm_input"][0], params["norm_input"][1])
    in_specs = [_bspec((B, N, D)),
                _const_spec((1, 1)),
                pl.BlockSpec((N, D), lambda b: (0, 0)),   # pe[:N] via BlockSpec
                _const_spec((1, D)),
                _const_spec((1, D))]
    return pl.pallas_call(
        _input_kernel,
        out_shape=jax.ShapeDtypeStruct((B, N, D), jnp.float32),
        grid=(B,),
        in_specs=in_specs,
        out_specs=_bspec((B, N, D)),
        compiler_params=_CPARAMS,
    )(*args)


def encoder_layer(p, x, nheads):
    B, N, D = x.shape
    scale = 1.0 / math.sqrt(D // nheads)
    a = p["attn"]
    args = (x,
            a["qkv"]["wt"], a["qkv"]["b"], a["out"]["wt"], a["out"]["b"],
            p["norm1"][0], p["norm1"][1],
            p["lin1"]["wt"], p["lin1"]["b"], p["lin2"]["wt"], p["lin2"]["b"],
            p["norm2"][0], p["norm2"][1])
    in_specs = [_bspec((B, N, D))] + [_const_spec(w.shape) for w in args[1:]]
    return pl.pallas_call(
        functools.partial(_encoder_layer_kernel, nheads=nheads, scale=scale),
        out_shape=jax.ShapeDtypeStruct((B, N, D), jnp.float32),
        grid=(B,),
        in_specs=in_specs,
        out_specs=_bspec((B, N, D)),
        compiler_params=_CPARAMS,
    )(*args)


def query_block(p, fusion_p, q_in, x_enc, nheads):
    B, Lq, D = q_in.shape
    N = x_enc.shape[1]
    scale = 1.0 / math.sqrt(D // nheads)
    sa = p["self_attn"]
    ca = p["cross_attn"]
    args = (q_in, x_enc,
            p["qproj"]["wt"], p["qproj"]["b"],
            sa["qkv"]["wt"], sa["qkv"]["b"], sa["out"]["wt"], sa["out"]["b"],
            p["norm_q"][0], p["norm_q"][1],
            ca["q"]["wt"], ca["q"]["b"], ca["kv"]["wt"], ca["kv"]["b"],
            ca["out"]["wt"], ca["out"]["b"],
            p["norm_out"][0], p["norm_out"][1],
            fusion_p["att1"]["wt"], fusion_p["att1"]["b"],
            fusion_p["att2"]["wt"], fusion_p["att2"]["b"])
    in_specs = ([_bspec((B, Lq, D)), _bspec((B, N, D))]
                + [_const_spec(w.shape) for w in args[2:]])
    out_shapes = (jax.ShapeDtypeStruct((B, Lq, D), jnp.float32),   # out
                  jax.ShapeDtypeStruct((B, Lq, D), jnp.float32),   # weighted out
                  jax.ShapeDtypeStruct((B, Lq, N), jnp.float32),   # attn probs
                  jax.ShapeDtypeStruct((B, Lq, D), jnp.float32))   # q_normed
    out_specs = (_bspec((B, Lq, D)), _bspec((B, Lq, D)),
                 _bspec((B, Lq, N)), _bspec((B, Lq, D)))
    return pl.pallas_call(
        functools.partial(_query_block_kernel, nheads=nheads, scale=scale),
        out_shape=out_shapes,
        grid=(B,),
        in_specs=in_specs,
        out_specs=out_specs,
        compiler_params=_CPARAMS,
    )(*args)


# -------------------------- XLA glue (tiny by design) -------------------------

def prepare_queries(p, B, prev_q):
    """Tile base queries; blend with propagated queries (layer_idx > 0)."""
    nq, D = p["queries"].shape[1:]
    base = jnp.broadcast_to(p["queries"], (B, nq, D))
    if prev_q is None:
        return base
    if p["adapter"] is not None:
        adapted = (jnp.einsum("bpd,qp->bqd", prev_q, p["adapter"]["w"])
                   + p["adapter"]["b"][None, :, None])
    else:
        adapted = prev_q
    alpha = jax.nn.sigmoid(p["gate"])
    return alpha * base + (1.0 - alpha) * adapted


def adaptive_fusion_tail(fp, weighted_outs):
    """concat -> final_proj over the query axis -> flatten -> L2 normalize."""
    concat = jnp.concatenate(weighted_outs, axis=1)            # [B, totalQ, D]
    final = (jnp.einsum("bqd,rq->bdr", concat, fp["fproj"]["w"])
             + fp["fproj"]["b"][None, None, :])                # [B, D, row_dim]
    B = final.shape[0]
    final = final.reshape(B, -1)
    norm = jnp.sqrt(jnp.sum(final * final, axis=-1, keepdims=True))
    return final / jnp.maximum(norm, 1e-12)                    # F.normalize p=2


def cmqe_adaptive_boq_forward(params, x, nheads, num_layers):
    B = x.shape[0]
    x = input_block(params, x)
    outs, weighted, attns = [], [], []
    prev_q = None
    for i in range(num_layers):
        p = params["boqs"][i]
        x = encoder_layer(p["encoder"], x, nheads)
        q_in = prepare_queries(p, B, prev_q)
        out, wout, attn, q_normed = query_block(p, params["fusion"], q_in, x,
                                                nheads)
        outs.append(out)
        weighted.append(wout)
        attns.append(attn)
        prev_q = q_normed                     # query propagation enabled
    final_out = adaptive_fusion_tail(params["fusion"], weighted)
    return final_out, attns, outs[0]


# ------------------------------ parameter init --------------------------------

def get_layer_queries_hierarchical(base_queries, num_layers):
    if num_layers == 1:
        return [base_queries]
    qs = []
    for i in range(num_layers):
        ratio = 1.0 - i / (num_layers - 1) * 0.3
        qs.append(max(8, int(base_queries * ratio)))
    return qs


def positional_encoding(N, D):
    position = jnp.arange(N, dtype=jnp.float32)[:, None]
    div_term = jnp.exp(jnp.arange(0, D, 2, dtype=jnp.float32)
                       * (-math.log(10000.0) / D))
    pe = jnp.zeros((N, D), jnp.float32)
    pe = pe.at[:, 0::2].set(jnp.sin(position * div_term))
    pe = pe.at[:, 1::2].set(jnp.cos(position * div_term))
    return pe


def init_params(key, D, num_queries, num_layers, row_dim, pe_max_len=512):
    layer_queries = get_layer_queries_hierarchical(num_queries, num_layers)
    keys = iter(jax.random.split(key, 256))

    def nk():
        return next(keys)

    def W(shape, scale=0.05):
        return jax.random.normal(nk(), shape, jnp.float32) * scale

    def ln(d):
        return (jnp.ones((1, d), jnp.float32), jnp.zeros((1, d), jnp.float32))

    def lin(out_d, in_d):
        # stored pre-transposed [in,out] bf16; bias pre-reshaped (1,out) f32
        w = W((out_d, in_d))
        return dict(wt=jnp.transpose(w).astype(jnp.bfloat16),
                    b=jnp.zeros((1, out_d), jnp.float32))

    def mha(d):
        in_w = W((3 * d, d))
        in_b = jnp.zeros((3 * d,), jnp.float32)
        out_w = W((d, d))
        out_b = jnp.zeros((d,), jnp.float32)
        return dict(
            qkv=dict(wt=jnp.transpose(in_w).astype(jnp.bfloat16),
                     b=in_b.reshape(1, 3 * d)),
            q=dict(wt=jnp.transpose(in_w[:d]).astype(jnp.bfloat16),
                   b=in_b[:d].reshape(1, d)),
            kv=dict(wt=jnp.transpose(in_w[d:]).astype(jnp.bfloat16),
                    b=in_b[d:].reshape(1, 2 * d)),
            out=dict(wt=jnp.transpose(out_w).astype(jnp.bfloat16),
                     b=out_b.reshape(1, d)))

    params = dict(pos_weight=jnp.ones((1, 1), jnp.float32),
                  pe=positional_encoding(pe_max_len, D),
                  norm_input=ln(D))
    boqs = []
    for i in range(num_layers):
        nq = layer_queries[i]
        init_scale = 1.0 * (1.0 + i * 0.5)      # hierarchical queries enabled
        adapter = None
        if i > 0 and layer_queries[i - 1] != nq:
            adapter = dict(w=W((nq, layer_queries[i - 1])),
                           b=jnp.zeros((nq,), jnp.float32))
        boqs.append(dict(
            encoder=dict(attn=mha(D), norm1=ln(D), lin1=lin(4 * D, D),
                         lin2=lin(D, 4 * D), norm2=ln(D)),
            queries=jax.random.normal(nk(), (1, nq, D), jnp.float32) * init_scale,
            qproj=lin(D, D),
            adapter=adapter,
            self_attn=mha(D),
            norm_q=ln(D),
            cross_attn=mha(D),
            norm_out=ln(D),
            gate=jnp.ones((1,), jnp.float32),
        ))
    params["boqs"] = boqs
    total_q = sum(layer_queries)
    params["fusion"] = dict(
        att1=lin(D // 4, D),
        att2=lin(1, D // 4),
        fproj=dict(w=W((row_dim, total_q)),
                   b=jnp.zeros((row_dim,), jnp.float32)))
    return params, layer_queries


# ------------------------------------ main -------------------------------------

if __name__ == "__main__":
    B, N, D = 2, 8, 64
    num_queries, num_layers, row_dim = 16, 2, 8
    nheads = max(1, D // 64)                     # mirrors max(1, input_dim // 64)

    key = jax.random.PRNGKey(0)
    kx, kp = jax.random.split(key)
    x = jax.random.normal(kx, (B, N, D), jnp.float32)
    params, layer_queries = init_params(kp, D, num_queries, num_layers, row_dim)

    fwd = jax.jit(cmqe_adaptive_boq_forward, static_argnums=(2, 3))
    final_out, attns, first_layer_queries = fwd(params, x, nheads, num_layers)

    jax.block_until_ready(final_out)
    jax.block_until_ready(first_layer_queries)
    for a in attns:
        jax.block_until_ready(a)

    assert final_out.shape == (B, D * row_dim)
    assert first_layer_queries.shape == (B, layer_queries[0], D)
    assert attns[0].shape == (B, layer_queries[0], N)
    assert attns[1].shape == (B, layer_queries[1], N)
    assert bool(jnp.all(jnp.isfinite(final_out)))
    # attention probabilities are exact-normalized; rows must sum to ~1
    assert bool(jnp.allclose(jnp.sum(attns[0], axis=-1), 1.0, atol=1e-3))
    print("KERNEL_OK")
</pallas_src>

<mosaic_0001>
module attributes {stable_mosaic.version = 11 : i64} {
  func.func @_input_kernel(%arg0: i32, %arg1: memref<1x8x64xf32, #tpu.memory_space<vmem>>, %arg2: memref<1x1xf32, #tpu.memory_space<vmem>>, %arg3: memref<8x64xf32, #tpu.memory_space<vmem>>, %arg4: memref<1x64xf32, #tpu.memory_space<vmem>>, %arg5: memref<1x64xf32, #tpu.memory_space<vmem>>, %arg6: memref<1x8x64xf32, #tpu.memory_space<vmem>>) attributes {dimension_semantics = [#tpu.dimension_semantics<parallel>], iteration_bounds = array<i64: 2>, scalar_prefetch = 0 : i64, scratch_operands = 0 : i64, tpu.core_type = #tpu.core_type<tc>, window_params = [{transform_indices = @transform_0, window_bounds = array<i64: 1, 8, 64>}, {pipeline_mode = #tpu.pipeline_mode<synchronous>, transform_indices = @transform_1, window_bounds = array<i64: 1, 1>}, {transform_indices = @transform_2, window_bounds = array<i64: 8, 64>}, {pipeline_mode = #tpu.pipeline_mode<synchronous>, transform_indices = @transform_3, window_bounds = array<i64: 1, 64>}, {pipeline_mode = #tpu.pipeline_mode<synchronous>, transform_indices = @transform_4, window_bounds = array<i64: 1, 64>}, {transform_indices = @transform_5, window_bounds = array<i64: 1, 8, 64>}]} {
    %c0 = arith.constant 0 : index
    %c0_0 = arith.constant 0 : index
    %c0_1 = arith.constant 0 : index
    %0 = vector.load %arg1[%c0, %c0_0, %c0_1] : memref<1x8x64xf32, #tpu.memory_space<vmem>>, vector<1x8x64xf32>
    %1 = vector.shape_cast %0 : vector<1x8x64xf32> to vector<8x64xf32>
    %c0_2 = arith.constant 0 : index
    %c0_3 = arith.constant 0 : index
    %2 = vector.load %arg2[%c0_2, %c0_3] : memref<1x1xf32, #tpu.memory_space<vmem>>, vector<1x1xf32>
    %c0_4 = arith.constant 0 : index
    %c0_5 = arith.constant 0 : index
    %3 = vector.load %arg3[%c0_4, %c0_5] : memref<8x64xf32, #tpu.memory_space<vmem>>, vector<8x64xf32>
    %4 = vector.broadcast %2 : vector<1x1xf32> to vector<8x64xf32>
    %5 = arith.mulf %4, %3 : vector<8x64xf32>
    %6 = arith.addf %1, %5 : vector<8x64xf32>
    %c0_6 = arith.constant 0 : index
    %c0_7 = arith.constant 0 : index
    %7 = vector.load %arg4[%c0_6, %c0_7] : memref<1x64xf32, #tpu.memory_space<vmem>>, vector<1x64xf32>
    %c0_8 = arith.constant 0 : index
    %c0_9 = arith.constant 0 : index
    %8 = vector.load %arg5[%c0_8, %c0_9] : memref<1x64xf32, #tpu.memory_space<vmem>>, vector<1x64xf32>
    %cst = arith.constant dense<0.000000e+00> : vector<8xf32>
    %9 = vector.multi_reduction <add>, %6, %cst [1] : vector<8x64xf32> to vector<8xf32>
    %10 = vector.shape_cast %9 : vector<8xf32> to vector<8x1xf32>
    %cst_10 = arith.constant 6.400000e+01 : f32
    %11 = vector.broadcast %cst_10 : f32 to vector<8x1xf32>
    %12 = arith.divf %10, %11 : vector<8x1xf32>
    %13 = vector.broadcast %12 : vector<8x1xf32> to vector<8x64xf32>
    %14 = arith.subf %6, %13 : vector<8x64xf32>
    %15 = arith.mulf %14, %14 : vector<8x64xf32>
    %cst_11 = arith.constant dense<0.000000e+00> : vector<8xf32>
    %16 = vector.multi_reduction <add>, %15, %cst_11 [1] : vector<8x64xf32> to vector<8xf32>
    %17 = vector.shape_cast %16 : vector<8xf32> to vector<8x1xf32>
    %cst_12 = arith.constant 6.400000e+01 : f32
    %18 = vector.broadcast %cst_12 : f32 to vector<8x1xf32>
    %19 = arith.divf %17, %18 : vector<8x1xf32>
    %20 = vector.broadcast %12 : vector<8x1xf32> to vector<8x64xf32>
    %21 = arith.subf %6, %20 : vector<8x64xf32>
    %cst_13 = arith.constant 9.99999974E-6 : f32
    %22 = vector.broadcast %cst_13 : f32 to vector<8x1xf32>
    %23 = arith.addf %19, %22 : vector<8x1xf32>
    %24 = math.rsqrt %23 : vector<8x1xf32>
    %25 = vector.broadcast %24 : vector<8x1xf32> to vector<8x64xf32>
    %26 = arith.mulf %21, %25 : vector<8x64xf32>
    %27 = vector.broadcast %7 : vector<1x64xf32> to vector<8x64xf32>
    %28 = arith.mulf %26, %27 : vector<8x64xf32>
    %29 = vector.broadcast %8 : vector<1x64xf32> to vector<8x64xf32>
    %30 = arith.addf %28, %29 : vector<8x64xf32>
    %c0_14 = arith.constant 0 : index
    %c0_15 = arith.constant 0 : index
    %c0_16 = arith.constant 0 : index
    %31 = vector.load %arg6[%c0_14, %c0_15, %c0_16] : memref<1x8x64xf32, #tpu.memory_space<vmem>>, vector<1x8x64xf32>
    %32 = vector.shape_cast %31 : vector<1x8x64xf32> to vector<8x64xf32>
    %33 = vector.shape_cast %30 : vector<8x64xf32> to vector<1x8x64xf32>
    tpu.vector_store %arg6[%c0_14, %c0_15, %c0_16], %33 {strides = array<i32>} : memref<1x8x64xf32, #tpu.memory_space<vmem>>, vector<1x8x64xf32>,
    return
  }
  func.func @transform_0(%arg0: i32) -> (i32, i32, i32) {
    %c0_i32 = arith.constant 0 : i32
    %c0_i32_0 = arith.constant 0 : i32
    %c0_i32_1 = arith.constant 0 : i32
    return %arg0, %c0_i32, %c0_i32_0 : i32, i32, i32
  }
  func.func @transform_1(%arg0: i32) -> (i32, i32) {
    %c0_i32 = arith.constant 0 : i32
    %c0_i32_0 = arith.constant 0 : i32
    %c0_i32_1 = arith.constant 0 : i32
    return %c0_i32, %c0_i32_0 : i32, i32
  }
  func.func @transform_2(%arg0: i32) -> (i32, i32) {
    %c0_i32 = arith.constant 0 : i32
    %c0_i32_0 = arith.constant 0 : i32
    %c0_i32_1 = arith.constant 0 : i32
    return %c0_i32, %c0_i32_0 : i32, i32
  }
  func.func @transform_3(%arg0: i32) -> (i32, i32) {
    %c0_i32 = arith.constant 0 : i32
    %c0_i32_0 = arith.constant 0 : i32
    %c0_i32_1 = arith.constant 0 : i32
    return %c0_i32, %c0_i32_0 : i32, i32
  }
  func.func @transform_4(%arg0: i32) -> (i32, i32) {
    %c0_i32 = arith.constant 0 : i32
    %c0_i32_0 = arith.constant 0 : i32
    %c0_i32_1 = arith.constant 0 : i32
    return %c0_i32, %c0_i32_0 : i32, i32
  }
  func.func @transform_5(%arg0: i32) -> (i32, i32, i32) {
    %c0_i32 = arith.constant 0 : i32
    %c0_i32_0 = arith.constant 0 : i32
    %c0_i32_1 = arith.constant 0 : i32
    return %arg0, %c0_i32, %c0_i32_0 : i32, i32, i32
  }
}

module attributes {stable_mosaic.version = 11 : i64} {
  func.func @_encoder_layer_kernel(%arg0: i32, %arg1: memref<1x8x64xf32, #tpu.memory_space<vmem>>, %arg2: memref<64x192xbf16, #tpu.memory_space<vmem>>, %arg3: memref<1x192xf32, #tpu.memory_space<vmem>>, %arg4: memref<64x64xbf16, #tpu.memory_space<vmem>>, %arg5: memref<1x64xf32, #tpu.memory_space<vmem>>, %arg6: memref<1x64xf32, #tpu.memory_space<vmem>>, %arg7: memref<1x64xf32, #tpu.memory_space<vmem>>, %arg8: memref<64x256xbf16, #tpu.memory_space<vmem>>, %arg9: memref<1x256xf32, #tpu.memory_space<vmem>>, %arg10: memref<256x64xbf16, #tpu.memory_space<vmem>>, %arg11: memref<1x64xf32, #tpu.memory_space<vmem>>, %arg12: memref<1x64xf32, #tpu.memory_space<vmem>>, %arg13: memref<1x64xf32, #tpu.memory_space<vmem>>, %arg14: memref<1x8x64xf32, #tpu.memory_space<vmem>>) attributes {dimension_semantics = [#tpu.dimension_semantics<parallel>], iteration_bounds = array<i64: 2>, scalar_prefetch = 0 : i64, scratch_operands = 0 : i64, tpu.core_type = #tpu.core_type<tc>, window_params = [{transform_indices = @transform_0, window_bounds = array<i64: 1, 8, 64>}, {pipeline_mode = #tpu.pipeline_mode<synchronous>, transform_indices = @transform_1, window_bounds = array<i64: 64, 192>}, {pipeline_mode = #tpu.pipeline_mode<synchronous>, transform_indices = @transform_2, window_bounds = array<i64: 1, 192>}, {pipeline_mode = #tpu.pipeline_mode<synchronous>, transform_indices = @transform_3, window_bounds = array<i64: 64, 64>}, {pipeline_mode = #tpu.pipeline_mode<synchronous>, transform_indices = @transform_4, window_bounds = array<i64: 1, 64>}, {pipeline_mode = #tpu.pipeline_mode<synchronous>, transform_indices = @transform_5, window_bounds = array<i64: 1, 64>}, {pipeline_mode = #tpu.pipeline_mode<synchronous>, transform_indices = @transform_6, window_bounds = array<i64: 1, 64>}, {pipeline_mode = #tpu.pipeline_mode<synchronous>, transform_indices = @transform_7, window_bounds = array<i64: 64, 256>}, {pipeline_mode = #tpu.pipeline_mode<synchronous>, transform_indices = @transform_8, window_bounds = array<i64: 1, 256>}, {pipeline_mode = #tpu.pipeline_mode<synchronous>, transform_indices = @transform_9, window_bounds = array<i64: 256, 64>}, {pipeline_mode = #tpu.pipeline_mode<synchronous>, transform_indices = @transform_10, window_bounds = array<i64: 1, 64>}, {pipeline_mode = #tpu.pipeline_mode<synchronous>, transform_indices = @transform_11, window_bounds = array<i64: 1, 64>}, {pipeline_mode = #tpu.pipeline_mode<synchronous>, transform_indices = @transform_12, window_bounds = array<i64: 1, 64>}, {transform_indices = @transform_13, window_bounds = array<i64: 1, 8, 64>}]} {
    %c0 = arith.constant 0 : index
    %c0_0 = arith.constant 0 : index
    %c0_1 = arith.constant 0 : index
    %0 = vector.load %arg1[%c0, %c0_0, %c0_1] : memref<1x8x64xf32, #tpu.memory_space<vmem>>, vector<1x8x64xf32>
    %1 = vector.shape_cast %0 : vector<1x8x64xf32> to vector<8x64xf32>
    %2 = arith.truncf %1 : vector<8x64xf32> to vector<8x64xbf16>
    %c0_2 = arith.constant 0 : index
    %c0_3 = arith.constant 0 : index
    %3 = vector.load %arg2[%c0_2, %c0_3] : memref<64x192xbf16, #tpu.memory_space<vmem>>, vector<64x192xbf16>
    %cst = arith.constant dense<0.000000e+00> : vector<8x192xf32>
    %4 = tpu.matmul %2, %3, %cst {dimension_numbers = #tpu.dot_dimension_numbers<[1], [0], [0], [1], [0, 0, 1, 1], [], []>} : vector<8x64xbf16>, vector<64x192xbf16>, vector<8x192xf32> -> vector<8x192xf32>
    %c0_4 = arith.constant 0 : index
    %c0_5 = arith.constant 0 : index
    %5 = vector.load %arg3[%c0_4, %c0_5] : memref<1x192xf32, #tpu.memory_space<vmem>>, vector<1x192xf32>
    %6 = vector.broadcast %5 : vector<1x192xf32> to vector<8x192xf32>
    %7 = arith.addf %4, %6 : vector<8x192xf32>
    %8 = vector.extract_strided_slice %7 {offsets = [0, 0], sizes = [8, 64], strides = [1, 1]} : vector<8x192xf32> to vector<8x64xf32>
    %9 = vector.extract_strided_slice %7 {offsets = [0, 64], sizes = [8, 64], strides = [1, 1]} : vector<8x192xf32> to vector<8x64xf32>
    %10 = vector.extract_strided_slice %7 {offsets = [0, 128], sizes = [8, 64], strides = [1, 1]} : vector<8x192xf32> to vector<8x64xf32>
    %11 = arith.truncf %8 : vector<8x64xf32> to vector<8x64xbf16>
    %12 = arith.truncf %9 : vector<8x64xf32> to vector<8x64xbf16>
    %13 = arith.truncf %10 : vector<8x64xf32> to vector<8x64xbf16>
    %cst_6 = arith.constant dense<0.000000e+00> : vector<8x8xf32>
    %14 = tpu.matmul %11, %12, %cst_6 {dimension_numbers = #tpu.dot_dimension_numbers<[1], [1], [0], [0], [0, 0, 1, 0], [], []>} : vector<8x64xbf16>, vector<8x64xbf16>, vector<8x8xf32> -> vector<8x8xf32>
    %cst_7 = arith.constant 1.250000e-01 : f32
    %15 = vector.broadcast %cst_7 : f32 to vector<8x8xf32>
    %16 = arith.mulf %14, %15 : vector<8x8xf32>
    %cst_8 = arith.constant dense<0xFF800000> : vector<8xf32>
    %17 = vector.multi_reduction <maximumf>, %16, %cst_8 [1] : vector<8x8xf32> to vector<8xf32>
    %18 = vector.shape_cast %17 : vector<8xf32> to vector<8x1xf32>
    %19 = vector.broadcast %18 : vector<8x1xf32> to vector<8x8xf32>
    %20 = arith.subf %16, %19 : vector<8x8xf32>
    %21 = math.exp %20 : vector<8x8xf32>
    %cst_9 = arith.constant dense<0.000000e+00> : vector<8xf32>
    %22 = vector.multi_reduction <add>, %21, %cst_9 [1] : vector<8x8xf32> to vector<8xf32>
    %23 = vector.shape_cast %22 : vector<8xf32> to vector<8x1xf32>
    %24 = tpu.reciprocal %23 {approx = true} : vector<8x1xf32> -> vector<8x1xf32>
    %25 = vector.broadcast %24 : vector<8x1xf32> to vector<8x8xf32>
    %26 = arith.mulf %21, %25 : vector<8x8xf32>
    %27 = arith.truncf %26 : vector<8x8xf32> to vector<8x8xbf16>
    %cst_10 = arith.constant dense<0.000000e+00> : vector<8x64xf32>
    %28 = tpu.matmul %27, %13, %cst_10 {dimension_numbers = #tpu.dot_dimension_numbers<[1], [0], [0], [1], [0, 0, 1, 1], [], []>} : vector<8x8xbf16>, vector<8x64xbf16>, vector<8x64xf32> -> vector<8x64xf32>
    %29 = arith.truncf %28 : vector<8x64xf32> to vector<8x64xbf16>
    %c0_11 = arith.constant 0 : index
    %c0_12 = arith.constant 0 : index
    %30 = vector.load %arg4[%c0_11, %c0_12] : memref<64x64xbf16, #tpu.memory_space<vmem>>, vector<64x64xbf16>
    %cst_13 = arith.constant dense<0.000000e+00> : vector<8x64xf32>
    %31 = tpu.matmul %29, %30, %cst_13 {dimension_numbers = #tpu.dot_dimension_numbers<[1], [0], [0], [1], [0, 0, 1, 1], [], []>} : vector<8x64xbf16>, vector<64x64xbf16>, vector<8x64xf32> -> vector<8x64xf32>
    %c0_14 = arith.constant 0 : index
    %c0_15 = arith.constant 0 : index
    %32 = vector.load %arg5[%c0_14, %c0_15] : memref<1x64xf32, #tpu.memory_space<vmem>>, vector<1x64xf32>
    %33 = vector.broadcast %32 : vector<1x64xf32> to vector<8x64xf32>
    %34 = arith.addf %31, %33 : vector<8x64xf32>
    %35 = arith.addf %1, %34 : vector<8x64xf32>
    %c0_16 = arith.constant 0 : index
    %c0_17 = arith.constant 0 : index
    %36 = vector.load %arg6[%c0_16, %c0_17] : memref<1x64xf32, #tpu.memory_space<vmem>>, vector<1x64xf32>
    %c0_18 = arith.constant 0 : index
    %c0_19 = arith.constant 0 : index
    %37 = vector.load %arg7[%c0_18, %c0_19] : memref<1x64xf32, #tpu.memory_space<vmem>>, vector<1x64xf32>
    %cst_20 = arith.constant dense<0.000000e+00> : vector<8xf32>
    %38 = vector.multi_reduction <add>, %35, %cst_20 [1] : vector<8x64xf32> to vector<8xf32>
    %39 = vector.shape_cast %38 : vector<8xf32> to vector<8x1xf32>
    %cst_21 = arith.constant 6.400000e+01 : f32
    %40 = vector.broadcast %cst_21 : f32 to vector<8x1xf32>
    %41 = arith.divf %39, %40 : vector<8x1xf32>
    %42 = vector.broadcast %41 : vector<8x1xf32> to vector<8x64xf32>
    %43 = arith.subf %35, %42 : vector<8x64xf32>
    %44 = arith.mulf %43, %43 : vector<8x64xf32>
    %cst_22 = arith.constant dense<0.000000e+00> : vector<8xf32>
    %45 = vector.multi_reduction <add>, %44, %cst_22 [1] : vector<8x64xf32> to vector<8xf32>
    %46 = vector.shape_cast %45 : vector<8xf32> to vector<8x1xf32>
    %cst_23 = arith.constant 6.400000e+01 : f32
    %47 = vector.broadcast %cst_23 : f32 to vector<8x1xf32>
    %48 = arith.divf %46, %47 : vector<8x1xf32>
    %49 = vector.broadcast %41 : vector<8x1xf32> to vector<8x64xf32>
    %50 = arith.subf %35, %49 : vector<8x64xf32>
    %cst_24 = arith.constant 9.99999974E-6 : f32
    %51 = vector.broadcast %cst_24 : f32 to vector<8x1xf32>
    %52 = arith.addf %48, %51 : vector<8x1xf32>
    %53 = math.rsqrt %52 : vector<8x1xf32>
    %54 = vector.broadcast %53 : vector<8x1xf32> to vector<8x64xf32>
    %55 = arith.mulf %50, %54 : vector<8x64xf32>
    %56 = vector.broadcast %36 : vector<1x64xf32> to vector<8x64xf32>
    %57 = arith.mulf %55, %56 : vector<8x64xf32>
    %58 = vector.broadcast %37 : vector<1x64xf32> to vector<8x64xf32>
    %59 = arith.addf %57, %58 : vector<8x64xf32>
    %60 = arith.truncf %59 : vector<8x64xf32> to vector<8x64xbf16>
    %c0_25 = arith.constant 0 : index
    %c0_26 = arith.constant 0 : index
    %61 = vector.load %arg8[%c0_25, %c0_26] : memref<64x256xbf16, #tpu.memory_space<vmem>>, vector<64x256xbf16>
    %cst_27 = arith.constant dense<0.000000e+00> : vector<8x256xf32>
    %62 = tpu.matmul %60, %61, %cst_27 {dimension_numbers = #tpu.dot_dimension_numbers<[1], [0], [0], [1], [0, 0, 1, 1], [], []>} : vector<8x64xbf16>, vector<64x256xbf16>, vector<8x256xf32> -> vector<8x256xf32>
    %c0_28 = arith.constant 0 : index
    %c0_29 = arith.constant 0 : index
    %63 = vector.load %arg9[%c0_28, %c0_29] : memref<1x256xf32, #tpu.memory_space<vmem>>, vector<1x256xf32>
    %64 = vector.broadcast %63 : vector<1x256xf32> to vector<8x256xf32>
    %65 = arith.addf %62, %64 : vector<8x256xf32>
    %cst_30 = arith.constant 0.000000e+00 : f32
    %66 = vector.broadcast %cst_30 : f32 to vector<8x256xf32>
    %67 = arith.maximumf %65, %66 : vector<8x256xf32>
    %68 = arith.truncf %67 : vector<8x256xf32> to vector<8x256xbf16>
    %c0_31 = arith.constant 0 : index
    %c0_32 = arith.constant 0 : index
    %69 = vector.load %arg10[%c0_31, %c0_32] : memref<256x64xbf16, #tpu.memory_space<vmem>>, vector<256x64xbf16>
    %cst_33 = arith.constant dense<0.000000e+00> : vector<8x64xf32>
    %70 = tpu.matmul %68, %69, %cst_33 {dimension_numbers = #tpu.dot_dimension_numbers<[1], [0], [0], [1], [0, 0, 1, 1], [], []>} : vector<8x256xbf16>, vector<256x64xbf16>, vector<8x64xf32> -> vector<8x64xf32>
    %c0_34 = arith.constant 0 : index
    %c0_35 = arith.constant 0 : index
    %71 = vector.load %arg11[%c0_34, %c0_35] : memref<1x64xf32, #tpu.memory_space<vmem>>, vector<1x64xf32>
    %72 = vector.broadcast %71 : vector<1x64xf32> to vector<8x64xf32>
    %73 = arith.addf %70, %72 : vector<8x64xf32>
    %74 = arith.addf %59, %73 : vector<8x64xf32>
    %c0_36 = arith.constant 0 : index
    %c0_37 = arith.constant 0 : index
    %75 = vector.load %arg12[%c0_36, %c0_37] : memref<1x64xf32, #tpu.memory_space<vmem>>, vector<1x64xf32>
    %c0_38 = arith.constant 0 : index
    %c0_39 = arith.constant 0 : index
    %76 = vector.load %arg13[%c0_38, %c0_39] : memref<1x64xf32, #tpu.memory_space<vmem>>, vector<1x64xf32>
    %cst_40 = arith.constant dense<0.000000e+00> : vector<8xf32>
    %77 = vector.multi_reduction <add>, %74, %cst_40 [1] : vector<8x64xf32> to vector<8xf32>
    %78 = vector.shape_cast %77 : vector<8xf32> to vector<8x1xf32>
    %cst_41 = arith.constant 6.400000e+01 : f32
    %79 = vector.broadcast %cst_41 : f32 to vector<8x1xf32>
    %80 = arith.divf %78, %79 : vector<8x1xf32>
    %81 = vector.broadcast %80 : vector<8x1xf32> to vector<8x64xf32>
    %82 = arith.subf %74, %81 : vector<8x64xf32>
    %83 = arith.mulf %82, %82 : vector<8x64xf32>
    %cst_42 = arith.constant dense<0.000000e+00> : vector<8xf32>
    %84 = vector.multi_reduction <add>, %83, %cst_42 [1] : vector<8x64xf32> to vector<8xf32>
    %85 = vector.shape_cast %84 : vector<8xf32> to vector<8x1xf32>
    %cst_43 = arith.constant 6.400000e+01 : f32
    %86 = vector.broadcast %cst_43 : f32 to vector<8x1xf32>
    %87 = arith.divf %85, %86 : vector<8x1xf32>
    %88 = vector.broadcast %80 : vector<8x1xf32> to vector<8x64xf32>
    %89 = arith.subf %74, %88 : vector<8x64xf32>
    %cst_44 = arith.constant 9.99999974E-6 : f32
    %90 = vector.broadcast %cst_44 : f32 to vector<8x1xf32>
    %91 = arith.addf %87, %90 : vector<8x1xf32>
    %92 = math.rsqrt %91 : vector<8x1xf32>
    %93 = vector.broadcast %92 : vector<8x1xf32> to vector<8x64xf32>
    %94 = arith.mulf %89, %93 : vector<8x64xf32>
    %95 = vector.broadcast %75 : vector<1x64xf32> to vector<8x64xf32>
    %96 = arith.mulf %94, %95 : vector<8x64xf32>
    %97 = vector.broadcast %76 : vector<1x64xf32> to vector<8x64xf32>
    %98 = arith.addf %96, %97 : vector<8x64xf32>
    %c0_45 = arith.constant 0 : index
    %c0_46 = arith.constant 0 : index
    %c0_47 = arith.constant 0 : index
    %99 = vector.load %arg14[%c0_45, %c0_46, %c0_47] : memref<1x8x64xf32, #tpu.memory_space<vmem>>, vector<1x8x64xf32>
    %100 = vector.shape_cast %99 : vector<1x8x64xf32> to vector<8x64xf32>
    %101 = vector.shape_cast %98 : vector<8x64xf32> to vector<1x8x64xf32>
    tpu.vector_store %arg14[%c0_45, %c0_46, %c0_47], %101 {strides = array<i32>} : memref<1x8x64xf32, #tpu.memory_space<vmem>>, vector<1x8x64xf32>,
    return
  }
  func.func @transform_0(%arg0: i32) -> (i32, i32, i32) {
    %c0_i32 = arith.constant 0 : i32
    %c0_i32_0 = arith.constant 0 : i32
    %c0_i32_1 = arith.constant 0 : i32
    return %arg0, %c0_i32, %c0_i32_0 : i32, i32, i32
  }
  func.func @transform_1(%arg0: i32) -> (i32, i32) {
    %c0_i32 = arith.constant 0 : i32
    %c0_i32_0 = arith.constant 0 : i32
    %c0_i32_1 = arith.constant 0 : i32
    return %c0_i32, %c0_i32_0 : i32, i32
  }
  func.func @transform_2(%arg0: i32) -> (i32, i32) {
    %c0_i32 = arith.constant 0 : i32
    %c0_i32_0 = arith.constant 0 : i32
    %c0_i32_1 = arith.constant 0 : i32
    return %c0_i32, %c0_i32_0 : i32, i32
  }
  func.func @transform_3(%arg0: i32) -> (i32, i32) {
    %c0_i32 = arith.constant 0 : i32
    %c0_i32_0 = arith.constant 0 : i32
    %c0_i32_1 = arith.constant 0 : i32
    return %c0_i32, %c0_i32_0 : i32, i32
  }
  func.func @transform_4(%arg0: i32) -> (i32, i32) {
    %c0_i32 = arith.constant 0 : i32
    %c0_i32_0 = arith.constant 0 : i32
    %c0_i32_1 = arith.constant 0 : i32
    return %c0_i32, %c0_i32_0 : i32, i32
  }
  func.func @transform_5(%arg0: i32) -> (i32, i32) {
    %c0_i32 = arith.constant 0 : i32
    %c0_i32_0 = arith.constant 0 : i32
    %c0_i32_1 = arith.constant 0 : i32
    return %c0_i32, %c0_i32_0 : i32, i32
  }
  func.func @transform_6(%arg0: i32) -> (i32, i32) {
    %c0_i32 = arith.constant 0 : i32
    %c0_i32_0 = arith.constant 0 : i32
    %c0_i32_1 = arith.constant 0 : i32
    return %c0_i32, %c0_i32_0 : i32, i32
  }
  func.func @transform_7(%arg0: i32) -> (i32, i32) {
    %c0_i32 = arith.constant 0 : i32
    %c0_i32_0 = arith.constant 0 : i32
    %c0_i32_1 = arith.constant 0 : i32
    return %c0_i32, %c0_i32_0 : i32, i32
  }
  func.func @transform_8(%arg0: i32) -> (i32, i32) {
    %c0_i32 = arith.constant 0 : i32
    %c0_i32_0 = arith.constant 0 : i32
    %c0_i32_1 = arith.constant 0 : i32
    return %c0_i32, %c0_i32_0 : i32, i32
  }
  func.func @transform_9(%arg0: i32) -> (i32, i32) {
    %c0_i32 = arith.constant 0 : i32
    %c0_i32_0 = arith.constant 0 : i32
    %c0_i32_1 = arith.constant 0 : i32
    return %c0_i32, %c0_i32_0 : i32, i32
  }
  func.func @transform_10(%arg0: i32) -> (i32, i32) {
    %c0_i32 = arith.constant 0 : i32
    %c0_i32_0 = arith.constant 0 : i32
    %c0_i32_1 = arith.constant 0 : i32
    return %c0_i32, %c0_i32_0 : i32, i32
  }
  func.func @transform_11(%arg0: i32) -> (i32, i32) {
    %c0_i32 = arith.constant 0 : i32
    %c0_i32_0 = arith.constant 0 : i32
    %c0_i32_1 = arith.constant 0 : i32
    return %c0_i32, %c0_i32_0 : i32, i32
  }
  func.func @transform_12(%arg0: i32) -> (i32, i32) {
    %c0_i32 = arith.constant 0 : i32
    %c0_i32_0 = arith.constant 0 : i32
    %c0_i32_1 = arith.constant 0 : i32
    return %c0_i32, %c0_i32_0 : i32, i32
  }
  func.func @transform_13(%arg0: i32) -> (i32, i32, i32) {
    %c0_i32 = arith.constant 0 : i32
    %c0_i32_0 = arith.constant 0 : i32
    %c0_i32_1 = arith.constant 0 : i32
    return %arg0, %c0_i32, %c0_i32_0 : i32, i32, i32
  }
}

module attributes {stable_mosaic.version = 11 : i64} {
  func.func @_query_block_kernel(%arg0: i32, %arg1: memref<1x16x64xf32, #tpu.memory_space<vmem>>, %arg2: memref<1x8x64xf32, #tpu.memory_space<vmem>>, %arg3: memref<64x64xbf16, #tpu.memory_space<vmem>>, %arg4: memref<1x64xf32, #tpu.memory_space<vmem>>, %arg5: memref<64x192xbf16, #tpu.memory_space<vmem>>, %arg6: memref<1x192xf32, #tpu.memory_space<vmem>>, %arg7: memref<64x64xbf16, #tpu.memory_space<vmem>>, %arg8: memref<1x64xf32, #tpu.memory_space<vmem>>, %arg9: memref<1x64xf32, #tpu.memory_space<vmem>>, %arg10: memref<1x64xf32, #tpu.memory_space<vmem>>, %arg11: memref<64x64xbf16, #tpu.memory_space<vmem>>, %arg12: memref<1x64xf32, #tpu.memory_space<vmem>>, %arg13: memref<64x128xbf16, #tpu.memory_space<vmem>>, %arg14: memref<1x128xf32, #tpu.memory_space<vmem>>, %arg15: memref<64x64xbf16, #tpu.memory_space<vmem>>, %arg16: memref<1x64xf32, #tpu.memory_space<vmem>>, %arg17: memref<1x64xf32, #tpu.memory_space<vmem>>, %arg18: memref<1x64xf32, #tpu.memory_space<vmem>>, %arg19: memref<64x16xbf16, #tpu.memory_space<vmem>>, %arg20: memref<1x16xf32, #tpu.memory_space<vmem>>, %arg21: memref<16x1xbf16, #tpu.memory_space<vmem>>, %arg22: memref<1x1xf32, #tpu.memory_space<vmem>>, %arg23: memref<1x16x64xf32, #tpu.memory_space<vmem>>, %arg24: memref<1x16x64xf32, #tpu.memory_space<vmem>>, %arg25: memref<1x16x8xf32, #tpu.memory_space<vmem>>, %arg26: memref<1x16x64xf32, #tpu.memory_space<vmem>>) attributes {dimension_semantics = [#tpu.dimension_semantics<parallel>], iteration_bounds = array<i64: 2>, scalar_prefetch = 0 : i64, scratch_operands = 0 : i64, tpu.core_type = #tpu.core_type<tc>, window_params = [{transform_indices = @transform_0, window_bounds = array<i64: 1, 16, 64>}, {transform_indices = @transform_1, window_bounds = array<i64: 1, 8, 64>}, {pipeline_mode = #tpu.pipeline_mode<synchronous>, transform_indices = @transform_2, window_bounds = array<i64: 64, 64>}, {pipeline_mode = #tpu.pipeline_mode<synchronous>, transform_indices = @transform_3, window_bounds = array<i64: 1, 64>}, {pipeline_mode = #tpu.pipeline_mode<synchronous>, transform_indices = @transform_4, window_bounds = array<i64: 64, 192>}, {pipeline_mode = #tpu.pipeline_mode<synchronous>, transform_indices = @transform_5, window_bounds = array<i64: 1, 192>}, {pipeline_mode = #tpu.pipeline_mode<synchronous>, transform_indices = @transform_6, window_bounds = array<i64: 64, 64>}, {pipeline_mode = #tpu.pipeline_mode<synchronous>, transform_indices = @transform_7, window_bounds = array<i64: 1, 64>}, {pipeline_mode = #tpu.pipeline_mode<synchronous>, transform_indices = @transform_8, window_bounds = array<i64: 1, 64>}, {pipeline_mode = #tpu.pipeline_mode<synchronous>, transform_indices = @transform_9, window_bounds = array<i64: 1, 64>}, {pipeline_mode = #tpu.pipeline_mode<synchronous>, transform_indices = @transform_10, window_bounds = array<i64: 64, 64>}, {pipeline_mode = #tpu.pipeline_mode<synchronous>, transform_indices = @transform_11, window_bounds = array<i64: 1, 64>}, {pipeline_mode = #tpu.pipeline_mode<synchronous>, transform_indices = @transform_12, window_bounds = array<i64: 64, 128>}, {pipeline_mode = #tpu.pipeline_mode<synchronous>, transform_indices = @transform_13, window_bounds = array<i64: 1, 128>}, {pipeline_mode = #tpu.pipeline_mode<synchronous>, transform_indices = @transform_14, window_bounds = array<i64: 64, 64>}, {pipeline_mode = #tpu.pipeline_mode<synchronous>, transform_indices = @transform_15, window_bounds = array<i64: 1, 64>}, {pipeline_mode = #tpu.pipeline_mode<synchronous>, transform_indices = @transform_16, window_bounds = array<i64: 1, 64>}, {pipeline_mode = #tpu.pipeline_mode<synchronous>, transform_indices = @transform_17, window_bounds = array<i64: 1, 64>}, {pipeline_mode = #tpu.pipeline_mode<synchronous>, transform_indices = @transform_18, window_bounds = array<i64: 64, 16>}, {pipeline_mode = #tpu.pipeline_mode<synchronous>, transform_indices = @transform_19, window_bounds = array<i64: 1, 16>}, {pipeline_mode = #tpu.pipeline_mode<synchronous>, transform_indices = @transform_20, window_bounds = array<i64: 16, 1>}, {pipeline_mode = #tpu.pipeline_mode<synchronous>, transform_indices = @transform_21, window_bounds = array<i64: 1, 1>}, {transform_indices = @transform_22, window_bounds = array<i64: 1, 16, 64>}, {transform_indices = @transform_23, window_bounds = array<i64: 1, 16, 64>}, {transform_indices = @transform_24, window_bounds = array<i64: 1, 16, 8>}, {transform_indices = @transform_25, window_bounds = array<i64: 1, 16, 64>}]} {
    %c0 = arith.constant 0 : index
    %c0_0 = arith.constant 0 : index
    %c0_1 = arith.constant 0 : index
    %0 = vector.load %arg1[%c0, %c0_0, %c0_1] : memref<1x16x64xf32, #tpu.memory_space<vmem>>, vector<1x16x64xf32>
    %1 = vector.shape_cast %0 : vector<1x16x64xf32> to vector<16x64xf32>
    %c0_2 = arith.constant 0 : index
    %c0_3 = arith.constant 0 : index
    %c0_4 = arith.constant 0 : index
    %2 = vector.load %arg2[%c0_2, %c0_3, %c0_4] : memref<1x8x64xf32, #tpu.memory_space<vmem>>, vector<1x8x64xf32>
    %3 = vector.shape_cast %2 : vector<1x8x64xf32> to vector<8x64xf32>
    %4 = arith.truncf %3 : vector<8x64xf32> to vector<8x64xbf16>
    %5 = arith.truncf %1 : vector<16x64xf32> to vector<16x64xbf16>
    %c0_5 = arith.constant 0 : index
    %c0_6 = arith.constant 0 : index
    %6 = vector.load %arg3[%c0_5, %c0_6] : memref<64x64xbf16, #tpu.memory_space<vmem>>, vector<64x64xbf16>
    %cst = arith.constant dense<0.000000e+00> : vector<16x64xf32>
    %7 = tpu.matmul %5, %6, %cst {dimension_numbers = #tpu.dot_dimension_numbers<[1], [0], [0], [1], [0, 0, 1, 1], [], []>} : vector<16x64xbf16>, vector<64x64xbf16>, vector<16x64xf32> -> vector<16x64xf32>
    %c0_7 = arith.constant 0 : index
    %c0_8 = arith.constant 0 : index
    %8 = vector.load %arg4[%c0_7, %c0_8] : memref<1x64xf32, #tpu.memory_space<vmem>>, vector<1x64xf32>
    %9 = vector.broadcast %8 : vector<1x64xf32> to vector<16x64xf32>
    %10 = arith.addf %7, %9 : vector<16x64xf32>
    %11 = arith.truncf %10 : vector<16x64xf32> to vector<16x64xbf16>
    %c0_9 = arith.constant 0 : index
    %c0_10 = arith.constant 0 : index
    %12 = vector.load %arg5[%c0_9, %c0_10] : memref<64x192xbf16, #tpu.memory_space<vmem>>, vector<64x192xbf16>
    %cst_11 = arith.constant dense<0.000000e+00> : vector<16x192xf32>
    %13 = tpu.matmul %11, %12, %cst_11 {dimension_numbers = #tpu.dot_dimension_numbers<[1], [0], [0], [1], [0, 0, 1, 1], [], []>} : vector<16x64xbf16>, vector<64x192xbf16>, vector<16x192xf32> -> vector<16x192xf32>
    %c0_12 = arith.constant 0 : index
    %c0_13 = arith.constant 0 : index
    %14 = vector.load %arg6[%c0_12, %c0_13] : memref<1x192xf32, #tpu.memory_space<vmem>>, vector<1x192xf32>
    %15 = vector.broadcast %14 : vector<1x192xf32> to vector<16x192xf32>
    %16 = arith.addf %13, %15 : vector<16x192xf32>
    %17 = vector.extract_strided_slice %16 {offsets = [0, 0], sizes = [16, 64], strides = [1, 1]} : vector<16x192xf32> to vector<16x64xf32>
    %18 = vector.extract_strided_slice %16 {offsets = [0, 64], sizes = [16, 64], strides = [1, 1]} : vector<16x192xf32> to vector<16x64xf32>
    %19 = vector.extract_strided_slice %16 {offsets = [0, 128], sizes = [16, 64], strides = [1, 1]} : vector<16x192xf32> to vector<16x64xf32>
    %20 = arith.truncf %17 : vector<16x64xf32> to vector<16x64xbf16>
    %21 = arith.truncf %18 : vector<16x64xf32> to vector<16x64xbf16>
    %22 = arith.truncf %19 : vector<16x64xf32> to vector<16x64xbf16>
    %cst_14 = arith.constant dense<0.000000e+00> : vector<16x16xf32>
    %23 = tpu.matmul %20, %21, %cst_14 {dimension_numbers = #tpu.dot_dimension_numbers<[1], [1], [0], [0], [0, 0, 1, 0], [], []>} : vector<16x64xbf16>, vector<16x64xbf16>, vector<16x16xf32> -> vector<16x16xf32>
    %cst_15 = arith.constant 1.250000e-01 : f32
    %24 = vector.broadcast %cst_15 : f32 to vector<16x16xf32>
    %25 = arith.mulf %23, %24 : vector<16x16xf32>
    %cst_16 = arith.constant dense<0xFF800000> : vector<16xf32>
    %26 = vector.multi_reduction <maximumf>, %25, %cst_16 [1] : vector<16x16xf32> to vector<16xf32>
    %27 = vector.shape_cast %26 : vector<16xf32> to vector<16x1xf32>
    %28 = vector.broadcast %27 : vector<16x1xf32> to vector<16x16xf32>
    %29 = arith.subf %25, %28 : vector<16x16xf32>
    %30 = math.exp %29 : vector<16x16xf32>
    %cst_17 = arith.constant dense<0.000000e+00> : vector<16xf32>
    %31 = vector.multi_reduction <add>, %30, %cst_17 [1] : vector<16x16xf32> to vector<16xf32>
    %32 = vector.shape_cast %31 : vector<16xf32> to vector<16x1xf32>
    %33 = tpu.reciprocal %32 {approx = true} : vector<16x1xf32> -> vector<16x1xf32>
    %34 = vector.broadcast %33 : vector<16x1xf32> to vector<16x16xf32>
    %35 = arith.mulf %30, %34 : vector<16x16xf32>
    %36 = arith.truncf %35 : vector<16x16xf32> to vector<16x16xbf16>
    %cst_18 = arith.constant dense<0.000000e+00> : vector<16x64xf32>
    %37 = tpu.matmul %36, %22, %cst_18 {dimension_numbers = #tpu.dot_dimension_numbers<[1], [0], [0], [1], [0, 0, 1, 1], [], []>} : vector<16x16xbf16>, vector<16x64xbf16>, vector<16x64xf32> -> vector<16x64xf32>
    %38 = arith.truncf %37 : vector<16x64xf32> to vector<16x64xbf16>
    %c0_19 = arith.constant 0 : index
    %c0_20 = arith.constant 0 : index
    %39 = vector.load %arg7[%c0_19, %c0_20] : memref<64x64xbf16, #tpu.memory_space<vmem>>, vector<64x64xbf16>
    %cst_21 = arith.constant dense<0.000000e+00> : vector<16x64xf32>
    %40 = tpu.matmul %38, %39, %cst_21 {dimension_numbers = #tpu.dot_dimension_numbers<[1], [0], [0], [1], [0, 0, 1, 1], [], []>} : vector<16x64xbf16>, vector<64x64xbf16>, vector<16x64xf32> -> vector<16x64xf32>
    %c0_22 = arith.constant 0 : index
    %c0_23 = arith.constant 0 : index
    %41 = vector.load %arg8[%c0_22, %c0_23] : memref<1x64xf32, #tpu.memory_space<vmem>>, vector<1x64xf32>
    %42 = vector.broadcast %41 : vector<1x64xf32> to vector<16x64xf32>
    %43 = arith.addf %40, %42 : vector<16x64xf32>
    %44 = arith.addf %10, %43 : vector<16x64xf32>
    %c0_24 = arith.constant 0 : index
    %c0_25 = arith.constant 0 : index
    %45 = vector.load %arg9[%c0_24, %c0_25] : memref<1x64xf32, #tpu.memory_space<vmem>>, vector<1x64xf32>
    %c0_26 = arith.constant 0 : index
    %c0_27 = arith.constant 0 : index
    %46 = vector.load %arg10[%c0_26, %c0_27] : memref<1x64xf32, #tpu.memory_space<vmem>>, vector<1x64xf32>
    %cst_28 = arith.constant dense<0.000000e+00> : vector<16xf32>
    %47 = vector.multi_reduction <add>, %44, %cst_28 [1] : vector<16x64xf32> to vector<16xf32>
    %48 = vector.shape_cast %47 : vector<16xf32> to vector<16x1xf32>
    %cst_29 = arith.constant 6.400000e+01 : f32
    %49 = vector.broadcast %cst_29 : f32 to vector<16x1xf32>
    %50 = arith.divf %48, %49 : vector<16x1xf32>
    %51 = vector.broadcast %50 : vector<16x1xf32> to vector<16x64xf32>
    %52 = arith.subf %44, %51 : vector<16x64xf32>
    %53 = arith.mulf %52, %52 : vector<16x64xf32>
    %cst_30 = arith.constant dense<0.000000e+00> : vector<16xf32>
    %54 = vector.multi_reduction <add>, %53, %cst_30 [1] : vector<16x64xf32> to vector<16xf32>
    %55 = vector.shape_cast %54 : vector<16xf32> to vector<16x1xf32>
    %cst_31 = arith.constant 6.400000e+01 : f32
    %56 = vector.broadcast %cst_31 : f32 to vector<16x1xf32>
    %57 = arith.divf %55, %56 : vector<16x1xf32>
    %58 = vector.broadcast %50 : vector<16x1xf32> to vector<16x64xf32>
    %59 = arith.subf %44, %58 : vector<16x64xf32>
    %cst_32 = arith.constant 9.99999974E-6 : f32
    %60 = vector.broadcast %cst_32 : f32 to vector<16x1xf32>
    %61 = arith.addf %57, %60 : vector<16x1xf32>
    %62 = math.rsqrt %61 : vector<16x1xf32>
    %63 = vector.broadcast %62 : vector<16x1xf32> to vector<16x64xf32>
    %64 = arith.mulf %59, %63 : vector<16x64xf32>
    %65 = vector.broadcast %45 : vector<1x64xf32> to vector<16x64xf32>
    %66 = arith.mulf %64, %65 : vector<16x64xf32>
    %67 = vector.broadcast %46 : vector<1x64xf32> to vector<16x64xf32>
    %68 = arith.addf %66, %67 : vector<16x64xf32>
    %c0_33 = arith.constant 0 : index
    %c0_34 = arith.constant 0 : index
    %c0_35 = arith.constant 0 : index
    %69 = vector.load %arg26[%c0_33, %c0_34, %c0_35] : memref<1x16x64xf32, #tpu.memory_space<vmem>>, vector<1x16x64xf32>
    %70 = vector.shape_cast %69 : vector<1x16x64xf32> to vector<16x64xf32>
    %71 = vector.shape_cast %68 : vector<16x64xf32> to vector<1x16x64xf32>
    tpu.vector_store %arg26[%c0_33, %c0_34, %c0_35], %71 {strides = array<i32>} : memref<1x16x64xf32, #tpu.memory_space<vmem>>, vector<1x16x64xf32>,
    %72 = arith.truncf %68 : vector<16x64xf32> to vector<16x64xbf16>
    %c0_36 = arith.constant 0 : index
    %c0_37 = arith.constant 0 : index
    %73 = vector.load %arg11[%c0_36, %c0_37] : memref<64x64xbf16, #tpu.memory_space<vmem>>, vector<64x64xbf16>
    %cst_38 = arith.constant dense<0.000000e+00> : vector<16x64xf32>
    %74 = tpu.matmul %72, %73, %cst_38 {dimension_numbers = #tpu.dot_dimension_numbers<[1], [0], [0], [1], [0, 0, 1, 1], [], []>} : vector<16x64xbf16>, vector<64x64xbf16>, vector<16x64xf32> -> vector<16x64xf32>
    %c0_39 = arith.constant 0 : index
    %c0_40 = arith.constant 0 : index
    %75 = vector.load %arg12[%c0_39, %c0_40] : memref<1x64xf32, #tpu.memory_space<vmem>>, vector<1x64xf32>
    %76 = vector.broadcast %75 : vector<1x64xf32> to vector<16x64xf32>
    %77 = arith.addf %74, %76 : vector<16x64xf32>
    %c0_41 = arith.constant 0 : index
    %c0_42 = arith.constant 0 : index
    %78 = vector.load %arg13[%c0_41, %c0_42] : memref<64x128xbf16, #tpu.memory_space<vmem>>, vector<64x128xbf16>
    %cst_43 = arith.constant dense<0.000000e+00> : vector<8x128xf32>
    %79 = tpu.matmul %4, %78, %cst_43 {dimension_numbers = #tpu.dot_dimension_numbers<[1], [0], [0], [1], [0, 0, 1, 1], [], []>} : vector<8x64xbf16>, vector<64x128xbf16>, vector<8x128xf32> -> vector<8x128xf32>
    %c0_44 = arith.constant 0 : index
    %c0_45 = arith.constant 0 : index
    %80 = vector.load %arg14[%c0_44, %c0_45] : memref<1x128xf32, #tpu.memory_space<vmem>>, vector<1x128xf32>
    %81 = vector.broadcast %80 : vector<1x128xf32> to vector<8x128xf32>
    %82 = arith.addf %79, %81 : vector<8x128xf32>
    %83 = vector.extract_strided_slice %82 {offsets = [0, 0], sizes = [8, 64], strides = [1, 1]} : vector<8x128xf32> to vector<8x64xf32>
    %84 = vector.extract_strided_slice %82 {offsets = [0, 64], sizes = [8, 64], strides = [1, 1]} : vector<8x128xf32> to vector<8x64xf32>
    %85 = arith.truncf %77 : vector<16x64xf32> to vector<16x64xbf16>
    %86 = arith.truncf %83 : vector<8x64xf32> to vector<8x64xbf16>
    %87 = arith.truncf %84 : vector<8x64xf32> to vector<8x64xbf16>
    %cst_46 = arith.constant dense<0.000000e+00> : vector<16x8xf32>
    %88 = tpu.matmul %85, %86, %cst_46 {dimension_numbers = #tpu.dot_dimension_numbers<[1], [1], [0], [0], [0, 0, 1, 0], [], []>} : vector<16x64xbf16>, vector<8x64xbf16>, vector<16x8xf32> -> vector<16x8xf32>
    %cst_47 = arith.constant 1.250000e-01 : f32
    %89 = vector.broadcast %cst_47 : f32 to vector<16x8xf32>
    %90 = arith.mulf %88, %89 : vector<16x8xf32>
    %cst_48 = arith.constant dense<0xFF800000> : vector<16xf32>
    %91 = vector.multi_reduction <maximumf>, %90, %cst_48 [1] : vector<16x8xf32> to vector<16xf32>
    %92 = vector.shape_cast %91 : vector<16xf32> to vector<16x1xf32>
    %93 = vector.broadcast %92 : vector<16x1xf32> to vector<16x8xf32>
    %94 = arith.subf %90, %93 : vector<16x8xf32>
    %95 = math.exp %94 : vector<16x8xf32>
    %cst_49 = arith.constant dense<0.000000e+00> : vector<16xf32>
    %96 = vector.multi_reduction <add>, %95, %cst_49 [1] : vector<16x8xf32> to vector<16xf32>
    %97 = vector.shape_cast %96 : vector<16xf32> to vector<16x1xf32>
    %98 = vector.broadcast %97 : vector<16x1xf32> to vector<16x8xf32>
    %99 = arith.divf %95, %98 : vector<16x8xf32>
    %100 = arith.truncf %99 : vector<16x8xf32> to vector<16x8xbf16>
    %cst_50 = arith.constant dense<0.000000e+00> : vector<16x64xf32>
    %101 = tpu.matmul %100, %87, %cst_50 {dimension_numbers = #tpu.dot_dimension_numbers<[1], [0], [0], [1], [0, 0, 1, 1], [], []>} : vector<16x8xbf16>, vector<8x64xbf16>, vector<16x64xf32> -> vector<16x64xf32>
    %cst_51 = arith.constant 1.000000e+00 : f32
    %102 = vector.broadcast %cst_51 : f32 to vector<16x8xf32>
    %103 = arith.mulf %99, %102 : vector<16x8xf32>
    %c0_52 = arith.constant 0 : index
    %c0_53 = arith.constant 0 : index
    %c0_54 = arith.constant 0 : index
    %104 = vector.load %arg25[%c0_52, %c0_53, %c0_54] : memref<1x16x8xf32, #tpu.memory_space<vmem>>, vector<1x16x8xf32>
    %105 = vector.shape_cast %104 : vector<1x16x8xf32> to vector<16x8xf32>
    %106 = vector.shape_cast %103 : vector<16x8xf32> to vector<1x16x8xf32>
    tpu.vector_store %arg25[%c0_52, %c0_53, %c0_54], %106 {strides = array<i32>} : memref<1x16x8xf32, #tpu.memory_space<vmem>>, vector<1x16x8xf32>,
    %107 = arith.truncf %101 : vector<16x64xf32> to vector<16x64xbf16>
    %c0_55 = arith.constant 0 : index
    %c0_56 = arith.constant 0 : index
    %108 = vector.load %arg15[%c0_55, %c0_56] : memref<64x64xbf16, #tpu.memory_space<vmem>>, vector<64x64xbf16>
    %cst_57 = arith.constant dense<0.000000e+00> : vector<16x64xf32>
    %109 = tpu.matmul %107, %108, %cst_57 {dimension_numbers = #tpu.dot_dimension_numbers<[1], [0], [0], [1], [0, 0, 1, 1], [], []>} : vector<16x64xbf16>, vector<64x64xbf16>, vector<16x64xf32> -> vector<16x64xf32>
    %c0_58 = arith.constant 0 : index
    %c0_59 = arith.constant 0 : index
    %110 = vector.load %arg16[%c0_58, %c0_59] : memref<1x64xf32, #tpu.memory_space<vmem>>, vector<1x64xf32>
    %111 = vector.broadcast %110 : vector<1x64xf32> to vector<16x64xf32>
    %112 = arith.addf %109, %111 : vector<16x64xf32>
    %c0_60 = arith.constant 0 : index
    %c0_61 = arith.constant 0 : index
    %113 = vector.load %arg17[%c0_60, %c0_61] : memref<1x64xf32, #tpu.memory_space<vmem>>, vector<1x64xf32>
    %c0_62 = arith.constant 0 : index
    %c0_63 = arith.constant 0 : index
    %114 = vector.load %arg18[%c0_62, %c0_63] : memref<1x64xf32, #tpu.memory_space<vmem>>, vector<1x64xf32>
    %cst_64 = arith.constant dense<0.000000e+00> : vector<16xf32>
    %115 = vector.multi_reduction <add>, %112, %cst_64 [1] : vector<16x64xf32> to vector<16xf32>
    %116 = vector.shape_cast %115 : vector<16xf32> to vector<16x1xf32>
    %cst_65 = arith.constant 6.400000e+01 : f32
    %117 = vector.broadcast %cst_65 : f32 to vector<16x1xf32>
    %118 = arith.divf %116, %117 : vector<16x1xf32>
    %119 = vector.broadcast %118 : vector<16x1xf32> to vector<16x64xf32>
    %120 = arith.subf %112, %119 : vector<16x64xf32>
    %121 = arith.mulf %120, %120 : vector<16x64xf32>
    %cst_66 = arith.constant dense<0.000000e+00> : vector<16xf32>
    %122 = vector.multi_reduction <add>, %121, %cst_66 [1] : vector<16x64xf32> to vector<16xf32>
    %123 = vector.shape_cast %122 : vector<16xf32> to vector<16x1xf32>
    %cst_67 = arith.constant 6.400000e+01 : f32
    %124 = vector.broadcast %cst_67 : f32 to vector<16x1xf32>
    %125 = arith.divf %123, %124 : vector<16x1xf32>
    %126 = vector.broadcast %118 : vector<16x1xf32> to vector<16x64xf32>
    %127 = arith.subf %112, %126 : vector<16x64xf32>
    %cst_68 = arith.constant 9.99999974E-6 : f32
    %128 = vector.broadcast %cst_68 : f32 to vector<16x1xf32>
    %129 = arith.addf %125, %128 : vector<16x1xf32>
    %130 = math.rsqrt %129 : vector<16x1xf32>
    %131 = vector.broadcast %130 : vector<16x1xf32> to vector<16x64xf32>
    %132 = arith.mulf %127, %131 : vector<16x64xf32>
    %133 = vector.broadcast %113 : vector<1x64xf32> to vector<16x64xf32>
    %134 = arith.mulf %132, %133 : vector<16x64xf32>
    %135 = vector.broadcast %114 : vector<1x64xf32> to vector<16x64xf32>
    %136 = arith.addf %134, %135 : vector<16x64xf32>
    %c0_69 = arith.constant 0 : index
    %c0_70 = arith.constant 0 : index
    %c0_71 = arith.constant 0 : index
    %137 = vector.load %arg23[%c0_69, %c0_70, %c0_71] : memref<1x16x64xf32, #tpu.memory_space<vmem>>, vector<1x16x64xf32>
    %138 = vector.shape_cast %137 : vector<1x16x64xf32> to vector<16x64xf32>
    %139 = vector.shape_cast %136 : vector<16x64xf32> to vector<1x16x64xf32>
    tpu.vector_store %arg23[%c0_69, %c0_70, %c0_71], %139 {strides = array<i32>} : memref<1x16x64xf32, #tpu.memory_space<vmem>>, vector<1x16x64xf32>,
    %cst_72 = arith.constant dense<0.000000e+00> : vector<64xf32>
    %140 = vector.multi_reduction <add>, %136, %cst_72 [0] : vector<16x64xf32> to vector<64xf32>
    %141 = vector.shape_cast %140 : vector<64xf32> to vector<1x64xf32>
    %cst_73 = arith.constant 1.600000e+01 : f32
    %142 = vector.broadcast %cst_73 : f32 to vector<1x64xf32>
    %143 = arith.divf %141, %142 : vector<1x64xf32>
    %144 = arith.truncf %143 : vector<1x64xf32> to vector<1x64xbf16>
    %c0_74 = arith.constant 0 : index
    %c0_75 = arith.constant 0 : index
    %145 = vector.load %arg19[%c0_74, %c0_75] : memref<64x16xbf16, #tpu.memory_space<vmem>>, vector<64x16xbf16>
    %cst_76 = arith.constant dense<0.000000e+00> : vector<1x16xf32>
    %146 = tpu.matmul %144, %145, %cst_76 {dimension_numbers = #tpu.dot_dimension_numbers<[1], [0], [0], [1], [0, 0, 1, 1], [], []>} : vector<1x64xbf16>, vector<64x16xbf16>, vector<1x16xf32> -> vector<1x16xf32>
    %c0_77 = arith.constant 0 : index
    %c0_78 = arith.constant 0 : index
    %147 = vector.load %arg20[%c0_77, %c0_78] : memref<1x16xf32, #tpu.memory_space<vmem>>, vector<1x16xf32>
    %148 = arith.addf %146, %147 : vector<1x16xf32>
    %cst_79 = arith.constant 0.000000e+00 : f32
    %149 = vector.broadcast %cst_79 : f32 to vector<1x16xf32>
    %150 = arith.maximumf %148, %149 : vector<1x16xf32>
    %151 = arith.truncf %150 : vector<1x16xf32> to vector<1x16xbf16>
    %c0_80 = arith.constant 0 : index
    %c0_81 = arith.constant 0 : index
    %152 = vector.load %arg21[%c0_80, %c0_81] : memref<16x1xbf16, #tpu.memory_space<vmem>>, vector<16x1xbf16>
    %cst_82 = arith.constant dense<0.000000e+00> : vector<1x1xf32>
    %153 = tpu.matmul %151, %152, %cst_82 {dimension_numbers = #tpu.dot_dimension_numbers<[1], [0], [0], [1], [0, 0, 1, 1], [], []>} : vector<1x16xbf16>, vector<16x1xbf16>, vector<1x1xf32> -> vector<1x1xf32>
    %c0_83 = arith.constant 0 : index
    %c0_84 = arith.constant 0 : index
    %154 = vector.load %arg22[%c0_83, %c0_84] : memref<1x1xf32, #tpu.memory_space<vmem>>, vector<1x1xf32>
    %155 = arith.addf %153, %154 : vector<1x1xf32>
    %156 = arith.negf %155 : vector<1x1xf32>
    %157 = math.exp %156 : vector<1x1xf32>
    %cst_85 = arith.constant 1.000000e+00 : f32
    %158 = vector.broadcast %cst_85 : f32 to vector<1x1xf32>
    %159 = arith.addf %158, %157 : vector<1x1xf32>
    %160 = arith.divf %158, %159 : vector<1x1xf32>
    %161 = vector.broadcast %160 : vector<1x1xf32> to vector<16x64xf32>
    %162 = arith.mulf %136, %161 : vector<16x64xf32>
    %c0_86 = arith.constant 0 : index
    %c0_87 = arith.constant 0 : index
    %c0_88 = arith.constant 0 : index
    %163 = vector.load %arg24[%c0_86, %c0_87, %c0_88] : memref<1x16x64xf32, #tpu.memory_space<vmem>>, vector<1x16x64xf32>
    %164 = vector.shape_cast %163 : vector<1x16x64xf32> to vector<16x64xf32>
    %165 = vector.shape_cast %162 : vector<16x64xf32> to vector<1x16x64xf32>
    tpu.vector_store %arg24[%c0_86, %c0_87, %c0_88], %165 {strides = array<i32>} : memref<1x16x64xf32, #tpu.memory_space<vmem>>, vector<1x16x64xf32>,
    return
  }
  func.func @transform_0(%arg0: i32) -> (i32, i32, i32) {
    %c0_i32 = arith.constant 0 : i32
    %c0_i32_0 = arith.constant 0 : i32
    %c0_i32_1 = arith.constant 0 : i32
    return %arg0, %c0_i32, %c0_i32_0 : i32, i32, i32
  }
  func.func @transform_1(%arg0: i32) -> (i32, i32, i32) {
    %c0_i32 = arith.constant 0 : i32
    %c0_i32_0 = arith.constant 0 : i32
    %c0_i32_1 = arith.constant 0 : i32
    return %arg0, %c0_i32, %c0_i32_0 : i32, i32, i32
  }
  func.func @transform_2(%arg0: i32) -> (i32, i32) {
    %c0_i32 = arith.constant 0 : i32
    %c0_i32_0 = arith.constant 0 : i32
    %c0_i32_1 = arith.constant 0 : i32
    return %c0_i32, %c0_i32_0 : i32, i32
  }
  func.func @transform_3(%arg0: i32) -> (i32, i32) {
    %c0_i32 = arith.constant 0 : i32
    %c0_i32_0 = arith.constant 0 : i32
    %c0_i32_1 = arith.constant 0 : i32
    return %c0_i32, %c0_i32_0 : i32, i32
  }
  func.func @transform_4(%arg0: i32) -> (i32, i32) {
    %c0_i32 = arith.constant 0 : i32
    %c0_i32_0 = arith.constant 0 : i32
    %c0_i32_1 = arith.constant 0 : i32
    return %c0_i32, %c0_i32_0 : i32, i32
  }
  func.func @transform_5(%arg0: i32) -> (i32, i32) {
    %c0_i32 = arith.constant 0 : i32
    %c0_i32_0 = arith.constant 0 : i32
    %c0_i32_1 = arith.constant 0 : i32
    return %c0_i32, %c0_i32_0 : i32, i32
  }
  func.func @transform_6(%arg0: i32) -> (i32, i32) {
    %c0_i32 = arith.constant 0 : i32
    %c0_i32_0 = arith.constant 0 : i32
    %c0_i32_1 = arith.constant 0 : i32
    return %c0_i32, %c0_i32_0 : i32, i32
  }
  func.func @transform_7(%arg0: i32) -> (i32, i32) {
    %c0_i32 = arith.constant 0 : i32
    %c0_i32_0 = arith.constant 0 : i32
    %c0_i32_1 = arith.constant 0 : i32
    return %c0_i32, %c0_i32_0 : i32, i32
  }
  func.func @transform_8(%arg0: i32) -> (i32, i32) {
    %c0_i32 = arith.constant 0 : i32
    %c0_i32_0 = arith.constant 0 : i32
    %c0_i32_1 = arith.constant 0 : i32
    return %c0_i32, %c0_i32_0 : i32, i32
  }
  func.func @transform_9(%arg0: i32) -> (i32, i32) {
    %c0_i32 = arith.constant 0 : i32
    %c0_i32_0 = arith.constant 0 : i32
    %c0_i32_1 = arith.constant 0 : i32
    return %c0_i32, %c0_i32_0 : i32, i32
  }
  func.func @transform_10(%arg0: i32) -> (i32, i32) {
    %c0_i32 = arith.constant 0 : i32
    %c0_i32_0 = arith.constant 0 : i32
    %c0_i32_1 = arith.constant 0 : i32
    return %c0_i32, %c0_i32_0 : i32, i32
  }
  func.func @transform_11(%arg0: i32) -> (i32, i32) {
    %c0_i32 = arith.constant 0 : i32
    %c0_i32_0 = arith.constant 0 : i32
    %c0_i32_1 = arith.constant 0 : i32
    return %c0_i32, %c0_i32_0 : i32, i32
  }
  func.func @transform_12(%arg0: i32) -> (i32, i32) {
    %c0_i32 = arith.constant 0 : i32
    %c0_i32_0 = arith.constant 0 : i32
    %c0_i32_1 = arith.constant 0 : i32
    return %c0_i32, %c0_i32_0 : i32, i32
  }
  func.func @transform_13(%arg0: i32) -> (i32, i32) {
    %c0_i32 = arith.constant 0 : i32
    %c0_i32_0 = arith.constant 0 : i32
    %c0_i32_1 = arith.constant 0 : i32
    return %c0_i32, %c0_i32_0 : i32, i32
  }
  func.func @transform_14(%arg0: i32) -> (i32, i32) {
    %c0_i32 = arith.constant 0 : i32
    %c0_i32_0 = arith.constant 0 : i32
    %c0_i32_1 = arith.constant 0 : i32
    return %c0_i32, %c0_i32_0 : i32, i32
  }
  func.func @transform_15(%arg0: i32) -> (i32, i32) {
    %c0_i32 = arith.constant 0 : i32
    %c0_i32_0 = arith.constant 0 : i32
    %c0_i32_1 = arith.constant 0 : i32
    return %c0_i32, %c0_i32_0 : i32, i32
  }
  func.func @transform_16(%arg0: i32) -> (i32, i32) {
    %c0_i32 = arith.constant 0 : i32
    %c0_i32_0 = arith.constant 0 : i32
    %c0_i32_1 = arith.constant 0 : i32
    return %c0_i32, %c0_i32_0 : i32, i32
  }
  func.func @transform_17(%arg0: i32) -> (i32, i32) {
    %c0_i32 = arith.constant 0 : i32
    %c0_i32_0 = arith.constant 0 : i32
    %c0_i32_1 = arith.constant 0 : i32
    return %c0_i32, %c0_i32_0 : i32, i32
  }
  func.func @transform_18(%arg0: i32) -> (i32, i32) {
    %c0_i32 = arith.constant 0 : i32
    %c0_i32_0 = arith.constant 0 : i32
    %c0_i32_1 = arith.constant 0 : i32
    return %c0_i32, %c0_i32_0 : i32, i32
  }
  func.func @transform_19(%arg0: i32) -> (i32, i32) {
    %c0_i32 = arith.constant 0 : i32
    %c0_i32_0 = arith.constant 0 : i32
    %c0_i32_1 = arith.constant 0 : i32
    return %c0_i32, %c0_i32_0 : i32, i32
  }
  func.func @transform_20(%arg0: i32) -> (i32, i32) {
    %c0_i32 = arith.constant 0 : i32
    %c0_i32_0 = arith.constant 0 : i32
    %c0_i32_1 = arith.constant 0 : i32
    return %c0_i32, %c0_i32_0 : i32, i32
  }
  func.func @transform_21(%arg0: i32) -> (i32, i32) {
    %c0_i32 = arith.constant 0 : i32
    %c0_i32_0 = arith.constant 0 : i32
    %c0_i32_1 = arith.constant 0 : i32
    return %c0_i32, %c0_i32_0 : i32, i32
  }
  func.func @transform_22(%arg0: i32) -> (i32, i32, i32) {
    %c0_i32 = arith.constant 0 : i32
    %c0_i32_0 = arith.constant 0 : i32
    %c0_i32_1 = arith.constant 0 : i32
    return %arg0, %c0_i32, %c0_i32_0 : i32, i32, i32
  }
  func.func @transform_23(%arg0: i32) -> (i32, i32, i32) {
    %c0_i32 = arith.constant 0 : i32
    %c0_i32_0 = arith.constant 0 : i32
    %c0_i32_1 = arith.constant 0 : i32
    return %arg0, %c0_i32, %c0_i32_0 : i32, i32, i32
  }
  func.func @transform_24(%arg0: i32) -> (i32, i32, i32) {
    %c0_i32 = arith.constant 0 : i32
    %c0_i32_0 = arith.constant 0 : i32
    %c0_i32_1 = arith.constant 0 : i32
    return %arg0, %c0_i32, %c0_i32_0 : i32, i32, i32
  }
  func.func @transform_25(%arg0: i32) -> (i32, i32, i32) {
    %c0_i32 = arith.constant 0 : i32
    %c0_i32_0 = arith.constant 0 : i32
    %c0_i32_1 = arith.constant 0 : i32
    return %arg0, %c0_i32, %c0_i32_0 : i32, i32, i32
  }
}

module attributes {stable_mosaic.version = 11 : i64} {
  func.func @_query_block_kernel(%arg0: i32, %arg1: memref<1x11x64xf32, #tpu.memory_space<vmem>>, %arg2: memref<1x8x64xf32, #tpu.memory_space<vmem>>, %arg3: memref<64x64xbf16, #tpu.memory_space<vmem>>, %arg4: memref<1x64xf32, #tpu.memory_space<vmem>>, %arg5: memref<64x192xbf16, #tpu.memory_space<vmem>>, %arg6: memref<1x192xf32, #tpu.memory_space<vmem>>, %arg7: memref<64x64xbf16, #tpu.memory_space<vmem>>, %arg8: memref<1x64xf32, #tpu.memory_space<vmem>>, %arg9: memref<1x64xf32, #tpu.memory_space<vmem>>, %arg10: memref<1x64xf32, #tpu.memory_space<vmem>>, %arg11: memref<64x64xbf16, #tpu.memory_space<vmem>>, %arg12: memref<1x64xf32, #tpu.memory_space<vmem>>, %arg13: memref<64x128xbf16, #tpu.memory_space<vmem>>, %arg14: memref<1x128xf32, #tpu.memory_space<vmem>>, %arg15: memref<64x64xbf16, #tpu.memory_space<vmem>>, %arg16: memref<1x64xf32, #tpu.memory_space<vmem>>, %arg17: memref<1x64xf32, #tpu.memory_space<vmem>>, %arg18: memref<1x64xf32, #tpu.memory_space<vmem>>, %arg19: memref<64x16xbf16, #tpu.memory_space<vmem>>, %arg20: memref<1x16xf32, #tpu.memory_space<vmem>>, %arg21: memref<16x1xbf16, #tpu.memory_space<vmem>>, %arg22: memref<1x1xf32, #tpu.memory_space<vmem>>, %arg23: memref<1x11x64xf32, #tpu.memory_space<vmem>>, %arg24: memref<1x11x64xf32, #tpu.memory_space<vmem>>, %arg25: memref<1x11x8xf32, #tpu.memory_space<vmem>>, %arg26: memref<1x11x64xf32, #tpu.memory_space<vmem>>) attributes {dimension_semantics = [#tpu.dimension_semantics<parallel>], iteration_bounds = array<i64: 2>, scalar_prefetch = 0 : i64, scratch_operands = 0 : i64, tpu.core_type = #tpu.core_type<tc>, window_params = [{transform_indices = @transform_0, window_bounds = array<i64: 1, 11, 64>}, {transform_indices = @transform_1, window_bounds = array<i64: 1, 8, 64>}, {pipeline_mode = #tpu.pipeline_mode<synchronous>, transform_indices = @transform_2, window_bounds = array<i64: 64, 64>}, {pipeline_mode = #tpu.pipeline_mode<synchronous>, transform_indices = @transform_3, window_bounds = array<i64: 1, 64>}, {pipeline_mode = #tpu.pipeline_mode<synchronous>, transform_indices = @transform_4, window_bounds = array<i64: 64, 192>}, {pipeline_mode = #tpu.pipeline_mode<synchronous>, transform_indices = @transform_5, window_bounds = array<i64: 1, 192>}, {pipeline_mode = #tpu.pipeline_mode<synchronous>, transform_indices = @transform_6, window_bounds = array<i64: 64, 64>}, {pipeline_mode = #tpu.pipeline_mode<synchronous>, transform_indices = @transform_7, window_bounds = array<i64: 1, 64>}, {pipeline_mode = #tpu.pipeline_mode<synchronous>, transform_indices = @transform_8, window_bounds = array<i64: 1, 64>}, {pipeline_mode = #tpu.pipeline_mode<synchronous>, transform_indices = @transform_9, window_bounds = array<i64: 1, 64>}, {pipeline_mode = #tpu.pipeline_mode<synchronous>, transform_indices = @transform_10, window_bounds = array<i64: 64, 64>}, {pipeline_mode = #tpu.pipeline_mode<synchronous>, transform_indices = @transform_11, window_bounds = array<i64: 1, 64>}, {pipeline_mode = #tpu.pipeline_mode<synchronous>, transform_indices = @transform_12, window_bounds = array<i64: 64, 128>}, {pipeline_mode = #tpu.pipeline_mode<synchronous>, transform_indices = @transform_13, window_bounds = array<i64: 1, 128>}, {pipeline_mode = #tpu.pipeline_mode<synchronous>, transform_indices = @transform_14, window_bounds = array<i64: 64, 64>}, {pipeline_mode = #tpu.pipeline_mode<synchronous>, transform_indices = @transform_15, window_bounds = array<i64: 1, 64>}, {pipeline_mode = #tpu.pipeline_mode<synchronous>, transform_indices = @transform_16, window_bounds = array<i64: 1, 64>}, {pipeline_mode = #tpu.pipeline_mode<synchronous>, transform_indices = @transform_17, window_bounds = array<i64: 1, 64>}, {pipeline_mode = #tpu.pipeline_mode<synchronous>, transform_indices = @transform_18, window_bounds = array<i64: 64, 16>}, {pipeline_mode = #tpu.pipeline_mode<synchronous>, transform_indices = @transform_19, window_bounds = array<i64: 1, 16>}, {pipeline_mode = #tpu.pipeline_mode<synchronous>, transform_indices = @transform_20, window_bounds = array<i64: 16, 1>}, {pipeline_mode = #tpu.pipeline_mode<synchronous>, transform_indices = @transform_21, window_bounds = array<i64: 1, 1>}, {transform_indices = @transform_22, window_bounds = array<i64: 1, 11, 64>}, {transform_indices = @transform_23, window_bounds = array<i64: 1, 11, 64>}, {transform_indices = @transform_24, window_bounds = array<i64: 1, 11, 8>}, {transform_indices = @transform_25, window_bounds = array<i64: 1, 11, 64>}]} {
    %c0 = arith.constant 0 : index
    %c0_0 = arith.constant 0 : index
    %c0_1 = arith.constant 0 : index
    %0 = vector.load %arg1[%c0, %c0_0, %c0_1] : memref<1x11x64xf32, #tpu.memory_space<vmem>>, vector<1x11x64xf32>
    %1 = vector.shape_cast %0 : vector<1x11x64xf32> to vector<11x64xf32>
    %c0_2 = arith.constant 0 : index
    %c0_3 = arith.constant 0 : index
    %c0_4 = arith.constant 0 : index
    %2 = vector.load %arg2[%c0_2, %c0_3, %c0_4] : memref<1x8x64xf32, #tpu.memory_space<vmem>>, vector<1x8x64xf32>
    %3 = vector.shape_cast %2 : vector<1x8x64xf32> to vector<8x64xf32>
    %4 = arith.truncf %3 : vector<8x64xf32> to vector<8x64xbf16>
    %5 = arith.truncf %1 : vector<11x64xf32> to vector<11x64xbf16>
    %c0_5 = arith.constant 0 : index
    %c0_6 = arith.constant 0 : index
    %6 = vector.load %arg3[%c0_5, %c0_6] : memref<64x64xbf16, #tpu.memory_space<vmem>>, vector<64x64xbf16>
    %cst = arith.constant dense<0.000000e+00> : vector<11x64xf32>
    %7 = tpu.matmul %5, %6, %cst {dimension_numbers = #tpu.dot_dimension_numbers<[1], [0], [0], [1], [0, 0, 1, 1], [], []>} : vector<11x64xbf16>, vector<64x64xbf16>, vector<11x64xf32> -> vector<11x64xf32>
    %c0_7 = arith.constant 0 : index
    %c0_8 = arith.constant 0 : index
    %8 = vector.load %arg4[%c0_7, %c0_8] : memref<1x64xf32, #tpu.memory_space<vmem>>, vector<1x64xf32>
    %9 = vector.broadcast %8 : vector<1x64xf32> to vector<11x64xf32>
    %10 = arith.addf %7, %9 : vector<11x64xf32>
    %11 = arith.truncf %10 : vector<11x64xf32> to vector<11x64xbf16>
    %c0_9 = arith.constant 0 : index
    %c0_10 = arith.constant 0 : index
    %12 = vector.load %arg5[%c0_9, %c0_10] : memref<64x192xbf16, #tpu.memory_space<vmem>>, vector<64x192xbf16>
    %cst_11 = arith.constant dense<0.000000e+00> : vector<11x192xf32>
    %13 = tpu.matmul %11, %12, %cst_11 {dimension_numbers = #tpu.dot_dimension_numbers<[1], [0], [0], [1], [0, 0, 1, 1], [], []>} : vector<11x64xbf16>, vector<64x192xbf16>, vector<11x192xf32> -> vector<11x192xf32>
    %c0_12 = arith.constant 0 : index
    %c0_13 = arith.constant 0 : index
    %14 = vector.load %arg6[%c0_12, %c0_13] : memref<1x192xf32, #tpu.memory_space<vmem>>, vector<1x192xf32>
    %15 = vector.broadcast %14 : vector<1x192xf32> to vector<11x192xf32>
    %16 = arith.addf %13, %15 : vector<11x192xf32>
    %17 = vector.extract_strided_slice %16 {offsets = [0, 0], sizes = [11, 64], strides = [1, 1]} : vector<11x192xf32> to vector<11x64xf32>
    %18 = vector.extract_strided_slice %16 {offsets = [0, 64], sizes = [11, 64], strides = [1, 1]} : vector<11x192xf32> to vector<11x64xf32>
    %19 = vector.extract_strided_slice %16 {offsets = [0, 128], sizes = [11, 64], strides = [1, 1]} : vector<11x192xf32> to vector<11x64xf32>
    %20 = arith.truncf %17 : vector<11x64xf32> to vector<11x64xbf16>
    %21 = arith.truncf %18 : vector<11x64xf32> to vector<11x64xbf16>
    %22 = arith.truncf %19 : vector<11x64xf32> to vector<11x64xbf16>
    %cst_14 = arith.constant dense<0.000000e+00> : vector<11x11xf32>
    %23 = tpu.matmul %20, %21, %cst_14 {dimension_numbers = #tpu.dot_dimension_numbers<[1], [1], [0], [0], [0, 0, 1, 0], [], []>} : vector<11x64xbf16>, vector<11x64xbf16>, vector<11x11xf32> -> vector<11x11xf32>
    %cst_15 = arith.constant 1.250000e-01 : f32
    %24 = vector.broadcast %cst_15 : f32 to vector<11x11xf32>
    %25 = arith.mulf %23, %24 : vector<11x11xf32>
    %cst_16 = arith.constant dense<0xFF800000> : vector<11xf32>
    %26 = vector.multi_reduction <maximumf>, %25, %cst_16 [1] : vector<11x11xf32> to vector<11xf32>
    %27 = vector.shape_cast %26 : vector<11xf32> to vector<11x1xf32>
    %28 = vector.broadcast %27 : vector<11x1xf32> to vector<11x11xf32>
    %29 = arith.subf %25, %28 : vector<11x11xf32>
    %30 = math.exp %29 : vector<11x11xf32>
    %cst_17 = arith.constant dense<0.000000e+00> : vector<11xf32>
    %31 = vector.multi_reduction <add>, %30, %cst_17 [1] : vector<11x11xf32> to vector<11xf32>
    %32 = vector.shape_cast %31 : vector<11xf32> to vector<11x1xf32>
    %33 = tpu.reciprocal %32 {approx = true} : vector<11x1xf32> -> vector<11x1xf32>
    %34 = vector.broadcast %33 : vector<11x1xf32> to vector<11x11xf32>
    %35 = arith.mulf %30, %34 : vector<11x11xf32>
    %36 = arith.truncf %35 : vector<11x11xf32> to vector<11x11xbf16>
    %cst_18 = arith.constant dense<0.000000e+00> : vector<11x64xf32>
    %37 = tpu.matmul %36, %22, %cst_18 {dimension_numbers = #tpu.dot_dimension_numbers<[1], [0], [0], [1], [0, 0, 1, 1], [], []>} : vector<11x11xbf16>, vector<11x64xbf16>, vector<11x64xf32> -> vector<11x64xf32>
    %38 = arith.truncf %37 : vector<11x64xf32> to vector<11x64xbf16>
    %c0_19 = arith.constant 0 : index
    %c0_20 = arith.constant 0 : index
    %39 = vector.load %arg7[%c0_19, %c0_20] : memref<64x64xbf16, #tpu.memory_space<vmem>>, vector<64x64xbf16>
    %cst_21 = arith.constant dense<0.000000e+00> : vector<11x64xf32>
    %40 = tpu.matmul %38, %39, %cst_21 {dimension_numbers = #tpu.dot_dimension_numbers<[1], [0], [0], [1], [0, 0, 1, 1], [], []>} : vector<11x64xbf16>, vector<64x64xbf16>, vector<11x64xf32> -> vector<11x64xf32>
    %c0_22 = arith.constant 0 : index
    %c0_23 = arith.constant 0 : index
    %41 = vector.load %arg8[%c0_22, %c0_23] : memref<1x64xf32, #tpu.memory_space<vmem>>, vector<1x64xf32>
    %42 = vector.broadcast %41 : vector<1x64xf32> to vector<11x64xf32>
    %43 = arith.addf %40, %42 : vector<11x64xf32>
    %44 = arith.addf %10, %43 : vector<11x64xf32>
    %c0_24 = arith.constant 0 : index
    %c0_25 = arith.constant 0 : index
    %45 = vector.load %arg9[%c0_24, %c0_25] : memref<1x64xf32, #tpu.memory_space<vmem>>, vector<1x64xf32>
    %c0_26 = arith.constant 0 : index
    %c0_27 = arith.constant 0 : index
    %46 = vector.load %arg10[%c0_26, %c0_27] : memref<1x64xf32, #tpu.memory_space<vmem>>, vector<1x64xf32>
    %cst_28 = arith.constant dense<0.000000e+00> : vector<11xf32>
    %47 = vector.multi_reduction <add>, %44, %cst_28 [1] : vector<11x64xf32> to vector<11xf32>
    %48 = vector.shape_cast %47 : vector<11xf32> to vector<11x1xf32>
    %cst_29 = arith.constant 6.400000e+01 : f32
    %49 = vector.broadcast %cst_29 : f32 to vector<11x1xf32>
    %50 = arith.divf %48, %49 : vector<11x1xf32>
    %51 = vector.broadcast %50 : vector<11x1xf32> to vector<11x64xf32>
    %52 = arith.subf %44, %51 : vector<11x64xf32>
    %53 = arith.mulf %52, %52 : vector<11x64xf32>
    %cst_30 = arith.constant dense<0.000000e+00> : vector<11xf32>
    %54 = vector.multi_reduction <add>, %53, %cst_30 [1] : vector<11x64xf32> to vector<11xf32>
    %55 = vector.shape_cast %54 : vector<11xf32> to vector<11x1xf32>
    %cst_31 = arith.constant 6.400000e+01 : f32
    %56 = vector.broadcast %cst_31 : f32 to vector<11x1xf32>
    %57 = arith.divf %55, %56 : vector<11x1xf32>
    %58 = vector.broadcast %50 : vector<11x1xf32> to vector<11x64xf32>
    %59 = arith.subf %44, %58 : vector<11x64xf32>
    %cst_32 = arith.constant 9.99999974E-6 : f32
    %60 = vector.broadcast %cst_32 : f32 to vector<11x1xf32>
    %61 = arith.addf %57, %60 : vector<11x1xf32>
    %62 = math.rsqrt %61 : vector<11x1xf32>
    %63 = vector.broadcast %62 : vector<11x1xf32> to vector<11x64xf32>
    %64 = arith.mulf %59, %63 : vector<11x64xf32>
    %65 = vector.broadcast %45 : vector<1x64xf32> to vector<11x64xf32>
    %66 = arith.mulf %64, %65 : vector<11x64xf32>
    %67 = vector.broadcast %46 : vector<1x64xf32> to vector<11x64xf32>
    %68 = arith.addf %66, %67 : vector<11x64xf32>
    %c0_33 = arith.constant 0 : index
    %c0_34 = arith.constant 0 : index
    %c0_35 = arith.constant 0 : index
    %69 = vector.load %arg26[%c0_33, %c0_34, %c0_35] : memref<1x11x64xf32, #tpu.memory_space<vmem>>, vector<1x11x64xf32>
    %70 = vector.shape_cast %69 : vector<1x11x64xf32> to vector<11x64xf32>
    %71 = vector.shape_cast %68 : vector<11x64xf32> to vector<1x11x64xf32>
    tpu.vector_store %arg26[%c0_33, %c0_34, %c0_35], %71 {strides = array<i32>} : memref<1x11x64xf32, #tpu.memory_space<vmem>>, vector<1x11x64xf32>,
    %72 = arith.truncf %68 : vector<11x64xf32> to vector<11x64xbf16>
    %c0_36 = arith.constant 0 : index
    %c0_37 = arith.constant 0 : index
    %73 = vector.load %arg11[%c0_36, %c0_37] : memref<64x64xbf16, #tpu.memory_space<vmem>>, vector<64x64xbf16>
    %cst_38 = arith.constant dense<0.000000e+00> : vector<11x64xf32>
    %74 = tpu.matmul %72, %73, %cst_38 {dimension_numbers = #tpu.dot_dimension_numbers<[1], [0], [0], [1], [0, 0, 1, 1], [], []>} : vector<11x64xbf16>, vector<64x64xbf16>, vector<11x64xf32> -> vector<11x64xf32>
    %c0_39 = arith.constant 0 : index
    %c0_40 = arith.constant 0 : index
    %75 = vector.load %arg12[%c0_39, %c0_40] : memref<1x64xf32, #tpu.memory_space<vmem>>, vector<1x64xf32>
    %76 = vector.broadcast %75 : vector<1x64xf32> to vector<11x64xf32>
    %77 = arith.addf %74, %76 : vector<11x64xf32>
    %c0_41 = arith.constant 0 : index
    %c0_42 = arith.constant 0 : index
    %78 = vector.load %arg13[%c0_41, %c0_42] : memref<64x128xbf16, #tpu.memory_space<vmem>>, vector<64x128xbf16>
    %cst_43 = arith.constant dense<0.000000e+00> : vector<8x128xf32>
    %79 = tpu.matmul %4, %78, %cst_43 {dimension_numbers = #tpu.dot_dimension_numbers<[1], [0], [0], [1], [0, 0, 1, 1], [], []>} : vector<8x64xbf16>, vector<64x128xbf16>, vector<8x128xf32> -> vector<8x128xf32>
    %c0_44 = arith.constant 0 : index
    %c0_45 = arith.constant 0 : index
    %80 = vector.load %arg14[%c0_44, %c0_45] : memref<1x128xf32, #tpu.memory_space<vmem>>, vector<1x128xf32>
    %81 = vector.broadcast %80 : vector<1x128xf32> to vector<8x128xf32>
    %82 = arith.addf %79, %81 : vector<8x128xf32>
    %83 = vector.extract_strided_slice %82 {offsets = [0, 0], sizes = [8, 64], strides = [1, 1]} : vector<8x128xf32> to vector<8x64xf32>
    %84 = vector.extract_strided_slice %82 {offsets = [0, 64], sizes = [8, 64], strides = [1, 1]} : vector<8x128xf32> to vector<8x64xf32>
    %85 = arith.truncf %77 : vector<11x64xf32> to vector<11x64xbf16>
    %86 = arith.truncf %83 : vector<8x64xf32> to vector<8x64xbf16>
    %87 = arith.truncf %84 : vector<8x64xf32> to vector<8x64xbf16>
    %cst_46 = arith.constant dense<0.000000e+00> : vector<11x8xf32>
    %88 = tpu.matmul %85, %86, %cst_46 {dimension_numbers = #tpu.dot_dimension_numbers<[1], [1], [0], [0], [0, 0, 1, 0], [], []>} : vector<11x64xbf16>, vector<8x64xbf16>, vector<11x8xf32> -> vector<11x8xf32>
    %cst_47 = arith.constant 1.250000e-01 : f32
    %89 = vector.broadcast %cst_47 : f32 to vector<11x8xf32>
    %90 = arith.mulf %88, %89 : vector<11x8xf32>
    %cst_48 = arith.constant dense<0xFF800000> : vector<11xf32>
    %91 = vector.multi_reduction <maximumf>, %90, %cst_48 [1] : vector<11x8xf32> to vector<11xf32>
    %92 = vector.shape_cast %91 : vector<11xf32> to vector<11x1xf32>
    %93 = vector.broadcast %92 : vector<11x1xf32> to vector<11x8xf32>
    %94 = arith.subf %90, %93 : vector<11x8xf32>
    %95 = math.exp %94 : vector<11x8xf32>
    %cst_49 = arith.constant dense<0.000000e+00> : vector<11xf32>
    %96 = vector.multi_reduction <add>, %95, %cst_49 [1] : vector<11x8xf32> to vector<11xf32>
    %97 = vector.shape_cast %96 : vector<11xf32> to vector<11x1xf32>
    %98 = vector.broadcast %97 : vector<11x1xf32> to vector<11x8xf32>
    %99 = arith.divf %95, %98 : vector<11x8xf32>
    %100 = arith.truncf %99 : vector<11x8xf32> to vector<11x8xbf16>
    %cst_50 = arith.constant dense<0.000000e+00> : vector<11x64xf32>
    %101 = tpu.matmul %100, %87, %cst_50 {dimension_numbers = #tpu.dot_dimension_numbers<[1], [0], [0], [1], [0, 0, 1, 1], [], []>} : vector<11x8xbf16>, vector<8x64xbf16>, vector<11x64xf32> -> vector<11x64xf32>
    %cst_51 = arith.constant 1.000000e+00 : f32
    %102 = vector.broadcast %cst_51 : f32 to vector<11x8xf32>
    %103 = arith.mulf %99, %102 : vector<11x8xf32>
    %c0_52 = arith.constant 0 : index
    %c0_53 = arith.constant 0 : index
    %c0_54 = arith.constant 0 : index
    %104 = vector.load %arg25[%c0_52, %c0_53, %c0_54] : memref<1x11x8xf32, #tpu.memory_space<vmem>>, vector<1x11x8xf32>
    %105 = vector.shape_cast %104 : vector<1x11x8xf32> to vector<11x8xf32>
    %106 = vector.shape_cast %103 : vector<11x8xf32> to vector<1x11x8xf32>
    tpu.vector_store %arg25[%c0_52, %c0_53, %c0_54], %106 {strides = array<i32>} : memref<1x11x8xf32, #tpu.memory_space<vmem>>, vector<1x11x8xf32>,
    %107 = arith.truncf %101 : vector<11x64xf32> to vector<11x64xbf16>
    %c0_55 = arith.constant 0 : index
    %c0_56 = arith.constant 0 : index
    %108 = vector.load %arg15[%c0_55, %c0_56] : memref<64x64xbf16, #tpu.memory_space<vmem>>, vector<64x64xbf16>
    %cst_57 = arith.constant dense<0.000000e+00> : vector<11x64xf32>
    %109 = tpu.matmul %107, %108, %cst_57 {dimension_numbers = #tpu.dot_dimension_numbers<[1], [0], [0], [1], [0, 0, 1, 1], [], []>} : vector<11x64xbf16>, vector<64x64xbf16>, vector<11x64xf32> -> vector<11x64xf32>
    %c0_58 = arith.constant 0 : index
    %c0_59 = arith.constant 0 : index
    %110 = vector.load %arg16[%c0_58, %c0_59] : memref<1x64xf32, #tpu.memory_space<vmem>>, vector<1x64xf32>
    %111 = vector.broadcast %110 : vector<1x64xf32> to vector<11x64xf32>
    %112 = arith.addf %109, %111 : vector<11x64xf32>
    %c0_60 = arith.constant 0 : index
    %c0_61 = arith.constant 0 : index
    %113 = vector.load %arg17[%c0_60, %c0_61] : memref<1x64xf32, #tpu.memory_space<vmem>>, vector<1x64xf32>
    %c0_62 = arith.constant 0 : index
    %c0_63 = arith.constant 0 : index
    %114 = vector.load %arg18[%c0_62, %c0_63] : memref<1x64xf32, #tpu.memory_space<vmem>>, vector<1x64xf32>
    %cst_64 = arith.constant dense<0.000000e+00> : vector<11xf32>
    %115 = vector.multi_reduction <add>, %112, %cst_64 [1] : vector<11x64xf32> to vector<11xf32>
    %116 = vector.shape_cast %115 : vector<11xf32> to vector<11x1xf32>
    %cst_65 = arith.constant 6.400000e+01 : f32
    %117 = vector.broadcast %cst_65 : f32 to vector<11x1xf32>
    %118 = arith.divf %116, %117 : vector<11x1xf32>
    %119 = vector.broadcast %118 : vector<11x1xf32> to vector<11x64xf32>
    %120 = arith.subf %112, %119 : vector<11x64xf32>
    %121 = arith.mulf %120, %120 : vector<11x64xf32>
    %cst_66 = arith.constant dense<0.000000e+00> : vector<11xf32>
    %122 = vector.multi_reduction <add>, %121, %cst_66 [1] : vector<11x64xf32> to vector<11xf32>
    %123 = vector.shape_cast %122 : vector<11xf32> to vector<11x1xf32>
    %cst_67 = arith.constant 6.400000e+01 : f32
    %124 = vector.broadcast %cst_67 : f32 to vector<11x1xf32>
    %125 = arith.divf %123, %124 : vector<11x1xf32>
    %126 = vector.broadcast %118 : vector<11x1xf32> to vector<11x64xf32>
    %127 = arith.subf %112, %126 : vector<11x64xf32>
    %cst_68 = arith.constant 9.99999974E-6 : f32
    %128 = vector.broadcast %cst_68 : f32 to vector<11x1xf32>
    %129 = arith.addf %125, %128 : vector<11x1xf32>
    %130 = math.rsqrt %129 : vector<11x1xf32>
    %131 = vector.broadcast %130 : vector<11x1xf32> to vector<11x64xf32>
    %132 = arith.mulf %127, %131 : vector<11x64xf32>
    %133 = vector.broadcast %113 : vector<1x64xf32> to vector<11x64xf32>
    %134 = arith.mulf %132, %133 : vector<11x64xf32>
    %135 = vector.broadcast %114 : vector<1x64xf32> to vector<11x64xf32>
    %136 = arith.addf %134, %135 : vector<11x64xf32>
    %c0_69 = arith.constant 0 : index
    %c0_70 = arith.constant 0 : index
    %c0_71 = arith.constant 0 : index
    %137 = vector.load %arg23[%c0_69, %c0_70, %c0_71] : memref<1x11x64xf32, #tpu.memory_space<vmem>>, vector<1x11x64xf32>
    %138 = vector.shape_cast %137 : vector<1x11x64xf32> to vector<11x64xf32>
    %139 = vector.shape_cast %136 : vector<11x64xf32> to vector<1x11x64xf32>
    tpu.vector_store %arg23[%c0_69, %c0_70, %c0_71], %139 {strides = array<i32>} : memref<1x11x64xf32, #tpu.memory_space<vmem>>, vector<1x11x64xf32>,
    %cst_72 = arith.constant dense<0.000000e+00> : vector<64xf32>
    %140 = vector.multi_reduction <add>, %136, %cst_72 [0] : vector<11x64xf32> to vector<64xf32>
    %141 = vector.shape_cast %140 : vector<64xf32> to vector<1x64xf32>
    %cst_73 = arith.constant 1.100000e+01 : f32
    %142 = vector.broadcast %cst_73 : f32 to vector<1x64xf32>
    %143 = arith.divf %141, %142 : vector<1x64xf32>
    %144 = arith.truncf %143 : vector<1x64xf32> to vector<1x64xbf16>
    %c0_74 = arith.constant 0 : index
    %c0_75 = arith.constant 0 : index
    %145 = vector.load %arg19[%c0_74, %c0_75] : memref<64x16xbf16, #tpu.memory_space<vmem>>, vector<64x16xbf16>
    %cst_76 = arith.constant dense<0.000000e+00> : vector<1x16xf32>
    %146 = tpu.matmul %144, %145, %cst_76 {dimension_numbers = #tpu.dot_dimension_numbers<[1], [0], [0], [1], [0, 0, 1, 1], [], []>} : vector<1x64xbf16>, vector<64x16xbf16>, vector<1x16xf32> -> vector<1x16xf32>
    %c0_77 = arith.constant 0 : index
    %c0_78 = arith.constant 0 : index
    %147 = vector.load %arg20[%c0_77, %c0_78] : memref<1x16xf32, #tpu.memory_space<vmem>>, vector<1x16xf32>
    %148 = arith.addf %146, %147 : vector<1x16xf32>
    %cst_79 = arith.constant 0.000000e+00 : f32
    %149 = vector.broadcast %cst_79 : f32 to vector<1x16xf32>
    %150 = arith.maximumf %148, %149 : vector<1x16xf32>
    %151 = arith.truncf %150 : vector<1x16xf32> to vector<1x16xbf16>
    %c0_80 = arith.constant 0 : index
    %c0_81 = arith.constant 0 : index
    %152 = vector.load %arg21[%c0_80, %c0_81] : memref<16x1xbf16, #tpu.memory_space<vmem>>, vector<16x1xbf16>
    %cst_82 = arith.constant dense<0.000000e+00> : vector<1x1xf32>
    %153 = tpu.matmul %151, %152, %cst_82 {dimension_numbers = #tpu.dot_dimension_numbers<[1], [0], [0], [1], [0, 0, 1, 1], [], []>} : vector<1x16xbf16>, vector<16x1xbf16>, vector<1x1xf32> -> vector<1x1xf32>
    %c0_83 = arith.constant 0 : index
    %c0_84 = arith.constant 0 : index
    %154 = vector.load %arg22[%c0_83, %c0_84] : memref<1x1xf32, #tpu.memory_space<vmem>>, vector<1x1xf32>
    %155 = arith.addf %153, %154 : vector<1x1xf32>
    %156 = arith.negf %155 : vector<1x1xf32>
    %157 = math.exp %156 : vector<1x1xf32>
    %cst_85 = arith.constant 1.000000e+00 : f32
    %158 = vector.broadcast %cst_85 : f32 to vector<1x1xf32>
    %159 = arith.addf %158, %157 : vector<1x1xf32>
    %160 = arith.divf %158, %159 : vector<1x1xf32>
    %161 = vector.broadcast %160 : vector<1x1xf32> to vector<11x64xf32>
    %162 = arith.mulf %136, %161 : vector<11x64xf32>
    %c0_86 = arith.constant 0 : index
    %c0_87 = arith.constant 0 : index
    %c0_88 = arith.constant 0 : index
    %163 = vector.load %arg24[%c0_86, %c0_87, %c0_88] : memref<1x11x64xf32, #tpu.memory_space<vmem>>, vector<1x11x64xf32>
    %164 = vector.shape_cast %163 : vector<1x11x64xf32> to vector<11x64xf32>
    %165 = vector.shape_cast %162 : vector<11x64xf32> to vector<1x11x64xf32>
    tpu.vector_store %arg24[%c0_86, %c0_87, %c0_88], %165 {strides = array<i32>} : memref<1x11x64xf32, #tpu.memory_space<vmem>>, vector<1x11x64xf32>,
    return
  }
  func.func @transform_0(%arg0: i32) -> (i32, i32, i32) {
    %c0_i32 = arith.constant 0 : i32
    %c0_i32_0 = arith.constant 0 : i32
    %c0_i32_1 = arith.constant 0 : i32
    return %arg0, %c0_i32, %c0_i32_0 : i32, i32, i32
  }
  func.func @transform_1(%arg0: i32) -> (i32, i32, i32) {
    %c0_i32 = arith.constant 0 : i32
    %c0_i32_0 = arith.constant 0 : i32
    %c0_i32_1 = arith.constant 0 : i32
    return %arg0, %c0_i32, %c0_i32_0 : i32, i32, i32
  }
  func.func @transform_2(%arg0: i32) -> (i32, i32) {
    %c0_i32 = arith.constant 0 : i32
    %c0_i32_0 = arith.constant 0 : i32
    %c0_i32_1 = arith.constant 0 : i32
    return %c0_i32, %c0_i32_0 : i32, i32
  }
  func.func @transform_3(%arg0: i32) -> (i32, i32) {
    %c0_i32 = arith.constant 0 : i32
    %c0_i32_0 = arith.constant 0 : i32
    %c0_i32_1 = arith.constant 0 : i32
    return %c0_i32, %c0_i32_0 : i32, i32
  }
  func.func @transform_4(%arg0: i32) -> (i32, i32) {
    %c0_i32 = arith.constant 0 : i32
    %c0_i32_0 = arith.constant 0 : i32
    %c0_i32_1 = arith.constant 0 : i32
    return %c0_i32, %c0_i32_0 : i32, i32
  }
  func.func @transform_5(%arg0: i32) -> (i32, i32) {
    %c0_i32 = arith.constant 0 : i32
    %c0_i32_0 = arith.constant 0 : i32
    %c0_i32_1 = arith.constant 0 : i32
    return %c0_i32, %c0_i32_0 : i32, i32
  }
  func.func @transform_6(%arg0: i32) -> (i32, i32) {
    %c0_i32 = arith.constant 0 : i32
    %c0_i32_0 = arith.constant 0 : i32
    %c0_i32_1 = arith.constant 0 : i32
    return %c0_i32, %c0_i32_0 : i32, i32
  }
  func.func @transform_7(%arg0: i32) -> (i32, i32) {
    %c0_i32 = arith.constant 0 : i32
    %c0_i32_0 = arith.constant 0 : i32
    %c0_i32_1 = arith.constant 0 : i32
    return %c0_i32, %c0_i32_0 : i32, i32
  }
  func.func @transform_8(%arg0: i32) -> (i32, i32) {
    %c0_i32 = arith.constant 0 : i32
    %c0_i32_0 = arith.constant 0 : i32
    %c0_i32_1 = arith.constant 0 : i32
    return %c0_i32, %c0_i32_0 : i32, i32
  }
  func.func @transform_9(%arg0: i32) -> (i32, i32) {
    %c0_i32 = arith.constant 0 : i32
    %c0_i32_0 = arith.constant 0 : i32
    %c0_i32_1 = arith.constant 0 : i32
    return %c0_i32, %c0_i32_0 : i32, i32
  }
  func.func @transform_10(%arg0: i32) -> (i32, i32) {
    %c0_i32 = arith.constant 0 : i32
    %c0_i32_0 = arith.constant 0 : i32
    %c0_i32_1 = arith.constant 0 : i32
    return %c0_i32, %c0_i32_0 : i32, i32
  }
  func.func @transform_11(%arg0: i32) -> (i32, i32) {
    %c0_i32 = arith.constant 0 : i32
    %c0_i32_0 = arith.constant 0 : i32
    %c0_i32_1 = arith.constant 0 : i32
    return %c0_i32, %c0_i32_0 : i32, i32
  }
  func.func @transform_12(%arg0: i32) -> (i32, i32) {
    %c0_i32 = arith.constant 0 : i32
    %c0_i32_0 = arith.constant 0 : i32
    %c0_i32_1 = arith.constant 0 : i32
    return %c0_i32, %c0_i32_0 : i32, i32
  }
  func.func @transform_13(%arg0: i32) -> (i32, i32) {
    %c0_i32 = arith.constant 0 : i32
    %c0_i32_0 = arith.constant 0 : i32
    %c0_i32_1 = arith.constant 0 : i32
    return %c0_i32, %c0_i32_0 : i32, i32
  }
  func.func @transform_14(%arg0: i32) -> (i32, i32) {
    %c0_i32 = arith.constant 0 : i32
    %c0_i32_0 = arith.constant 0 : i32
    %c0_i32_1 = arith.constant 0 : i32
    return %c0_i32, %c0_i32_0 : i32, i32
  }
  func.func @transform_15(%arg0: i32) -> (i32, i32) {
    %c0_i32 = arith.constant 0 : i32
    %c0_i32_0 = arith.constant 0 : i32
    %c0_i32_1 = arith.constant 0 : i32
    return %c0_i32, %c0_i32_0 : i32, i32
  }
  func.func @transform_16(%arg0: i32) -> (i32, i32) {
    %c0_i32 = arith.constant 0 : i32
    %c0_i32_0 = arith.constant 0 : i32
    %c0_i32_1 = arith.constant 0 : i32
    return %c0_i32, %c0_i32_0 : i32, i32
  }
  func.func @transform_17(%arg0: i32) -> (i32, i32) {
    %c0_i32 = arith.constant 0 : i32
    %c0_i32_0 = arith.constant 0 : i32
    %c0_i32_1 = arith.constant 0 : i32
    return %c0_i32, %c0_i32_0 : i32, i32
  }
  func.func @transform_18(%arg0: i32) -> (i32, i32) {
    %c0_i32 = arith.constant 0 : i32
    %c0_i32_0 = arith.constant 0 : i32
    %c0_i32_1 = arith.constant 0 : i32
    return %c0_i32, %c0_i32_0 : i32, i32
  }
  func.func @transform_19(%arg0: i32) -> (i32, i32) {
    %c0_i32 = arith.constant 0 : i32
    %c0_i32_0 = arith.constant 0 : i32
    %c0_i32_1 = arith.constant 0 : i32
    return %c0_i32, %c0_i32_0 : i32, i32
  }
  func.func @transform_20(%arg0: i32) -> (i32, i32) {
    %c0_i32 = arith.constant 0 : i32
    %c0_i32_0 = arith.constant 0 : i32
    %c0_i32_1 = arith.constant 0 : i32
    return %c0_i32, %c0_i32_0 : i32, i32
  }
  func.func @transform_21(%arg0: i32) -> (i32, i32) {
    %c0_i32 = arith.constant 0 : i32
    %c0_i32_0 = arith.constant 0 : i32
    %c0_i32_1 = arith.constant 0 : i32
    return %c0_i32, %c0_i32_0 : i32, i32
  }
  func.func @transform_22(%arg0: i32) -> (i32, i32, i32) {
    %c0_i32 = arith.constant 0 : i32
    %c0_i32_0 = arith.constant 0 : i32
    %c0_i32_1 = arith.constant 0 : i32
    return %arg0, %c0_i32, %c0_i32_0 : i32, i32, i32
  }
  func.func @transform_23(%arg0: i32) -> (i32, i32, i32) {
    %c0_i32 = arith.constant 0 : i32
    %c0_i32_0 = arith.constant 0 : i32
    %c0_i32_1 = arith.constant 0 : i32
    return %arg0, %c0_i32, %c0_i32_0 : i32, i32, i32
  }
  func.func @transform_24(%arg0: i32) -> (i32, i32, i32) {
    %c0_i32 = arith.constant 0 : i32
    %c0_i32_0 = arith.constant 0 : i32
    %c0_i32_1 = arith.constant 0 : i32
    return %arg0, %c0_i32, %c0_i32_0 : i32, i32, i32
  }
  func.func @transform_25(%arg0: i32) -> (i32, i32, i32) {
    %c0_i32 = arith.constant 0 : i32
    %c0_i32_0 = arith.constant 0 : i32
    %c0_i32_1 = arith.constant 0 : i32
    return %arg0, %c0_i32, %c0_i32_0 : i32, i32, i32
  }
}

</mosaic_0001>

<bundles_post_ra>
// kernel: cmqe_adaptive_boq_forward.5
= control target key start
LH: loop header
LB: loop body
LE: loop exit
PB: predicated region body
PF: predicated region fallthrough
CT: control target
= control target key end

     0   :  { %s387_s20 = smov 0   ;;  %s416_s0 = inlined_call_operand.vmem [shape: f32[2,8,64], index: 0, kind: input, shape index: {}]   ;;  %s417_s1 = inlined_call_operand.<no memory space> [shape: f32[1,1], index: 1, kind: input, shape index: {}]   ;;  %s418_s2 = inlined_call_operand.vmem [shape: f32[512,64], index: 2, kind: input, shape index: {}]   ;;  %s419_s3 = inlined_call_operand.vmem [shape: f32[1,64], index: 3, kind: input, shape index: {}]   ;;  %s420_s4 = inlined_call_operand.vmem [shape: f32[1,64], index: 4, kind: input, shape index: {}]   ;;  %s421_s5 = inlined_call_operand.vmem [shape: f32[2,8,64], index: 5, kind: output, shape index: {}]  }
   0x1   :  { %v10_v0 = vstv %s417_s1 }
   0x2   :  { %11 = vst [vmem:[#allocation2] sm:$0x1] %v10_v0 }
   0x3 LB: > { %s321_s21 = sadd.s32 4294967295, %s351_s20   ;;  %p325_p0 = scmp.ge.s32.totalorder %s351_s20, 1  ;;  %s351_s20 = sphi %s387_s20, %s17_s20  }
   0x4   : > { %p188_p1 = scmp.lt.s32.totalorder %s351_s20, 3 }
   0x6   : > { %p189_p2 = pnand %p325_p0, %p188_p1 }
   0x7   : > { %p214_p3 = scmp.lt.s32.totalorder (!%p189_p2), %s321_s21, 1 }
   0x8   : > { %192 = sbr.rel (%p189_p2) target bundleno = 452 (0x1c4), region = 40 }
   0xd   : > { %v328_v1 = vld [vmem:[#allocation2] ss:$0 sm:$0xff]  ;;  %v353_v2 = vmov 0   ;;  %s423_s21 = smov (!%p214_p3, %s321_s21), 1  ;;  %vm238_vm0 = vcmask 523264  }
   0xe   : > { %342 = vset.pattern.permute.xlu0 %v353_v2  ;;  %s326_s1 = sshll.u32 %s423_s21, 3  ;;  %v224_v3 = vld [vmem:[%s418_s2] sm:$0xff] }
   0xf   : > { %231 = vperm.xlu0 %342, %v328_v1   ;;  %s217_s24 = scalar_lea.vmem %s416_s0, %s326_s1  ;;  %v329_v18 = vld [vmem:[%s419_s3] ss:$0 sm:$0xff]  ;;  %s221_s8 = scalar_lea.vmem %s421_s5, %s326_s1 }
  0x10   : > { %v222_v5 = vld [vmem:[%s217_s24] sm:$0xff] }
  0x11   : > { %v330_v20 = vld [vmem:[%s420_s4] ss:$0 sm:$0xff] }
  0x8a   : > { %v232_v4 = vpop.permute.xlu0 %231 }
  0x8b   : > { %v234_v6 = vmul.f32 %v232_v4, %v224_v3 }
  0x8d   : > { %v235_v7 = vadd.f32 %v234_v6, %v222_v5 }
  0x8f   : > { %v239_v8 = vsel %vm238_vm0, %v235_v7, 0.0 }
  0x90   : > { %240 = vadd.xlane.f32.xlu0 %v239_v8 }
 0x119   : > { %v241_v9 = vpop.xlane.xlu0 %240 }
 0x11a   : > { %v243_v10 = vmul.f32 0.015625, %v241_v9 }
 0x11c   : > { %v244_v11 = vsub.f32 %v235_v7, %v243_v10 }
 0x11e   : > { %v245_v12 = vmul.f32 %v244_v11, %v244_v11 }
 0x120   : > { %v246_v13 = vsel %vm238_vm0, %v245_v12, 0.0 }
 0x121   : > { %247 = vadd.xlane.f32.xlu1 %v246_v13 }
 0x1aa   : > { %v248_v14 = vpop.xlane.xlu1 %247 }
 0x1ab   : > { %v249_v15 = vmul.f32 0.015625, %v248_v14 }
 0x1ad   : > { %v250_v16 = vadd.f32 1e-05, %v249_v15 }
 0x1af   : > { %343 = vrsqrt.f32 %v250_v16 }
 0x1bc   : > { %v344_v17 = vpop.eup %343 }
 0x1bd   : > { %v252_v19 = vmul.f32 %v344_v17, %v244_v11 }
 0x1bf   : > { %v259_v21 = vmul.f32 %v329_v18, %v252_v19 }
 0x1c1   : > { %v266_v22 = vadd.f32 %v330_v20, %v259_v21 }
 0x1c3   : > { %267 = vst.msk [vmem:[%s221_s8] sm:$0xff] %vm238_vm0, %v266_v22 }
 0x1c4 PF: > { %s17_s20 = sadd.s32 1, %s351_s20  }
 0x1c5   : > { %p14_p4 = scmp.ge.s32.totalorder %s17_s20, 4  }
 0x1c7   :  { %16 = sbr.rel (!%p14_p4) target bundleno = 3 (0x3), region = 70 }

// kernel: cmqe_adaptive_boq_forward.6
= control target key start
LH: loop header
LB: loop body
LE: loop exit
PB: predicated region body
PF: predicated region fallthrough
CT: control target
= control target key end

     0   :  { %s1395_s25 = smov 0   ;;  %s1586_s0 = inlined_call_operand.vmem [shape: f32[2,8,64], index: 0, kind: input, shape index: {}]   ;;  %s1587_s1 = inlined_call_operand.vmem [shape: bf16[64,192], index: 1, kind: input, shape index: {}]   ;;  %s1588_s2 = inlined_call_operand.vmem [shape: f32[1,192], index: 2, kind: input, shape index: {}]   ;;  %s1589_s3 = inlined_call_operand.vmem [shape: bf16[64,64], index: 3, kind: input, shape index: {}]   ;;  %s1590_s4 = inlined_call_operand.vmem [shape: f32[1,64], index: 4, kind: input, shape index: {}]   ;;  %s1591_s5 = inlined_call_operand.vmem [shape: f32[1,64], index: 5, kind: input, shape index: {}]   ;;  %s1592_s6 = inlined_call_operand.vmem [shape: f32[1,64], index: 6, kind: input, shape index: {}]   ;;  %s1593_s7 = inlined_call_operand.vmem [shape: bf16[64,256], index: 7, kind: input, shape index: {}]   ;;  %s1594_s8 = inlined_call_operand.vmem [shape: f32[1,256], index: 8, kind: input, shape index: {}]   ;;  %s1595_s9 = inlined_call_operand.vmem [shape: bf16[256,64], index: 9, kind: input, shape index: {}]   ;;  %s1596_s10 = inlined_call_operand.vmem [shape: f32[1,64], index: 10, kind: input, shape index: {}]   ;;  %s1597_s11 = inlined_call_operand.vmem [shape: f32[1,64], index: 11, kind: input, shape index: {}]   ;;  %s1598_s12 = inlined_call_operand.vmem [shape: f32[1,64], index: 12, kind: input, shape index: {}]   ;;  %s1599_s13 = inlined_call_operand.vmem [shape: f32[2,8,64], index: 13, kind: output, shape index: {}]  }
   0x1 LB: > { %s1138_s26 = sadd.s32 4294967295, %s1319_s25   ;;  %p1142_p0 = scmp.ge.s32.totalorder %s1319_s25, 1  ;;  %s1319_s25 = sphi %s1395_s25, %s23_s25  }
   0x2   : > { %p386_p1 = scmp.lt.s32.totalorder %s1319_s25, 3 }
   0x4   : > { %p387_p2 = pnand %p1142_p0, %p386_p1 }
   0x5   : > { %p428_p3 = scmp.lt.s32.totalorder (!%p387_p2), %s1138_s26, 1  ;;  %s1324_s17 = smov (!%p387_p2), 64  }
   0x6   : > { %390 = sbr.rel (%p387_p2) target bundleno = 2271 (0x8df), region = 72 }
   0xb   : > { %v1261_v0 = vld [vmem:[%s1587_s1 + $0x34] ss:$8 sps:$4 sm:$0xff]   ;;  %v1263_v1 = vld [vmem:[%s1587_s1 + $0x30] ss:$8 sps:$4 sm:$0xff]   ;;  %v1321_v2 = vmov 0   ;;  %s1601_s26 = smov (!%p428_p3, %s1138_s26), 1  ;;  %v449_v11 = vlaneseq }
   0xc   : > { %535 = vmatprep.mubr.bf16.mxu1 %v1321_v2  ;;  %511 = vmatprep.subr.bf16.mxu1 %v1261_v0  ;;  %v1264_v3 = vld [vmem:[%s1587_s1 + $0x24] ss:$8 sps:$4 sm:$0xff]   ;;  %v1266_v4 = vld [vmem:[%s1587_s1 + $0x20] ss:$8 sps:$4 sm:$0xff]   ;;  %v1267_v5 = vld [vmem:[%s1587_s1 + $0x14] ss:$8 sps:$4 sm:$0xff]  }
   0xd   : > { %512 = vmatpush1.bf16.msra.mxu1 %v1263_v1  ;;  %s1143_s20 = sshll.u32 %s1601_s26, 3  ;;  %v1269_v6 = vld [vmem:[%s1587_s1 + $0x10] ss:$8 sps:$4 sm:$0xff]   ;;  %v1270_v7 = vld [vmem:[%s1587_s1 + $0x4] ss:$8 sps:$4 sm:$0xff]   ;;  %vm499_vm0 = vcmask 523264  }
   0xe   : > { %513 = vmatprep.subr.bf16.mxu1 %v1264_v3  ;;  %s431_s29 = scalar_lea.vmem %s1586_s0, %s1143_s20  ;;  %v1272_v8 = vld [vmem:[%s1587_s1] ss:$8 sps:$4 sm:$0xff]   ;;  %v1441_v12 = vshrl.u32 %v449_v11, 7  ;;  %v1322_v13 = vmov 0.0   ;;  %vm1323_vm1 = vmmov 0   ;;  %vm612_vm2 = vcmask 1043456   ;;  %s435_s21 = scalar_lea.vmem %s1599_s13, %s1143_s20 }
   0xf   : > { %v1436_v9 = vld [vmem:[%s431_s29] sm:$0xff]  ;;  %1237 = vmatprep.subr.bf16.mxu0 %v1322_v13  ;;  %1245 = vmatprep.mubr.msk.bf16.mxu0 %vm1323_vm1, %v1322_v13  ;;  %vm596_vm3 = vcmask 64512   ;;  %v1273_v41 = vld [vmem:[%s1589_s3 + $0x18] sm:$0xff]   ;;  %v1274_v42 = vld [vmem:[%s1589_s3 + $0x10] sm:$0xff]  }
  0x10   : > { %v438_v10 = vpack.c.bf16 %v1436_v9, %v1436_v9  ;;  %v451_v14 = vsub.s32 0, %v1441_v12  ;;  %v447_v15 = vld [vmem:[%s1588_s2] sm:$0x3]  ;;  %v455_v23 = vsub.s32 1, %v1441_v12  ;;  %1238 = vmatpush3.bf16.msra.mxu0 %v1273_v41  ;;  %v1275_v43 = vld [vmem:[%s1589_s3 + $0x8] sm:$0xff]   ;;  %v1289_v11 = vld [vmem:[%s1595_s9 + $0x78] sm:$0xff]  }
  0x11   : > { %514 = vmatpush1.bf16.msra.mxu1 %v1266_v4  ;;  %1239 = vmatprep.subr.bf16.mxu0 %v1322_v13  ;;  %v1276_v48 = vld [vmem:[%s1589_s3] sm:$0xff]   ;;  %v1279_v3 = vld [vmem:[%s1593_s7 + $0x34] ss:$8 sps:$4 sm:$0xff]   ;;  %v1277_v4 = vld [vmem:[%s1593_s7 + $0x30] ss:$8 sps:$4 sm:$0xff]  }
  0x12   : > { %515 = vmatprep.subr.bf16.mxu1 %v1267_v5  ;;  %v452_v16 = vrot.slane %v447_v15, %v451_v14  ;;  %v456_v24 = vrot.slane %v447_v15, %v455_v23  ;;  %v1156_v54 = vld [vmem:[%s1590_s4] ss:$0 sm:$0xff]  ;;  %v1282_v5 = vld [vmem:[%s1593_s7 + $0x24] ss:$8 sps:$4 sm:$0xff]   ;;  %v1291_v15 = vld [vmem:[%s1595_s9 + $0x70] sm:$0xff]  }
  0x14   : > { %1240 = vmatpush3.bf16.msra.mxu0 %v1274_v42 }
  0x15   : > { %516 = vmatpush1.bf16.msra.mxu1 %v1269_v6  ;;  %1241 = vmatprep.subr.bf16.mxu0 %v1322_v13  ;;  %v1280_v6 = vld [vmem:[%s1593_s7 + $0x20] ss:$8 sps:$4 sm:$0xff]  }
  0x16   : > { %517 = vmatprep.subr.bf16.mxu1 %v1270_v7  ;;  %v1285_v7 = vld [vmem:[%s1593_s7 + $0x14] ss:$8 sps:$4 sm:$0xff]  }
  0x18   : > { %1242 = vmatpush3.bf16.msra.mxu0 %v1275_v43 }
  0x19   : > { %518 = vmatpush1.bf16.msra.mxu1 %v1272_v8  ;;  %1243 = vmatprep.subr.bf16.mxu0 %v1322_v13  ;;  %v1283_v8 = vld [vmem:[%s1593_s7 + $0x10] ss:$8 sps:$4 sm:$0xff]  }
  0x1a   : > { %1225 = vmatprep.subr.bf16.mxu1 %v1322_v13 }
  0x1c   : > { %1153 = vmatmul.mubr.msk.bf16.vlgmr.msra.gmra.mxu1 %vm499_vm0, %v438_v10  ;;  %1244 = vmatpush3.bf16.msra.mxu0 %v1276_v48  ;;  %v1286_v10 = vld [vmem:[%s1593_s7] ss:$8 sps:$4 sm:$0xff]  }
  0x1d   : > { %1227 = vmatprep.mubr.msk.bf16.mxu1 %vm1323_vm1, %v1322_v13  ;;  %1203 = vmatprep.subr.bf16.mxu0 %v1289_v11 }
  0xdc   : > { %v537_v17 = vpop.f32.mrf.mxu1 }
  0xdd   : > { %v538_v18 = vadd.f32 %v537_v17, %v452_v16  ;;  %v1292_v16 = vld [vmem:[%s1595_s9 + $0x30] sm:$0xff]   ;;  %v1293_v17 = vld [vmem:[%s1595_s9 + $0x68] sm:$0xff]  }
  0xde   : > { %v539_v19 = vpop.f32.mrf.mxu1 }
  0xdf   : > { %v544_v20 = vpack.c.bf16 %v538_v18, %v538_v18  ;;  %v540_v26 = vadd.f32 %v539_v19, %v456_v24  ;;  %v1294_v18 = vld [vmem:[%s1595_s9 + $0x28] sm:$0xff]   ;;  %v1295_v19 = vld [vmem:[%s1595_s9 + $0x60] sm:$0xff]   ;;  %v1299_v24 = vld [vmem:[%s1595_s9 + $0x50] sm:$0xff]  }
  0xe0   : > { %v541_v21 = vpop.f32.mrf.mxu1 }
  0xe1   : > { %547 = vrot.lane.b32.xlu0 %v544_v20, %s1324_s17  ;;  %v545_v28 = vpack.c.bf16 %v540_v26, %v540_v26  ;;  %v1297_v21 = vld [vmem:[%s1595_s9 + $0x58] sm:$0xff]  }
  0xe2   : > { %v542_v22 = vpop.f32.mrf.mxu1 }
  0xe3   : > { %v614_v29 = vsel %vm612_vm2, %v545_v28, 0  ;;  %v1298_v22 = vld [vmem:[%s1595_s9 + $0x18] sm:$0xff]  }
 0x153   : > { %v548_v25 = vpop.permute.xlu0 %547 }
 0x154   : > { %v553_v27 = vsel %vm499_vm0, %v548_v25, 0  ;;  %v1300_v25 = vld [vmem:[%s1595_s9 + $0x10] sm:$0xff]  }
 0x155   : > { %1226 = vmatpush3.bf16.xpose.msra.mxu1 %v553_v27 }
 0x156   : > { %1231 = vmatprep.subr.bf16.mxu1 %v1322_v13 }
 0x15c   : > { %1228 = vmatmul.mubr.msk.bf16.vlgmr.msra.gmra.mxu1 %vm499_vm0, %v544_v20  ;;  %v1296_v20 = vld [vmem:[%s1595_s9 + $0x20] sm:$0xff]  }
 0x15d   : > { %1232 = vmatpush3.bf16.msra.mxu1 %v614_v29  ;;  %1233 = vmatprep.mubr.msk.bf16.mxu1 %vm1323_vm1, %v1322_v13  ;;  %v1290_v13 = vld [vmem:[%s1595_s9 + $0x38] sm:$0xff]  }
 0x15e   : > { %842 = vmatprep.subr.bf16.mxu1 %v1279_v3 }
 0x21c   : > { %v589_v30 = vpop.f32.mrf.mxu1 }
 0x21d   : > { %v595_v31 = vmul.f32 0.125, %v589_v30  ;;  %v1162_v30 = vld [vmem:[%s1591_s5] ss:$0 sm:$0xff] }
 0x21e   : > { %v1229_v32 = vpop.f32.mrf.mxu1 }
 0x21f   : > { %v597_v33 = vsel %vm596_vm3, %v595_v31, -inf  ;;  %v1163_v32 = vld [vmem:[%s1592_s6] ss:$0 sm:$0xff] }
 0x220   : > { %598 = vmax.xlane.f32.xlu0 %v597_v33  ;;  %v592_v34 = vpop.f32.mrf.mxu1 }
 0x222   : > { %v1230_v35 = vpop.f32.mrf.mxu1 }
 0x2a9   : > { %v599_v36 = vpop.xlane.xlu0 %598 }
 0x2aa   : > { %v600_v37 = vsub.f32 %v595_v31, %v599_v36  ;;  %v1301_v36 = vld [vmem:[%s1595_s9 + $0x48] sm:$0xff]  }
 0x2ac   : > { %v601_v38 = vmul.f32 1.442695, %v600_v37  ;;  %v1302_v37 = vld [vmem:[%s1595_s9 + $0x8] sm:$0xff]  }
 0x2ae   : > { %1305 = vpow2.f32 %v601_v38  ;;  %v1303_v38 = vld [vmem:[%s1595_s9 + $0x40] sm:$0xff]  }
 0x2bb   : > { %v1306_v39 = vpop.eup %1305 }
 0x2bc   : > { %v603_v40 = vsel %vm596_vm3, %v1306_v39, 0.0 }
 0x2bd   : > { %604 = vadd.xlane.f32.xlu1 %v603_v40  ;;  %v779_v40 = vld [vmem:[%s1594_s8] sm:$0x3] }
 0x2be   : > { %v784_v41 = vrot.slane %v779_v40, %v451_v14  ;;  %v788_v42 = vrot.slane %v779_v40, %v455_v23  ;;  %v1173_v14 = vld [vmem:[%s1596_s10] ss:$0 sm:$0xff] }
 0x346   : > { %v605_v44 = vpop.xlane.xlu1 %604 }
 0x347   : > { %1307 = vrcp.f32 %v605_v44 }
 0x354   : > { %v1308_v45 = vpop.eup %1307 }
 0x355   : > { %v607_v46 = vmul.f32 %v1308_v45, %v1306_v39  ;;  %v1304_v39 = vld [vmem:[%s1595_s9] sm:$0xff]  }
 0x357   : > { %v608_v47 = vpack.c.bf16 %v607_v46, %v607_v46 }
 0x359   : > { %1234 = vmatmul.mubr.msk.bf16.vlgmr.msra.gmra.mxu1 %vm596_vm3, %v608_v47 }
 0x35a   : > { %866 = vmatprep.mubr.bf16.mxu1 %v1321_v2  ;;  %843 = vmatpush1.bf16.msra.mxu1 %v1277_v4  ;;  %v1190_v4 = vld [vmem:[%s1597_s11] ss:$0 sm:$0xff] }
 0x35b   : > { %844 = vmatprep.subr.bf16.mxu1 %v1282_v5 }
 0x35e   : > { %845 = vmatpush1.bf16.msra.mxu1 %v1280_v6  ;;  %v1191_v6 = vld [vmem:[%s1598_s12] ss:$0 sm:$0xff] }
 0x35f   : > { %846 = vmatprep.subr.bf16.mxu1 %v1285_v7 }
 0x362   : > { %847 = vmatpush1.bf16.msra.mxu1 %v1283_v8 }
 0x419   : > { %v650_v49 = vpop.f32.mrf.mxu1 }
 0x41a   : > { %v656_v50 = vpack.c.bf16 %v650_v49, %v650_v49 }
 0x41b   : > { %v1235_v51 = vpop.f32.mrf.mxu1 }
 0x41c   : > { %1246 = vmatmul.mubr.msk.bf16.vlgmr.msra.gmra.mxu0 %vm499_vm0, %v656_v50 }
 0x41d   : > { %v653_v52 = vpop.f32.mrf.mxu1  ;;  %1204 = vmatpush3.bf16.msra.mxu0 %v1290_v13 }
 0x41e   : > { %1205 = vmatprep.subr.bf16.mxu0 %v1291_v15 }
 0x41f   : > { %v1236_v53 = vpop.f32.mrf.mxu1 }
 0x421   : > { %1206 = vmatpush3.bf16.msra.mxu0 %v1292_v16 }
 0x422   : > { %1207 = vmatprep.subr.bf16.mxu0 %v1293_v17 }
 0x425   : > { %1208 = vmatpush3.bf16.msra.mxu0 %v1294_v18 }
 0x426   : > { %1209 = vmatprep.subr.bf16.mxu0 %v1295_v19 }
 0x429   : > { %1210 = vmatpush3.bf16.msra.mxu0 %v1296_v20 }
 0x42a   : > { %1211 = vmatprep.subr.bf16.mxu0 %v1297_v21 }
 0x42d   : > { %1212 = vmatpush3.bf16.msra.mxu0 %v1298_v22 }
 0x42e   : > { %1213 = vmatprep.subr.bf16.mxu0 %v1299_v24 }
 0x431   : > { %1214 = vmatpush3.bf16.msra.mxu0 %v1300_v25 }
 0x432   : > { %1215 = vmatprep.subr.bf16.mxu0 %v1301_v36 }
 0x435   : > { %1216 = vmatpush3.bf16.msra.mxu0 %v1302_v37 }
 0x436   : > { %1217 = vmatprep.subr.bf16.mxu0 %v1303_v38 }
 0x439   : > { %1218 = vmatpush3.bf16.msra.mxu0 %v1304_v39 }
 0x4dc   : > { %v733_v55 = vpop.f32.mrf.mxu0 }
 0x4dd   : > { %v734_v56 = vadd.f32 %v1156_v54, %v733_v55 }
 0x4de   : > { %v1247_v57 = vpop.f32.mrf.mxu0 }
 0x4df   : > { %v739_v58 = vadd.f32 %v734_v56, %v1436_v9  ;;  %v1288_v9 = vld [vmem:[%s1593_s7 + $0x4] ss:$8 sps:$4 sm:$0xff]  }
 0x4e0   : > { %v736_v59 = vpop.f32.mrf.mxu0  ;;  %848 = vmatprep.subr.bf16.mxu1 %v1288_v9 }
 0x4e1   : > { %v742_v60 = vsel %vm499_vm0, %v739_v58, 0.0  ;;  %849 = vmatpush1.bf16.msra.mxu1 %v1286_v10 }
 0x4e2   : > { %743 = vadd.xlane.f32.xlu1 %v742_v60  ;;  %v1248_v61 = vpop.f32.mrf.mxu0 }
 0x56b   : > { %v744_v62 = vpop.xlane.xlu1 %743 }
 0x56c   : > { %v746_v63 = vmul.f32 0.015625, %v744_v62 }
 0x56e   : > { %v747_v0 = vsub.f32 %v739_v58, %v746_v63 }
 0x570   : > { %v748_v1 = vmul.f32 %v747_v0, %v747_v0 }
 0x572   : > { %v749_v2 = vsel %vm499_vm0, %v748_v1, 0.0 }
 0x573   : > { %750 = vadd.xlane.f32.xlu1 %v749_v2 }
 0x5fc   : > { %v751_v26 = vpop.xlane.xlu1 %750 }
 0x5fd   : > { %v752_v27 = vmul.f32 0.015625, %v751_v26 }
 0x5ff   : > { %v753_v28 = vadd.f32 1e-05, %v752_v27 }
 0x601   : > { %1309 = vrsqrt.f32 %v753_v28 }
 0x60e   : > { %v1310_v29 = vpop.eup %1309 }
 0x60f   : > { %v755_v31 = vmul.f32 %v1310_v29, %v747_v0 }
 0x611   : > { %v762_v33 = vmul.f32 %v1162_v30, %v755_v31 }
 0x613   : > { %v769_v34 = vadd.f32 %v1163_v32, %v762_v33 }
 0x615   : > { %v770_v35 = vpack.c.bf16 %v769_v34, %v769_v34 }
 0x617   : > { %1172 = vmatmul.mubr.msk.bf16.vlgmr.msra.gmra.mxu1 %vm499_vm0, %v770_v35 }
 0x6d7   : > { %v868_v43 = vpop.f32.mrf.mxu1 }
 0x6d8   : > { %v869_v44 = vadd.f32 %v868_v43, %v784_v41 }
 0x6d9   : > { %v870_v45 = vpop.f32.mrf.mxu1 }
 0x6da   : > { %v871_v46 = vadd.f32 %v870_v45, %v788_v42  ;;  %v875_v47 = vmax.f32 %v869_v44, 0.0 }
 0x6db   : > { %v872_v48 = vpop.f32.mrf.mxu1 }
 0x6dc   : > { %v876_v49 = vmax.f32 %v871_v46, 0.0  ;;  %v877_v52 = vpack.c.bf16 %v875_v47, %v875_v47 }
 0x6dd   : > { %v873_v50 = vpop.f32.mrf.mxu1 }
 0x6de   : > { %v878_v51 = vpack.c.bf16 %v876_v49, %v876_v49 }
 0x6e0   : > { %1046 = vmatprep.mubr.bf16.mxu0 %v878_v51 }
 0x6e1   : > { %1047 = vmatmul.mubr.bf16.vlgmr.msra.gmra.mxu0 %v877_v52 }
 0x7a1   : > { %v1219_v53 = vpop.f32.mrf.mxu0 }
 0x7a3   : > { %v1220_v54 = vpop.f32.mrf.mxu0 }
 0x7a4   : > { %v1221_v12 = vadd.f32 %v1220_v54, %v1219_v53 }
 0x7a5   : > { %v1222_v23 = vpop.f32.mrf.mxu0 }
 0x7a6   : > { %v1049_v55 = vadd.f32 %v1221_v12, %v1173_v14 }
 0x7a7   : > { %v1223_v56 = vpop.f32.mrf.mxu0 }
 0x7a8   : > { %v1054_v57 = vadd.f32 %v1049_v55, %v769_v34 }
 0x7aa   : > { %v1057_v58 = vsel %vm499_vm0, %v1054_v57, 0.0 }
 0x7ab   : > { %1058 = vadd.xlane.f32.xlu1 %v1057_v58 }
 0x834   : > { %v1059_v59 = vpop.xlane.xlu1 %1058 }
 0x835   : > { %v1060_v60 = vmul.f32 0.015625, %v1059_v59 }
 0x837   : > { %v1061_v61 = vsub.f32 %v1054_v57, %v1060_v60 }
 0x839   : > { %v1062_v62 = vmul.f32 %v1061_v61, %v1061_v61 }
 0x83b   : > { %v1063_v63 = vsel %vm499_vm0, %v1062_v62, 0.0 }
 0x83c   : > { %1064 = vadd.xlane.f32.xlu1 %v1063_v63 }
 0x8c5   : > { %v1065_v0 = vpop.xlane.xlu1 %1064 }
 0x8c6   : > { %v1066_v1 = vmul.f32 0.015625, %v1065_v0 }
 0x8c8   : > { %v1067_v2 = vadd.f32 1e-05, %v1066_v1 }
 0x8ca   : > { %1311 = vrsqrt.f32 %v1067_v2 }
 0x8d7   : > { %v1312_v3 = vpop.eup %1311 }
 0x8d8   : > { %v1069_v5 = vmul.f32 %v1312_v3, %v1061_v61 }
 0x8da   : > { %v1076_v7 = vmul.f32 %v1190_v4, %v1069_v5 }
 0x8dc   : > { %v1083_v8 = vadd.f32 %v1191_v6, %v1076_v7 }
 0x8de   : > { %1084 = vst.msk [vmem:[%s435_s21] sm:$0xff] %vm499_vm0, %v1083_v8 }
 0x8df PF: > { %s23_s25 = sadd.s32 1, %s1319_s25  }
 0x8e0   : > { %p20_p4 = scmp.ge.s32.totalorder %s23_s25, 4  }
 0x8e2   :  { %22 = sbr.rel (!%p20_p4) target bundleno = 1 (0x1), region = 102 }

// kernel: cmqe_adaptive_boq_forward.7
= control target key start
LH: loop header
LB: loop body
LE: loop exit
PB: predicated region body
PF: predicated region fallthrough
CT: control target
= control target key end

     0   :  { %s2949_s0 = inlined_call_operand.vmem [shape: f32[2,16,64], index: 0, kind: input, shape index: {}]   ;;  %s2950_s1 = inlined_call_operand.vmem [shape: f32[2,8,64], index: 1, kind: input, shape index: {}]   ;;  %s2951_s2 = inlined_call_operand.vmem [shape: bf16[64,64], index: 2, kind: input, shape index: {}]   ;;  %s2952_s3 = inlined_call_operand.vmem [shape: f32[1,64], index: 3, kind: input, shape index: {}]   ;;  %s2953_s4 = inlined_call_operand.vmem [shape: bf16[64,192], index: 4, kind: input, shape index: {}]   ;;  %s2954_s5 = inlined_call_operand.vmem [shape: f32[1,192], index: 5, kind: input, shape index: {}]   ;;  %s2955_s6 = inlined_call_operand.vmem [shape: bf16[64,64], index: 6, kind: input, shape index: {}]   ;;  %s2956_s7 = inlined_call_operand.vmem [shape: f32[1,64], index: 7, kind: input, shape index: {}]   ;;  %s2957_s8 = inlined_call_operand.vmem [shape: f32[1,64], index: 8, kind: input, shape index: {}]   ;;  %s2958_s9 = inlined_call_operand.vmem [shape: f32[1,64], index: 9, kind: input, shape index: {}]   ;;  %s2959_s10 = inlined_call_operand.vmem [shape: bf16[64,64], index: 10, kind: input, shape index: {}]   ;;  %s2960_s11 = inlined_call_operand.vmem [shape: f32[1,64], index: 11, kind: input, shape index: {}]   ;;  %s2961_s12 = inlined_call_operand.vmem [shape: bf16[64,128], index: 12, kind: input, shape index: {}]   ;;  %s2962_s13 = inlined_call_operand.vmem [shape: f32[1,128], index: 13, kind: input, shape index: {}]   ;;  %s2963_s14 = inlined_call_operand.vmem [shape: bf16[64,64], index: 14, kind: input, shape index: {}]   ;;  %s2964_s15 = inlined_call_operand.vmem [shape: f32[1,64], index: 15, kind: input, shape index: {}]   ;;  %s2965_s16 = inlined_call_operand.vmem [shape: f32[1,64], index: 16, kind: input, shape index: {}]   ;;  %s2966_s17 = inlined_call_operand.vmem [shape: f32[1,64], index: 17, kind: input, shape index: {}]   ;;  %s2967_s18 = inlined_call_operand.vmem [shape: bf16[64,16], index: 18, kind: input, shape index: {}]   ;;  %s2968_s19 = inlined_call_operand.vmem [shape: f32[1,16], index: 19, kind: input, shape index: {}]   ;;  %s2969_s20 = inlined_call_operand.vmem [shape: bf16[16,1], index: 20, kind: input, shape index: {}]   ;;  %s2970_s21 = inlined_call_operand.<no memory space> [shape: f32[1,1], index: 21, kind: input, shape index: {}]   ;;  %s2971_s22 = inlined_call_operand.hbm [shape: f32[2,16,64], index: 22, kind: output, shape index: {0}]   ;;  %s2972_s23 = inlined_call_operand.vmem [shape: f32[2,16,64], index: 23, kind: output, shape index: {1}]   ;;  %s2973_s24 = inlined_call_operand.vmem [shape: f32[2,16,8], index: 24, kind: output, shape index: {2}]   ;;  %s2974_s25 = inlined_call_operand.vmem [shape: f32[2,16,64], index: 25, kind: output, shape index: {3}]  }
   0x1   :  { %2987 = sst [smem:[#allocation12_spill]] %s2949_s0  ;;  %v31_v0 = vstv %s2970_s21 }
   0x2   :  { %2988 = sst [smem:[#allocation13_spill]] %s2950_s1  ;;  %32 = vst [vmem:[#allocation2] sm:$0x1] %v31_v0 }
   0x3   :  { %2989 = sst [smem:[#allocation14_spill]] %s2951_s2 }
   0x4   :  { %2990 = sst [smem:[#allocation15_spill]] %s2952_s3 }
   0x5   :  { %2991 = sst [smem:[#allocation16_spill]] %s2953_s4 }
   0x6   :  { %2992 = sst [smem:[#allocation17_spill]] %s2954_s5 }
   0x7   :  { %2993 = sst [smem:[#allocation18_spill]] %s2955_s6 }
   0x8   :  { %2994 = sst [smem:[#allocation19_spill]] %s2956_s7 }
   0x9   :  { %2995 = sst [smem:[#allocation20_spill]] %s2957_s8 }
   0xa   :  { %2996 = sst [smem:[#allocation21_spill]] %s2958_s9 }
   0xb   :  { %2997 = sst [smem:[#allocation22_spill]] %s2972_s23 }
   0xc   :  { %33 = vsyncpa [#allocation4], 0 }
   0xd   :  { %35 = vsyncpa [#allocation4 + $0x1], 0  ;;  %s2573_s6 = smov 0   ;;  %s2575_s30 = smov 0  }
   0xe   :  { %s2577_s7 = smov 0   ;;  %s2579_s3 = smov 0  }
   0xf LB: > { %2998 = sst [smem:[#allocation6_spill]] %s2419_s6  ;;  %s2594_s21 = sadd.s32 4294967295, %s2431_s3   ;;  %s2431_s3 = sphi %s2579_s3, %s3021_s3   ;;  %s2427_s7 = sphi %s2577_s7, %s3023_s7   ;;  %s2423_s30 = sphi %s2575_s30, %s3025_s30   ;;  %s2419_s6 = sphi %s2573_s6, %s3024_s6  }
  0x10   : > { %2999 = sst [smem:[#allocation7_spill]] %s2427_s7  ;;  %s2038_s26 = sadd.s32 4294967294, %s2431_s3  }
  0x11   : > { %3000 = sst [smem:[#allocation8_spill]] %s2431_s3  ;;  %s2598_s1 = sadd.s32 1, %s2431_s3  }
  0x12   : > { %3001 = sst [smem:[#allocation9_spill]] %s2598_s1  ;;  %s520_s8 = sadd.s32 1, %s2427_s7 }
  0x13   : > { %s517_s27 = ssub.s32 %s2431_s3, %s2598_s1  ;;  %p530_p0 = scmp.ne.s32.totalorder %s2427_s7, %s2423_s30 }
  0x14   : > { %p518_p1 = scmp.eq.s32.totalorder %s517_s27, 0  ;;  %p531_p2 = scmp.eq.s32.totalorder %s2594_s21, 1 }
  0x15   : > { %p536_p3 = scmp.ne.s32.totalorder %s2423_s30, %s2419_s6  ;;  %p537_p4 = scmp.eq.s32.totalorder %s2038_s26, 1 }
  0x16   : > { %s2609_s4 = scalar_select %p518_p1, %s2427_s7, %s520_s8  }
  0x17   : > { %p2611_p5 = por %p531_p2, %p530_p0  ;;  %p2615_p6 = por %p537_p4, %p536_p3 }
  0x18   : > { %3002 = sst [smem:[#allocation10_spill]] %s2609_s4  ;;  %p2041_p7 = scmp.ge.s32.totalorder %s2431_s3, 1 }
  0x19   : > { %s3004_s9 = scalar_select %p2615_p6, 1, 0 }
  0x1a   : > { %p708_p8 = scmp.lt.s32.totalorder %s2431_s3, 3 }
  0x1b   : > { %3005 = sst [smem:[#allocation11_spill]] %s3004_s9 }
  0x1c   : > { %p709_p9 = pnand %p2041_p7, %p708_p8 }
  0x1d   : > { %s3006_s29 = sld [smem:[#allocation14_spill]] (!%p709_p9)  ;;  %p795_p10 = scmp.lt.s32.totalorder (!%p709_p9), %s2594_s21, 1 }
  0x1e   : > { %712 = sbr.rel (%p709_p9) target bundleno = 3719 (0xe87), region = 108  ;;  %s3007_s0 = sld [smem:[#allocation16_spill]] (!%p709_p9) }
  0x1f   : > { %s3008_s3 = sld [smem:[#allocation12_spill]] (!%p709_p9)  ;;  %s2984_s27 = smov (!%p709_p9), 64  }
  0x20   : > { %s3009_s23 = sld [smem:[#allocation15_spill]] (!%p709_p9) }
  0x21   : > { %s3010_s9 = sld [smem:[#allocation17_spill]] (!%p709_p9) }
  0x22   : > { %s3011_s4 = sld [smem:[#allocation18_spill]] (!%p709_p9) }
  0x23   : > { %v2306_v1 = vld [vmem:[%s3006_s29 + $0x18] sm:$0xff]   ;;  %v2433_v2 = vmov 0.0   ;;  %v2307_v3 = vld [vmem:[%s3006_s29 + $0x10] sm:$0xff]   ;;  %vm2434_vm0 = vmmov 0   ;;  %s2633_s8 = scalar_select %p795_p10, %s2594_s21, 1  ;;  %v2308_v6 = vld [vmem:[%s3006_s29 + $0x8] sm:$0xff]   ;;  %v920_v26 = vlaneseq }
  0x24   : > { %2157 = vmatprep.subr.bf16.mxu0 %v2433_v2  ;;  %2165 = vmatprep.mubr.msk.bf16.mxu0 %vm2434_vm0, %v2433_v2  ;;  %v2310_v4 = vld [vmem:[%s3007_s0 + $0x34] ss:$8 sps:$4 sm:$0xff]   ;;  %v2312_v5 = vld [vmem:[%s3007_s0 + $0x30] ss:$8 sps:$4 sm:$0xff]   ;;  %v2313_v7 = vld [vmem:[%s3007_s0 + $0x24] ss:$8 sps:$4 sm:$0xff]  }
  0x25   : > { %2158 = vmatpush3.bf16.msra.mxu0 %v2306_v1  ;;  %s2645_s1 = sshll.u32 %s2633_s8, 4  ;;  %981 = vmatprep.subr.bf16.mxu1 %v2310_v4  ;;  %v2315_v8 = vld [vmem:[%s3007_s0 + $0x20] ss:$8 sps:$4 sm:$0xff]   ;;  %vm864_vm1 = vcmask 523264   ;;  %v2316_v13 = vld [vmem:[%s3007_s0 + $0x14] ss:$8 sps:$4 sm:$0xff]  }
  0x26   : > { %2159 = vmatprep.subr.bf16.mxu0 %v2433_v2  ;;  %s799_s7 = scalar_lea.vmem %s3008_s3, %s2645_s1  ;;  %982 = vmatpush1.bf16.msra.mxu1 %v2312_v5  ;;  %v2309_v9 = vld [vmem:[%s3006_s29] sm:$0xff]   ;;  %v2318_v14 = vld [vmem:[%s3007_s0 + $0x10] ss:$8 sps:$4 sm:$0xff]   ;;  %v2435_v17 = vmov 0   ;;  %v921_v27 = vshrl.u32 %v920_v26, 7  ;;  %vm1070_vm2 = vcmask 130048  }
  0x27   : > { %v820_v10 = vld [vmem:[%s799_s7] sm:$0xff]  ;;  %v821_v11 = vld [vmem:[%s799_s7 + $0x8] sm:$0xff]  ;;  %983 = vmatprep.subr.bf16.mxu1 %v2313_v7  ;;  %1005 = vmatprep.mubr.bf16.mxu1 %v2435_v17  ;;  %s3012_s2 = sld [smem:[#allocation19_spill]]  ;;  %s2045_s6 = sshll.u32 %s2633_s8, 3  ;;  %vm1488_vm3 = vcmask 64512   ;;  %vm1518_vm4 = vcmask 1043456  }
  0x28   : > { %v824_v12 = vpack.c.bf16 %v821_v11, %v820_v10  ;;  %v2319_v15 = vld [vmem:[%s3007_s0 + $0x4] ss:$8 sps:$4 sm:$0xff]   ;;  %v2321_v16 = vld [vmem:[%s3007_s0] ss:$8 sps:$4 sm:$0xff]   ;;  %v922_v28 = vsub.s32 0, %v921_v27  ;;  %v926_v30 = vsub.s32 1, %v921_v27  ;;  %s818_s8 = scalar_lea.vmem %s2974_s25, %s2645_s1 }
  0x29   : > { %2160 = vmatpush3.bf16.msra.mxu0 %v2307_v3  ;;  %v2052_v19 = vld [vmem:[%s3009_s23] ss:$0 sm:$0xff]  ;;  %v2322_v63 = vld [vmem:[%s3011_s4 + $0x18] sm:$0xff]   ;;  %v2323_v0 = vld [vmem:[%s3011_s4 + $0x10] sm:$0xff]   ;;  %s3013_s0 = sld [smem:[#allocation13_spill]] }
  0x2a   : > { %2161 = vmatprep.subr.bf16.mxu0 %v2433_v2  ;;  %984 = vmatpush1.bf16.msra.mxu1 %v2315_v8  ;;  %v918_v29 = vld [vmem:[%s3010_s9] sm:$0x3]  ;;  %s3014_s26 = sld [smem:[#allocation20_spill]] }
  0x2b   : > { %985 = vmatprep.subr.bf16.mxu1 %v2316_v13  ;;  %v923_v32 = vrot.slane %v918_v29, %v922_v28  ;;  %v927_v34 = vrot.slane %v918_v29, %v926_v30  ;;  %v2325_v10 = vld [vmem:[%s3011_s4] sm:$0xff]   ;;  %s3015_s3 = sld [smem:[#allocation21_spill]] }
  0x2d   : > { %2162 = vmatpush3.bf16.msra.mxu0 %v2308_v6 }
  0x2e   : > { %2163 = vmatprep.subr.bf16.mxu0 %v2433_v2  ;;  %986 = vmatpush1.bf16.msra.mxu1 %v2318_v14 }
  0x2f   : > { %987 = vmatprep.subr.bf16.mxu1 %v2319_v15  ;;  %s803_s9 = scalar_lea.vmem %s3013_s0, %s2045_s6  ;;  %s2116_s0 = sshll.u32 %s2594_s21, 8 }
  0x30   : > { %s2895_s23 = scalar_lea.hbm %s2971_s22, %s2116_s0  ;;  %s2437_s21 = smov [#allocation3]  }
  0x31   : > { %2164 = vmatpush3.bf16.msra.mxu0 %v2309_v9  ;;  %v2324_v9 = vld [vmem:[%s3011_s4 + $0x8] sm:$0xff]  }
  0x32   : > { %2169 = vmatprep.subr.bf16.mxu0 %v2433_v2  ;;  %988 = vmatpush1.bf16.msra.mxu1 %v2321_v16  ;;  %v2069_v16 = vld [vmem:[%s3012_s2] ss:$0 sm:$0xff]  ;;  %s3016_s2 = smov 64  }
  0x33   : > { %2175 = vmatprep.subr.bf16.mxu1 %v2433_v2 }
  0x34   : > { %2166 = vmatmul.mubr.msk.bf16.vlgmr.msra.gmra.mxu0 %vm864_vm1, %v824_v12 }
  0x35   : > { %2171 = vmatprep.mubr.msk.bf16.mxu0 %vm2434_vm0, %v2433_v2 }
  0xf4   : > { %v902_v18 = vpop.f32.mrf.mxu0 }
  0xf5   : > { %v2682_v22 = vadd.f32 %v2052_v19, %v902_v18 }
  0xf6   : > { %v2167_v20 = vpop.f32.mrf.mxu0 }
  0xf8   : > { %v905_v21 = vpop.f32.mrf.mxu0 }
  0xf9   : > { %v2684_v23 = vadd.f32 %v2052_v19, %v905_v21 }
  0xfa   : > { %v2168_v24 = vpop.f32.mrf.mxu0 }
  0xfb   : > { %v909_v25 = vpack.c.bf16 %v2684_v23, %v2682_v22 }
  0xfd   : > { %2066 = vmatmul.mubr.msk.bf16.vlgmr.msra.gmra.mxu1 %vm864_vm1, %v909_v25 }
  0xfe   : > { %2177 = vmatprep.mubr.msk.bf16.mxu1 %vm2434_vm0, %v2433_v2 }
 0x1bd   : > { %v1007_v31 = vpop.f32.mrf.mxu1 }
 0x1be   : > { %v1008_v36 = vadd.f32 %v1007_v31, %v923_v32 }
 0x1bf   : > { %v1009_v33 = vpop.f32.mrf.mxu1 }
 0x1c0   : > { %v1010_v39 = vadd.f32 %v1009_v33, %v927_v34 }
 0x1c1   : > { %v1011_v35 = vpop.f32.mrf.mxu1 }
 0x1c2   : > { %v1012_v37 = vadd.f32 %v1011_v35, %v923_v32 }
 0x1c3   : > { %v1013_v38 = vpop.f32.mrf.mxu1 }
 0x1c4   : > { %v1014_v40 = vadd.f32 %v1013_v38, %v927_v34  ;;  %v1016_v41 = vpack.c.bf16 %v1012_v37, %v1008_v36  ;;  %v2327_v38 = vld [vmem:[%s2961_s12 + $0x10] sm:$0xff]  }
 0x1c6   : > { %v1017_v42 = vpack.c.bf16 %v1014_v40, %v1010_v39  ;;  %1019 = vrot.lane.b32.xlu0 %v1016_v41, %s2984_s27  ;;  %v2328_v39 = vld [vmem:[%s2961_s12 + $0x8] sm:$0xff]   ;;  %v2329_v40 = vld [vmem:[%s2959_s10 + $0x18] sm:$0xff]   ;;  %s771_s27 = sand.u32 1, %s2423_s30  }
 0x1c7   : > { %s2901_s6 = scalar_lea.sflag [#allocation4], %s771_s27 }
 0x1c8   : > { %2176 = vmatpush3.bf16.msra.mxu1 %v1017_v42  ;;  %v2331_v42 = vld [vmem:[%s2959_s10 + $0x10] sm:$0xff]  }
 0x1c9   : > { %2193 = vmatprep.subr.bf16.mxu1 %v2433_v2 }
 0x238   : > { %v1020_v43 = vpop.permute.xlu0 %1019 }
 0x239   : > { %v1025_v44 = vsel %vm864_vm1, %v1020_v43, 0  ;;  %v822_v43 = vld [vmem:[%s803_s9] sm:$0xff] }
 0x23a   : > { %2170 = vmatpush3.bf16.xpose.msra.mxu0 %v1025_v44  ;;  %v823_v44 = vpack.c.bf16 %v822_v43, %v822_v43 }
 0x23b   : > { %2181 = vmatprep.subr.bf16.mxu0 %v2433_v2 }
 0x241   : > { %2172 = vmatmul.mubr.msk.bf16.vlgmr.msra.gmra.mxu0 %vm864_vm1, %v1016_v41  ;;  %v2330_v41 = vld [vmem:[%s2961_s12] sm:$0xff]  }
 0x242   : > { %2189 = vmatprep.mubr.msk.bf16.mxu0 %vm2434_vm0, %v2433_v2  ;;  %2182 = vmatpush3.bf16.msra.mxu0 %v2322_v63 }
 0x243   : > { %2183 = vmatprep.subr.bf16.mxu0 %v2433_v2 }
 0x246   : > { %2184 = vmatpush3.bf16.msra.mxu0 %v2323_v0  ;;  %v2083_v0 = vld [vmem:[%s2962_s13] ss:$0 sm:$0xff] }
 0x247   : > { %2185 = vmatprep.subr.bf16.mxu0 %v2433_v2 }
 0x24a   : > { %2186 = vmatpush3.bf16.msra.mxu0 %v2324_v9 }
 0x24b   : > { %2187 = vmatprep.subr.bf16.mxu0 %v2433_v2 }
 0x24e   : > { %2188 = vmatpush3.bf16.msra.mxu0 %v2325_v10  ;;  %v2077_v10 = vld [vmem:[%s2960_s11] ss:$0 sm:$0xff] }
 0x24f   : > { %2205 = vmatprep.subr.bf16.mxu0 %v2433_v2 }
 0x301   : > { %v1061_v45 = vpop.f32.mrf.mxu0 }
 0x302   : > { %v1068_v46 = vmul.f32 0.125, %v1061_v45  ;;  %v2332_v45 = vld [vmem:[%s2959_s10 + $0x8] sm:$0xff]  }
 0x303   : > { %v2173_v47 = vpop.f32.mrf.mxu0 }
 0x304   : > { %v1071_v48 = vsel %vm1070_vm2, %v1068_v46, -inf }
 0x305   : > { %1072 = vmax.xlane.f32.xlu0 %v1071_v48  ;;  %v1064_v49 = vpop.f32.mrf.mxu0 }
 0x306   : > { %v1069_v50 = vmul.f32 0.125, %v1064_v49 }
 0x307   : > { %v2174_v51 = vpop.f32.mrf.mxu0 }
 0x308   : > { %v1074_v52 = vsel %vm1070_vm2, %v1069_v50, -inf }
 0x309   : > { %1075 = vmax.xlane.f32.xlu1 %v1074_v52 }
 0x38e   : > { %v1073_v53 = vpop.xlane.xlu0 %1072 }
 0x38f   : > { %v1077_v54 = vsub.f32 %v1068_v46, %v1073_v53  ;;  %v2333_v46 = vld [vmem:[%s2959_s10] sm:$0xff]  }
 0x391   : > { %v1079_v55 = vmul.f32 1.442695, %v1077_v54  ;;  %v2075_v54 = vld [vmem:[%s3014_s26] ss:$0 sm:$0xff]  ;;  %s2042_s26 = sshll.u32 %s771_s27, 4 }
 0x392   : > { %v1076_v56 = vpop.xlane.xlu1 %1075 }
 0x393   : > { %2343 = vpow2.f32 %v1079_v55  ;;  %v1078_v57 = vsub.f32 %v1069_v50, %v1076_v56  ;;  %v2076_v56 = vld [vmem:[%s3015_s3] ss:$0 sm:$0xff]  ;;  %s2868_s3 = scalar_lea.vmem [#allocation3], %s2042_s26 }
 0x394   : > { %s1880_s4 = sshll.u32 %s2868_s3, 4  ;;  %s2897_s4 = int_to_ptr.vmem [resolvable:$true] %s1880_s4 }
 0x395   : > { %v1081_v58 = vmul.f32 1.442695, %v1078_v57  ;;  %s2371_s9 = scalar_lea.vmem %s2897_s4, 256 }
 0x396   : > { %p2372_p11 = scmp.ne.s32.totalorder %s2897_s4, %s2371_s9 }
 0x397   : > { %2345 = vpow2.f32 %v1081_v58 }
 0x398   : > { %p2373_p12 = pnand %p2372_p11, %p2611_p5 }
 0x39a   : > { %p2374_p13 = pneg %p2373_p12 }
 0x3a0   : > { %v2344_v59 = vpop.eup %2343 }
 0x3a1   : > { %v1083_v60 = vsel %vm1070_vm2, %v2344_v59, 0.0 }
 0x3a2   : > { %1084 = vadd.xlane.f32.xlu1 %v1083_v60 }
 0x3a4   : > { %v2346_v61 = vpop.eup %2345 }
 0x3a5   : > { %v1086_v62 = vsel %vm1070_vm2, %v2346_v61, 0.0 }
 0x3a6   : > { %1087 = vadd.xlane.f32.xlu1 %v1086_v62 }
 0x42b   : > { %v1085_v1 = vpop.xlane.xlu1 %1084 }
 0x42c   : > { %2347 = vrcp.f32 %v1085_v1 }
 0x42f   : > { %v1088_v3 = vpop.xlane.xlu1 %1087 }
 0x430   : > { %2349 = vrcp.f32 %v1088_v3 }
 0x439   : > { %v2348_v4 = vpop.eup %2347 }
 0x43a   : > { %v1091_v6 = vmul.f32 %v2348_v4, %v2344_v59 }
 0x43d   : > { %v2350_v5 = vpop.eup %2349 }
 0x43e   : > { %v1092_v7 = vmul.f32 %v2350_v5, %v2346_v61 }
 0x440   : > { %v1093_v8 = vpack.c.bf16 %v1092_v7, %v1091_v6 }
 0x442   : > { %2178 = vmatmul.mubr.msk.bf16.vlgmr.msra.gmra.mxu1 %vm1070_vm2, %v1093_v8 }
 0x443   : > { %2201 = vmatprep.mubr.msk.bf16.mxu1 %vm2434_vm0, %v2433_v2  ;;  %2194 = vmatpush3.bf16.msra.mxu1 %v2329_v40 }
 0x444   : > { %2195 = vmatprep.subr.bf16.mxu1 %v2433_v2 }
 0x447   : > { %2196 = vmatpush3.bf16.msra.mxu1 %v2331_v42 }
 0x448   : > { %2197 = vmatprep.subr.bf16.mxu1 %v2433_v2 }
 0x44b   : > { %2198 = vmatpush3.bf16.msra.mxu1 %v2332_v45 }
 0x44c   : > { %2199 = vmatprep.subr.bf16.mxu1 %v2433_v2 }
 0x44f   : > { %2200 = vmatpush3.bf16.msra.mxu1 %v2333_v46  ;;  %v2336_v46 = vld [vmem:[%s2963_s14 + $0x8] sm:$0xff]  }
 0x450   : > { %2217 = vmatprep.subr.bf16.mxu1 %v2433_v2 }
 0x502   : > { %v1131_v11 = vpop.f32.mrf.mxu1 }
 0x504   : > { %v2179_v12 = vpop.f32.mrf.mxu1 }
 0x506   : > { %v1134_v13 = vpop.f32.mrf.mxu1 }
 0x507   : > { %v1138_v14 = vpack.c.bf16 %v1134_v13, %v1131_v11 }
 0x508   : > { %v2180_v15 = vpop.f32.mrf.mxu1 }
 0x509   : > { %2190 = vmatmul.mubr.msk.bf16.vlgmr.msra.gmra.mxu0 %vm864_vm1, %v1138_v14 }
 0x50a   : > { %2213 = vmatprep.mubr.msk.bf16.mxu0 %vm2434_vm0, %v2433_v2 }
 0x5c9   : > { %v1215_v17 = vpop.f32.mrf.mxu0 }
 0x5ca   : > { %v1216_v18 = vadd.f32 %v2069_v16, %v1215_v17 }
 0x5cb   : > { %v2191_v19 = vpop.f32.mrf.mxu0 }
 0x5cc   : > { %v1222_v20 = vadd.f32 %v1216_v18, %v2682_v22 }
 0x5cd   : > { %v1218_v21 = vpop.f32.mrf.mxu0 }
 0x5ce   : > { %v1219_v24 = vadd.f32 %v2069_v16, %v1218_v21  ;;  %v1226_v25 = vsel %vm864_vm1, %v1222_v20, 0.0 }
 0x5cf   : > { %1227 = vadd.xlane.f32.xlu1 %v1226_v25  ;;  %v2192_v26 = vpop.f32.mrf.mxu0 }
 0x5d0   : > { %v1223_v27 = vadd.f32 %v1219_v24, %v2684_v23  ;;  %v2326_v23 = vld [vmem:[%s2961_s12 + $0x18] sm:$0xff]  }
 0x5d1   : > { %2206 = vmatpush3.bf16.msra.mxu0 %v2326_v23 }
 0x5d2   : > { %v1229_v28 = vsel %vm864_vm1, %v1223_v27, 0.0  ;;  %2207 = vmatprep.subr.bf16.mxu0 %v2433_v2 }
 0x5d3   : > { %1230 = vadd.xlane.f32.xlu1 %v1229_v28 }
 0x5d5   : > { %2208 = vmatpush3.bf16.msra.mxu0 %v2327_v38 }
 0x5d6   : > { %2209 = vmatprep.subr.bf16.mxu0 %v2433_v2 }
 0x5d9   : > { %2210 = vmatpush3.bf16.msra.mxu0 %v2328_v39 }
 0x5da   : > { %2211 = vmatprep.subr.bf16.mxu0 %v2433_v2 }
 0x5dd   : > { %2212 = vmatpush3.bf16.msra.mxu0 %v2330_v41 }
 0x5de   : > { %2229 = vmatprep.subr.bf16.mxu0 %v2433_v2 }
 0x5e0   : > { %2214 = vmatmul.mubr.msk.bf16.vlgmr.msra.gmra.mxu0 %vm864_vm1, %v823_v44 }
 0x5e1   : > { %2237 = vmatprep.mubr.msk.bf16.mxu0 %vm2434_vm0, %v2433_v2 }
 0x658   : > { %v1228_v29 = vpop.xlane.xlu1 %1227 }
 0x659   : > { %v1233_v30 = vmul.f32 0.015625, %v1228_v29 }
 0x65b   : > { %v1235_v31 = vsub.f32 %v1222_v20, %v1233_v30 }
 0x65c   : > { %v1231_v32 = vpop.xlane.xlu1 %1230 }
 0x65d   : > { %v1234_v33 = vmul.f32 0.015625, %v1231_v32  ;;  %v1237_v34 = vmul.f32 %v1235_v31, %v1235_v31 }
 0x65f   : > { %v1236_v35 = vsub.f32 %v1223_v27, %v1234_v33  ;;  %v1239_v22 = vsel %vm864_vm1, %v1237_v34, 0.0 }
 0x660   : > { %1240 = vadd.xlane.f32.xlu1 %v1239_v22 }
 0x661   : > { %v1238_v36 = vmul.f32 %v1236_v35, %v1236_v35 }
 0x663   : > { %v1242_v37 = vsel %vm864_vm1, %v1238_v36, 0.0  ;;  %v2334_v36 = vld [vmem:[%s2963_s14 + $0x18] sm:$0xff]  }
 0x664   : > { %1243 = vadd.xlane.f32.xlu1 %v1242_v37  ;;  %2230 = vmatpush3.bf16.msra.mxu0 %v2334_v36  ;;  %v2335_v37 = vld [vmem:[%s2963_s14 + $0x10] sm:$0xff]  }
 0x665   : > { %2231 = vmatprep.subr.bf16.mxu0 %v2433_v2 }
 0x668   : > { %2232 = vmatpush3.bf16.msra.mxu0 %v2335_v37 }
 0x669   : > { %2233 = vmatprep.subr.bf16.mxu0 %v2433_v2 }
 0x66c   : > { %2234 = vmatpush3.bf16.msra.mxu0 %v2336_v46 }
 0x66d   : > { %2235 = vmatprep.subr.bf16.mxu0 %v2433_v2 }
 0x6a0   : > { %v1431_v1 = vpop.f32.mrf.mxu0 }
 0x6a1   : > { %v1432_v3 = vadd.f32 %v2083_v0, %v1431_v1 }
 0x6a2   : > { %v2215_v4 = vpop.f32.mrf.mxu0 }
 0x6a3   : > { %v1438_v5 = vpack.c.bf16 %v1432_v3, %v1432_v3 }
 0x6a4   : > { %v1434_v6 = vpop.f32.mrf.mxu0 }
 0x6a5   : > { %v1443_v7 = vsel %vm864_vm1, %v1438_v5, 0 }
 0x6a6   : > { %v2216_v8 = vpop.f32.mrf.mxu0 }
 0x6e9   : > { %v1241_v47 = vpop.xlane.xlu1 %1240 }
 0x6ea   : > { %v1245_v48 = vmul.f32 0.015625, %v1241_v47  ;;  %v2337_v47 = vld [vmem:[%s2963_s14] sm:$0xff]  }
 0x6eb   : > { %2236 = vmatpush3.bf16.msra.mxu0 %v2337_v47 }
 0x6ec   : > { %v1247_v49 = vadd.f32 1e-05, %v1245_v48  ;;  %2253 = vmatprep.subr.bf16.mxu0 %v2433_v2 }
 0x6ed   : > { %v1244_v50 = vpop.xlane.xlu1 %1243 }
 0x6ee   : > { %2351 = vrsqrt.f32 %v1247_v49  ;;  %v1246_v51 = vmul.f32 0.015625, %v1244_v50 }
 0x6f0   : > { %v1248_v52 = vadd.f32 1e-05, %v1246_v51 }
 0x6f2   : > { %2353 = vrsqrt.f32 %v1248_v52 }
 0x6fb   : > { %v2352_v53 = vpop.eup %2351 }
 0x6fc   : > { %v1251_v55 = vmul.f32 %v2352_v53, %v1235_v31  ;;  %v2091_v53 = vld [vmem:[%s2964_s15] ss:$0 sm:$0xff] }
 0x6fe   : > { %v1259_v57 = vmul.f32 %v2075_v54, %v1251_v55 }
 0x6ff   : > { %v2354_v58 = vpop.eup %2353 }
 0x700   : > { %v1252_v59 = vmul.f32 %v2354_v58, %v1236_v35  ;;  %v1267_v60 = vadd.f32 %v2076_v56, %v1259_v57 }
 0x702   : > { %v1260_v61 = vmul.f32 %v2075_v54, %v1252_v59  ;;  %1269 = vst.msk [vmem:[%s818_s8] sm:$0xff] %vm864_vm1, %v1267_v60 }
 0x704   : > { %v1268_v62 = vadd.f32 %v2076_v56, %v1260_v61 }
 0x706   : > { %1270 = vst.msk [vmem:[%s818_s8 + $0x8] sm:$0xff] %vm864_vm1, %v1268_v62  ;;  %v1271_v63 = vpack.c.bf16 %v1268_v62, %v1267_v60  ;;  %s813_s8 = scalar_lea.vmem %s2973_s24, %s2645_s1 }
 0x708   : > { %2202 = vmatmul.mubr.msk.bf16.vlgmr.msra.gmra.mxu1 %vm864_vm1, %v1271_v63 }
 0x709   : > { %2219 = vmatprep.mubr.msk.bf16.mxu1 %vm2434_vm0, %v2433_v2  ;;  %2218 = vmatpush3.bf16.xpose.msra.mxu1 %v1443_v7 }
 0x70a   : > { %2223 = vmatprep.subr.bf16.mxu1 %v2433_v2 }
 0x7c8   : > { %v1348_v9 = vpop.f32.mrf.mxu1 }
 0x7c9   : > { %v1349_v13 = vadd.f32 %v2077_v10, %v1348_v9  ;;  %v2338_v9 = vld [vmem:[%s2967_s18 + $0x18] sm:$0xff]  }
 0x7ca   : > { %v2203_v11 = vpop.f32.mrf.mxu1 }
 0x7cb   : > { %v2340_v11 = vld [vmem:[%s2967_s18 + $0x8] sm:$0xff]  }
 0x7cc   : > { %v1351_v12 = vpop.f32.mrf.mxu1 }
 0x7cd   : > { %v1352_v14 = vadd.f32 %v2077_v10, %v1351_v12  ;;  %v2339_v10 = vld [vmem:[%s2967_s18 + $0x10] sm:$0xff]   ;;  %v2341_v12 = vld [vmem:[%s2967_s18] sm:$0xff]  }
 0x7ce   : > { %v2204_v15 = vpop.f32.mrf.mxu1 }
 0x7cf   : > { %v1437_v16 = vpack.c.bf16 %v1352_v14, %v1349_v13 }
 0x7d1   : > { %2220 = vmatmul.mubr.msk.bf16.vlgmr.msra.gmra.mxu1 %vm864_vm1, %v1437_v16 }
 0x7d2   : > { %2225 = vmatprep.mubr.msk.bf16.mxu1 %vm2434_vm0, %v2433_v2 }
 0x891   : > { %v1479_v17 = vpop.f32.mrf.mxu1 }
 0x892   : > { %v1486_v18 = vmul.f32 0.125, %v1479_v17 }
 0x893   : > { %v2221_v19 = vpop.f32.mrf.mxu1 }
 0x894   : > { %v1489_v20 = vsel %vm1488_vm3, %v1486_v18, -inf }
 0x895   : > { %1490 = vmax.xlane.f32.xlu1 %v1489_v20  ;;  %v1482_v21 = vpop.f32.mrf.mxu1  ;;  %v2097_v20 = vld [vmem:[%s2965_s16] ss:$0 sm:$0xff] }
 0x896   : > { %v1487_v24 = vmul.f32 0.125, %v1482_v21 }
 0x897   : > { %v2222_v25 = vpop.f32.mrf.mxu1 }
 0x898   : > { %v1492_v26 = vsel %vm1488_vm3, %v1487_v24, -inf }
 0x899   : > { %1493 = vmax.xlane.f32.xlu1 %v1492_v26 }
 0x91e   : > { %v1491_v27 = vpop.xlane.xlu1 %1490 }
 0x91f   : > { %v1495_v28 = vsub.f32 %v1486_v18, %v1491_v27 }
 0x921   : > { %v1497_v29 = vmul.f32 1.442695, %v1495_v28 }
 0x922   : > { %v1494_v30 = vpop.xlane.xlu1 %1493 }
 0x923   : > { %2355 = vpow2.f32 %v1497_v29  ;;  %v1496_v31 = vsub.f32 %v1487_v24, %v1494_v30 }
 0x925   : > { %v1499_v32 = vmul.f32 1.442695, %v1496_v31 }
 0x927   : > { %2357 = vpow2.f32 %v1499_v32 }
 0x930   : > { %v2356_v33 = vpop.eup %2355 }
 0x931   : > { %v1501_v34 = vsel %vm1488_vm3, %v2356_v33, 0.0 }
 0x932   : > { %1502 = vadd.xlane.f32.xlu0 %v1501_v34 }
 0x934   : > { %v2358_v35 = vpop.eup %2357 }
 0x935   : > { %v1504_v22 = vsel %vm1488_vm3, %v2358_v35, 0.0 }
 0x936   : > { %1505 = vadd.xlane.f32.xlu1 %v1504_v22 }
 0x948   : > { %1513 = vrot.lane.b32.xlu0 %v1438_v5, %s3016_s2 }
 0x9bb   : > { %v1503_v23 = vpop.xlane.xlu0 %1502 }
 0x9bc   : > { %2359 = vrcp.f32 %v1503_v23 }
 0x9bf   : > { %v1514_v38 = vpop.permute.xlu0 %1513  ;;  %v1506_v39 = vpop.xlane.xlu1 %1505 }
 0x9c0   : > { %v1520_v40 = vsel %vm1518_vm4, %v1514_v38, 0  ;;  %2361 = vrcp.f32 %v1506_v39  ;;  %v2342_v39 = vld [vmem:[%s2969_s20] sm:$0xff]  }
 0x9c1   : > { %2224 = vmatpush3.bf16.msra.mxu1 %v1520_v40  ;;  %v1715_v40 = vld [vmem:[%s2968_s19] sm:$0x1] }
 0x9c2   : > { %2241 = vmatprep.subr.bf16.mxu1 %v2433_v2 }
 0x9c9   : > { %v2360_v41 = vpop.eup %2359 }
 0x9ca   : > { %v1508_v42 = vmul.f32 %v2360_v41, %v2356_v33 }
 0x9cc   : > { %1563 = vst.msk [vmem:[%s813_s8] sm:$0xff] %vm1488_vm3, %v1508_v42 }
 0x9cd   : > { %v2362_v43 = vpop.eup %2361 }
 0x9ce   : > { %v1510_v44 = vmul.f32 %v2362_v43, %v2358_v35 }
 0x9d0   : > { %v1511_v45 = vpack.c.bf16 %v1510_v44, %v1508_v42  ;;  %1564 = vst.msk [vmem:[%s813_s8 + $0x8] sm:$0xff] %vm1488_vm3, %v1510_v44 }
 0x9d2   : > { %2226 = vmatmul.mubr.msk.bf16.vlgmr.msra.gmra.mxu1 %vm1488_vm3, %v1511_v45 }
 0x9d3   : > { %2249 = vmatprep.mubr.msk.bf16.mxu1 %vm2434_vm0, %v2433_v2  ;;  %2242 = vmatpush3.bf16.msra.mxu1 %v2338_v9 }
 0x9d4   : > { %2243 = vmatprep.subr.bf16.mxu1 %v2433_v2 }
 0x9d7   : > { %2244 = vmatpush3.bf16.msra.mxu1 %v2339_v10 }
 0x9d8   : > { %2245 = vmatprep.subr.bf16.mxu1 %v2433_v2 }
 0x9db   : > { %2246 = vmatpush3.bf16.msra.mxu1 %v2340_v11 }
 0x9dc   : > { %2247 = vmatprep.subr.bf16.mxu1 %v2433_v2 }
 0x9df   : > { %2248 = vmatpush3.bf16.msra.mxu1 %v2341_v12 }
 0xa92   : > { %v1556_v48 = vpop.f32.mrf.mxu1 }
 0xa94   : > { %v2227_v49 = vpop.f32.mrf.mxu1 }
 0xa96   : > { %v1559_v50 = vpop.f32.mrf.mxu1 }
 0xa97   : > { %v1565_v51 = vpack.c.bf16 %v1559_v50, %v1556_v48 }
 0xa98   : > { %v2228_v52 = vpop.f32.mrf.mxu1 }
 0xa99   : > { %2238 = vmatmul.mubr.msk.bf16.vlgmr.msra.gmra.mxu0 %vm864_vm1, %v1565_v51 }
 0xa9a   : > { %2255 = vmatprep.mubr.msk.bf16.mxu0 %vm2434_vm0, %v2433_v2  ;;  %v2098_v2 = vld [vmem:[%s2966_s17] ss:$0 sm:$0xff]  ;;  %2254 = vmatpush3.bf16.msra.mxu0 %v2342_v39 }
 0xb59   : > { %v1642_v54 = vpop.f32.mrf.mxu0 }
 0xb5a   : > { %v1643_v55 = vadd.f32 %v2091_v53, %v1642_v54 }
 0xb5b   : > { %v2239_v56 = vpop.f32.mrf.mxu0 }
 0xb5c   : > { %v1651_v57 = vsel %vm864_vm1, %v1643_v55, 0.0 }
 0xb5d   : > { %1652 = vadd.xlane.f32.xlu1 %v1651_v57  ;;  %v1645_v58 = vpop.f32.mrf.mxu0 }
 0xb5e   : > { %v1646_v59 = vadd.f32 %v2091_v53, %v1645_v58 }
 0xb5f   : > { %v2240_v60 = vpop.f32.mrf.mxu0 }
 0xb60   : > { %v1654_v61 = vsel %vm864_vm1, %v1646_v59, 0.0 }
 0xb61   : > { %1655 = vadd.xlane.f32.xlu1 %v1654_v61 }
 0xbe6   : > { %v1653_v62 = vpop.xlane.xlu1 %1652 }
 0xbe7   : > { %v1657_v63 = vmul.f32 0.015625, %v1653_v62 }
 0xbe9   : > { %v1659_v0 = vsub.f32 %v1643_v55, %v1657_v63 }
 0xbea   : > { %v1656_v1 = vpop.xlane.xlu1 %1655 }
 0xbeb   : > { %v1658_v3 = vmul.f32 0.015625, %v1656_v1  ;;  %v1661_v4 = vmul.f32 %v1659_v0, %v1659_v0 }
 0xbed   : > { %v1660_v5 = vsub.f32 %v1646_v59, %v1658_v3  ;;  %v1663_v6 = vsel %vm864_vm1, %v1661_v4, 0.0 }
 0xbee   : > { %1664 = vadd.xlane.f32.xlu1 %v1663_v6 }
 0xbef   : > { %v1662_v7 = vmul.f32 %v1660_v5, %v1660_v5 }
 0xbf1   : > { %v1666_v8 = vsel %vm864_vm1, %v1662_v7, 0.0 }
 0xbf2   : > { %1667 = vadd.xlane.f32.xlu1 %v1666_v8 }
 0xc77   : > { %v1665_v13 = vpop.xlane.xlu1 %1664 }
 0xc78   : > { %v1669_v14 = vmul.f32 0.015625, %v1665_v13 }
 0xc7a   : > { %v1671_v15 = vadd.f32 1e-05, %v1669_v14 }
 0xc7b   : > { %v1668_v16 = vpop.xlane.xlu1 %1667 }
 0xc7c   : > { %2363 = vrsqrt.f32 %v1671_v15  ;;  %v1670_v17 = vmul.f32 0.015625, %v1668_v16 }
 0xc7e   : > { %v1672_v18 = vadd.f32 1e-05, %v1670_v17 }
 0xc80   : > { %2365 = vrsqrt.f32 %v1672_v18 }
 0xc89   : > { %v2364_v19 = vpop.eup %2363 }
 0xc8a   : > { %v1675_v21 = vmul.f32 %v2364_v19, %v1659_v0 }
 0xc8c   : > { %v1683_v24 = vmul.f32 %v2097_v20, %v1675_v21 }
 0xc8d   : > { %v2366_v25 = vpop.eup %2365 }
 0xc8e   : > { %v2866_v26 = vadd.f32 %v2098_v2, %v1683_v24  ;;  %v1676_v27 = vmul.f32 %v2366_v25, %v1660_v5 }
 0xc90   : > { %v1684_v28 = vmul.f32 %v2097_v20, %v1676_v27  ;;  %1693 = vst.msk [vmem:[%s2868_s3] sm:$0xff] %vm864_vm1, %v2866_v26  ;;  %v1695_v30 = vsel %vm864_vm1, %v2866_v26, 0.0 }
 0xc92   : > { %v2873_v29 = vadd.f32 %v2098_v2, %v1684_v28 }
 0xc94   : > { %v1696_v31 = vsel %vm864_vm1, %v2873_v29, 0.0  ;;  %1694 = vst.msk [vmem:[%s2868_s3 + $0x8] sm:$0xff] %vm864_vm1, %v2873_v29  ;;  %s2375_s3 = sshll.u32 %s2437_s21, 4  ;;  %s2376_s3 = int_to_ptr.vmem [resolvable:$false] %s2375_s3 }
 0xc95   : > { %v1697_v32 = vadd.f32 %v1696_v31, %v1695_v30  ;;  %s2377_s5 = scalar_lea.vmem %s2376_s3, 512  ;;  %p2378_p0 = scmp.lt.s32.totalorder %s2897_s4, %s2376_s3 }
 0xc96   : > { %p2379_p1 = scmp.lt.s32.totalorder %s2377_s5, %s2371_s9 }
 0xc97   : > { %v1698_v33 = vrot.slane %v1697_v32, 4 }
 0xc98   : > { %p2380_p2 = por %p2379_p1, %p2378_p0 }
 0xc99   : > { %v1699_v34 = vadd.f32 %v1698_v33, %v1697_v32 }
 0xc9a   : > { %p2381_p3 = pnand %p2380_p2, %p2374_p13 }
 0xc9b   : > { %v1700_v35 = vrot.slane %v1699_v34, 2 }
 0xc9d   : > { %v1701_v22 = vadd.f32 %v1700_v35, %v1699_v34 }
 0xc9f   : > { %v1702_v36 = vrot.slane %v1701_v22, 1 }
 0xca1   : > { %v1703_v37 = vadd.f32 %v1702_v36, %v1701_v22 }
 0xca3   : > { %v1705_v23 = vmul.f32 0.0625, %v1703_v37 }
 0xca5   : > { %v1706_v38 = vpack.c.bf16 %v1705_v23, %v1705_v23 }
 0xca7   : > { %2250 = vmatmul.mubr.msk.bf16.vlgmr.msra.gmra.mxu1 %vm864_vm1, %v1706_v38 }
 0xd67   : > { %v1777_v41 = vpop.f32.mrf.mxu1 }
 0xd68   : > { %v1778_v42 = vadd.f32 %v1777_v41, %v1715_v40 }
 0xd69   : > { %v2251_v43 = vpop.f32.mrf.mxu1 }
 0xd6a   : > { %v1783_v44 = vmax.f32 %v1778_v42, 0.0 }
 0xd6b   : > { %v1780_v45 = vpop.f32.mrf.mxu1 }
 0xd6c   : > { %v1784_v46 = vpack.c.bf16 %v1783_v44, %v1783_v44 }
 0xd6d   : > { %v2252_v47 = vpop.f32.mrf.mxu1 }
 0xd6e   : > { %2256 = vmatmul.mubr.msk.bf16.vlgmr.msra.gmra.mxu0 %vm1070_vm2, %v1784_v46 }
 0xd6f   : > { %2384 = shalt.err (!%p2381_p3)
}
 0xd70   : > { %s2385_s27 = scalar_lea.hbm %s2895_s23, 256  ;;  %s2389_s0 = scalar_lea.hbm %s2971_s22, 512 }
 0xd71   : > { %p2386_p4 = scmp.ne.s32.totalorder %s2895_s23, %s2385_s27  ;;  %p2390_p9 = scmp.lt.s32.totalorder %s2895_s23, %s2971_s22 }
 0xd72   : > { %p2391_p10 = scmp.lt.s32.totalorder %s2389_s0, %s2385_s27 }
 0xd73   : > { %p2387_p7 = pnand %p2386_p4, %p2611_p5 }
 0xd74   : > { %p2392_p11 = por %p2391_p10, %p2390_p9 }
 0xd75   : > { %p2388_p8 = pneg %p2387_p7 }
 0xd77   : > { %p2393_p12 = pnand %p2392_p11, %p2388_p8 }
 0xd79   : > { %2396 = shalt.err (!%p2393_p12)
}
 0xd7a   : > { %s2438_s9 = smov 128   ;;  %s2439_s21 = smov 8   ;;  %v1787_v48 = vld [vmem:[#allocation2] sm:$0x1] }
 0xd7b   : > { %2261 = dma.vmem_to_hbm [thread:$0]  (%p2611_p5), %s2897_s4, 256, %s2895_s23, %s2901_s6, %s2438_s9, %s2438_s9, %s2439_s21  }
 0xd7c   : > { %s3017_s8 = sld [smem:[#allocation22_spill]] }
 0xd82   : > { %s808_s28 = scalar_lea.vmem %s3017_s8, %s2645_s1 }
 0xe2e   : > { %v1831_v49 = vpop.f32.mrf.mxu0 }
 0xe2f   : > { %v1832_v50 = vadd.f32 %v1831_v49, %v1787_v48 }
 0xe30   : > { %v2257_v51 = vpop.f32.mrf.mxu0 }
 0xe31   : > { %v2106_v52 = vmul.f32 -1.442695, %v1832_v50 }
 0xe32   : > { %v1834_v53 = vpop.f32.mrf.mxu0 }
 0xe33   : > { %2367 = vpow2.f32 %v2106_v52 }
 0xe34   : > { %v2258_v54 = vpop.f32.mrf.mxu0 }
 0xe40   : > { %v2368_v55 = vpop.eup %2367 }
 0xe41   : > { %v1840_v56 = vadd.f32 1.0, %v2368_v55 }
 0xe43   : > { %2369 = vrcp.f32 %v1840_v56 }
 0xe50   : > { %v2370_v57 = vpop.eup %2369 }
 0xe51   : > { %2259 = vpush %v2370_v57 }
 0xe82   : > { %s2260_s3 = spop %2259 }
 0xe83   : > { %v1845_v58 = vstv %s2260_s3 }
 0xe84   : > { %v1847_v59 = vmul.f32 %v1845_v58, %v2866_v26  ;;  %v1848_v60 = vmul.f32 %v1845_v58, %v2873_v29 }
 0xe86   : > { %1849 = vst.msk [vmem:[%s808_s28] sm:$0xff] %vm864_vm1, %v1847_v59  ;;  %1850 = vst.msk [vmem:[%s808_s28 + $0x8] sm:$0xff] %vm864_vm1, %v1848_v60 }
 0xe87 PF: > { %s3018_s4 = sld [smem:[#allocation8_spill]] }
 0xe88   : > { %s3019_s23 = sld [smem:[#allocation6_spill]] }
 0xe8d   : > { %p2267_p5 = scmp.ge.s32.totalorder %s3018_s4, 2 }
 0xe8e   : > { %s1904_s7 = sand.u32 1, %s3019_s23  }
 0xe8f   : > { %p2264_p13 = pnand %p2267_p5, %p2615_p6  ;;  %s1905_s0 = scalar_lea.sflag [#allocation4], %s1904_s7 }
 0xe91   : > { %p2265_p0 = pneg %p2264_p13 }
 0xe93   : > { %2414 = dma.done.wait (%p2265_p0), %s1905_s0, 256  }
 0xe94   : > { %2416 = vsyncadd (%p2265_p0), %s1905_s0, 4294967040  ;;  %s3021_s3 = sld [smem:[#allocation9_spill]]  ;;  %s3024_s6 = smov %s2423_s30 }
 0xe95   : > { %s3022_s1 = sld [smem:[#allocation7_spill]] }
 0xe96   : > { %s3023_s7 = sld [smem:[#allocation10_spill]] }
 0xe9a   : > { %p38_p1 = scmp.ge.s32.totalorder %s3021_s3, 4  }
 0xe9b   : > { %s3025_s30 = smov %s3022_s1 }
 0xe9c   :  { %40 = sbr.rel (!%p38_p1) target bundleno = 15 (0xf), region = 182 }
 0xea1   :  { %1934 = vsyncpa [#allocation4], 1 }
 0xea2   :  { %1936 = vsyncpa [#allocation4 + $0x1], 1 }

// kernel: cmqe_adaptive_boq_forward.9
= control target key start
LH: loop header
LB: loop body
LE: loop exit
PB: predicated region body
PF: predicated region fallthrough
CT: control target
= control target key end

     0   :  { %s3059_s0 = inlined_call_operand.vmem [shape: f32[2,11,64], index: 0, kind: input, shape index: {}]   ;;  %s3060_s1 = inlined_call_operand.vmem [shape: f32[2,8,64], index: 1, kind: input, shape index: {}]   ;;  %s3061_s2 = inlined_call_operand.vmem [shape: bf16[64,64], index: 2, kind: input, shape index: {}]   ;;  %s3062_s3 = inlined_call_operand.vmem [shape: f32[1,64], index: 3, kind: input, shape index: {}]   ;;  %s3063_s4 = inlined_call_operand.vmem [shape: bf16[64,192], index: 4, kind: input, shape index: {}]   ;;  %s3064_s5 = inlined_call_operand.vmem [shape: f32[1,192], index: 5, kind: input, shape index: {}]   ;;  %s3065_s6 = inlined_call_operand.vmem [shape: bf16[64,64], index: 6, kind: input, shape index: {}]   ;;  %s3066_s7 = inlined_call_operand.vmem [shape: f32[1,64], index: 7, kind: input, shape index: {}]   ;;  %s3067_s8 = inlined_call_operand.vmem [shape: f32[1,64], index: 8, kind: input, shape index: {}]   ;;  %s3068_s9 = inlined_call_operand.vmem [shape: f32[1,64], index: 9, kind: input, shape index: {}]   ;;  %s3069_s10 = inlined_call_operand.vmem [shape: bf16[64,64], index: 10, kind: input, shape index: {}]   ;;  %s3070_s11 = inlined_call_operand.vmem [shape: f32[1,64], index: 11, kind: input, shape index: {}]   ;;  %s3071_s12 = inlined_call_operand.vmem [shape: bf16[64,128], index: 12, kind: input, shape index: {}]   ;;  %s3072_s13 = inlined_call_operand.vmem [shape: f32[1,128], index: 13, kind: input, shape index: {}]   ;;  %s3073_s14 = inlined_call_operand.vmem [shape: bf16[64,64], index: 14, kind: input, shape index: {}]   ;;  %s3074_s15 = inlined_call_operand.vmem [shape: f32[1,64], index: 15, kind: input, shape index: {}]   ;;  %s3075_s16 = inlined_call_operand.vmem [shape: f32[1,64], index: 16, kind: input, shape index: {}]   ;;  %s3076_s17 = inlined_call_operand.vmem [shape: f32[1,64], index: 17, kind: input, shape index: {}]   ;;  %s3077_s18 = inlined_call_operand.vmem [shape: bf16[64,16], index: 18, kind: input, shape index: {}]   ;;  %s3078_s19 = inlined_call_operand.vmem [shape: f32[1,16], index: 19, kind: input, shape index: {}]   ;;  %s3079_s20 = inlined_call_operand.vmem [shape: bf16[16,1], index: 20, kind: input, shape index: {}]   ;;  %s3080_s21 = inlined_call_operand.<no memory space> [shape: f32[1,1], index: 21, kind: input, shape index: {}]   ;;  %s3081_s22 = inlined_call_operand.hbm [shape: f32[2,11,64], index: 22, kind: output, shape index: {0}]   ;;  %s3082_s23 = inlined_call_operand.vmem [shape: f32[2,11,64], index: 23, kind: output, shape index: {1}]   ;;  %s3083_s24 = inlined_call_operand.vmem [shape: f32[2,11,8], index: 24, kind: output, shape index: {2}]   ;;  %s3084_s25 = inlined_call_operand.hbm [shape: f32[2,11,64], index: 25, kind: output, shape index: {3}]  }
   0x1   :  { %3098 = sst [smem:[#allocation15_spill]] %s3059_s0  ;;  %v31_v0 = vstv %s3080_s21 }
   0x2   :  { %3099 = sst [smem:[#allocation16_spill]] %s3060_s1  ;;  %32 = vst [vmem:[#allocation2] sm:$0x1] %v31_v0 }
   0x3   :  { %3100 = sst [smem:[#allocation17_spill]] %s3061_s2 }
   0x4   :  { %3101 = sst [smem:[#allocation18_spill]] %s3062_s3 }
   0x5   :  { %3102 = sst [smem:[#allocation19_spill]] %s3063_s4 }
   0x6   :  { %3103 = sst [smem:[#allocation20_spill]] %s3064_s5 }
   0x7   :  { %3104 = sst [smem:[#allocation21_spill]] %s3065_s6 }
   0x8   :  { %3105 = sst [smem:[#allocation22_spill]] %s3066_s7 }
   0x9   :  { %3106 = sst [smem:[#allocation23_spill]] %s3067_s8 }
   0xa   :  { %3107 = sst [smem:[#allocation24_spill]] %s3068_s9 }
   0xb   :  { %3108 = sst [smem:[#allocation25_spill]] %s3069_s10 }
   0xc   :  { %3109 = sst [smem:[#allocation26_spill]] %s3070_s11 }
   0xd   :  { %3110 = sst [smem:[#allocation27_spill]] %s3071_s12 }
   0xe   :  { %3111 = sst [smem:[#allocation28_spill]] %s3082_s23 }
   0xf   :  { %33 = vsyncpa [#allocation4], 0 }
  0x10   :  { %35 = vsyncpa [#allocation4 + $0x1], 0 }
  0x11   :  { %36 = vsyncpa [#allocation6], 0 }
  0x12   :  { %38 = vsyncpa [#allocation6 + $0x1], 0  ;;  %s2642_s6 = smov 0   ;;  %s2644_s30 = smov 0  }
  0x13   :  { %s2646_s7 = smov 0   ;;  %s2648_s3 = smov 0  }
  0x14 LB: > { %3112 = sst [smem:[#allocation9_spill]] %s2486_s6  ;;  %s2663_s21 = sadd.s32 4294967295, %s2498_s3   ;;  %s2498_s3 = sphi %s2648_s3, %s3140_s3   ;;  %s2494_s7 = sphi %s2646_s7, %s3142_s7   ;;  %s2490_s30 = sphi %s2644_s30, %s3144_s30   ;;  %s2486_s6 = sphi %s2642_s6, %s3143_s6  }
  0x15   : > { %3113 = sst [smem:[#allocation10_spill]] %s2494_s7  ;;  %s2067_s26 = sadd.s32 4294967294, %s2498_s3  }
  0x16   : > { %3114 = sst [smem:[#allocation11_spill]] %s2498_s3  ;;  %s2667_s1 = sadd.s32 1, %s2498_s3  }
  0x17   : > { %3115 = sst [smem:[#allocation12_spill]] %s2667_s1  ;;  %s523_s8 = sadd.s32 1, %s2494_s7 }
  0x18   : > { %s520_s27 = ssub.s32 %s2498_s3, %s2667_s1  ;;  %p533_p0 = scmp.ne.s32.totalorder %s2494_s7, %s2490_s30 }
  0x19   : > { %p521_p1 = scmp.eq.s32.totalorder %s520_s27, 0  ;;  %p534_p2 = scmp.eq.s32.totalorder %s2663_s21, 1 }
  0x1a   : > { %p539_p3 = scmp.ne.s32.totalorder %s2490_s30, %s2486_s6  ;;  %p540_p4 = scmp.eq.s32.totalorder %s2067_s26, 1 }
  0x1b   : > { %s2678_s4 = scalar_select %p521_p1, %s2494_s7, %s523_s8  }
  0x1c   : > { %p2680_p5 = por %p534_p2, %p533_p0  ;;  %p2684_p6 = por %p540_p4, %p539_p3 }
  0x1d   : > { %3116 = sst [smem:[#allocation13_spill]] %s2678_s4  ;;  %p2070_p7 = scmp.ge.s32.totalorder %s2498_s3, 1 }
  0x1e   : > { %s3118_s9 = scalar_select %p2684_p6, 1, 0 }
  0x1f   : > { %p711_p8 = scmp.lt.s32.totalorder %s2498_s3, 3 }
  0x20   : > { %3119 = sst [smem:[#allocation14_spill]] %s3118_s9 }
  0x21   : > { %p712_p9 = pnand %p2070_p7, %p711_p8 }
  0x22   : > { %s3120_s29 = sld [smem:[#allocation17_spill]] (!%p712_p9)  ;;  %p798_p10 = scmp.lt.s32.totalorder (!%p712_p9), %s2663_s21, 1 }
  0x23   : > { %715 = sbr.rel (%p712_p9) target bundleno = 3725 (0xe8d), region = 108  ;;  %s3121_s0 = sld [smem:[#allocation19_spill]] (!%p712_p9) }
  0x24   : > { %s3122_s3 = sld [smem:[#allocation15_spill]] (!%p712_p9)  ;;  %s3094_s27 = smov (!%p712_p9), 64  }
  0x25   : > { %s3123_s23 = sld [smem:[#allocation18_spill]] (!%p712_p9)  ;;  %s3133_s26 = smov (!%p712_p9), 64  }
  0x26   : > { %s3124_s9 = sld [smem:[#allocation20_spill]] (!%p712_p9) }
  0x27   : > { %s3125_s4 = sld [smem:[#allocation21_spill]] (!%p712_p9) }
  0x28   : > { %v2343_v1 = vld [vmem:[%s3120_s29 + $0x18] sm:$0xff]   ;;  %v2500_v2 = vmov 0.0   ;;  %v2344_v3 = vld [vmem:[%s3120_s29 + $0x10] sm:$0xff]   ;;  %vm2501_vm0 = vmmov 0   ;;  %s2702_s8 = scalar_select %p798_p10, %s2663_s21, 1  ;;  %v2345_v6 = vld [vmem:[%s3120_s29 + $0x8] sm:$0xff]   ;;  %v918_v26 = vlaneseq }
  0x29   : > { %2188 = vmatprep.subr.bf16.mxu0 %v2500_v2  ;;  %2196 = vmatprep.mubr.msk.bf16.mxu0 %vm2501_vm0, %v2500_v2  ;;  %v2347_v4 = vld [vmem:[%s3121_s0 + $0x34] ss:$8 sps:$4 sm:$0xff]   ;;  %v2349_v5 = vld [vmem:[%s3121_s0 + $0x30] ss:$8 sps:$4 sm:$0xff]   ;;  %v2350_v7 = vld [vmem:[%s3121_s0 + $0x24] ss:$8 sps:$4 sm:$0xff]  }
  0x2a   : > { %2189 = vmatpush3.bf16.msra.mxu0 %v2343_v1  ;;  %s2714_s1 = sshll.u32 %s2702_s8, 4  ;;  %979 = vmatprep.subr.bf16.mxu1 %v2347_v4  ;;  %v2352_v8 = vld [vmem:[%s3121_s0 + $0x20] ss:$8 sps:$4 sm:$0xff]   ;;  %vm862_vm1 = vcmask 523264   ;;  %v2353_v13 = vld [vmem:[%s3121_s0 + $0x14] ss:$8 sps:$4 sm:$0xff]  }
  0x2b   : > { %2190 = vmatprep.subr.bf16.mxu0 %v2500_v2  ;;  %s802_s7 = scalar_lea.vmem %s3122_s3, %s2714_s1  ;;  %980 = vmatpush1.bf16.msra.mxu1 %v2349_v5  ;;  %v2346_v9 = vld [vmem:[%s3120_s29] sm:$0xff]   ;;  %v2355_v14 = vld [vmem:[%s3121_s0 + $0x10] ss:$8 sps:$4 sm:$0xff]   ;;  %v2502_v17 = vmov 0   ;;  %v919_v27 = vshrl.u32 %v918_v26, 7  ;;  %vm1096_vm2 = vcmask 1044480  }
  0x2c   : > { %v818_v10 = vld [vmem:[%s802_s7] sm:$0xff]  ;;  %v819_v11 = vld [vmem:[%s802_s7 + $0x8] sm:$0x7]  ;;  %981 = vmatprep.subr.bf16.mxu1 %v2350_v7  ;;  %1003 = vmatprep.mubr.bf16.mxu1 %v2502_v17  ;;  %vm1097_vm3 = vcmask 1045504   ;;  %v2503_v38 = vmov 65535   ;;  %vm1068_vm4 = vcmask 89088  }
  0x2d   : > { %v822_v12 = vpack.c.bf16 %v819_v11, %v818_v10  ;;  %v2356_v15 = vld [vmem:[%s3121_s0 + $0x4] ss:$8 sps:$4 sm:$0xff]   ;;  %v2358_v16 = vld [vmem:[%s3121_s0] ss:$8 sps:$4 sm:$0xff]   ;;  %v920_v28 = vsub.s32 0, %v919_v27  ;;  %v924_v30 = vsub.s32 1, %v919_v27 }
  0x2e   : > { %2191 = vmatpush3.bf16.msra.mxu0 %v2344_v3  ;;  %v2080_v19 = vld [vmem:[%s3123_s23] ss:$0 sm:$0xff]  ;;  %v1098_v39 = vsel %vm1096_vm2, 4294967295, %v2503_v38  ;;  %vm1072_vm5 = vcmask 83968   ;;  %v2359_v4 = vld [vmem:[%s3125_s4 + $0x18] sm:$0xff]   ;;  %v2360_v5 = vld [vmem:[%s3125_s4 + $0x10] sm:$0xff]  }
  0x2f   : > { %2192 = vmatprep.subr.bf16.mxu0 %v2500_v2  ;;  %982 = vmatpush1.bf16.msra.mxu1 %v2352_v8  ;;  %v916_v29 = vld [vmem:[%s3124_s9] sm:$0x3]  ;;  %v1099_v44 = vsel %vm1097_vm3, %v1098_v39, 0  ;;  %s3126_s2 = sld [smem:[#allocation22_spill]]  ;;  %vm1235_vm6 = vcmask 518144   ;;  %s2075_s6 = sshll.u32 %s2702_s8, 3 }
  0x30   : > { %983 = vmatprep.subr.bf16.mxu1 %v2353_v13  ;;  %v921_v32 = vrot.slane %v916_v29, %v920_v28  ;;  %v925_v34 = vrot.slane %v916_v29, %v924_v30  ;;  %v2361_v13 = vld [vmem:[%s3125_s4 + $0x8] sm:$0xff]   ;;  %s3127_s12 = sld [smem:[#allocation27_spill]]  ;;  %vm1495_vm7 = vcmask 64512   ;;  %vm1499_vm8 = vcmask 59392  }
  0x31   : > { %s3128_s10 = sld [smem:[#allocation25_spill]]  ;;  %vm1526_vm9 = vcmask 1043456   ;;  %vm1802_vm10 = vcmask 130048  }
  0x32   : > { %2193 = vmatpush3.bf16.msra.mxu0 %v2345_v6  ;;  %s3129_s0 = sld [smem:[#allocation16_spill]] }
  0x33   : > { %2194 = vmatprep.subr.bf16.mxu0 %v2500_v2  ;;  %984 = vmatpush1.bf16.msra.mxu1 %v2355_v14  ;;  %v2362_v14 = vld [vmem:[%s3125_s4] sm:$0xff]   ;;  %s2845_s4 = sand.u32 1, %s2490_s30   ;;  %s3130_s23 = sld [smem:[#allocation23_spill]] }
  0x34   : > { %985 = vmatprep.subr.bf16.mxu1 %v2356_v15  ;;  %s3131_s5 = sld [smem:[#allocation24_spill]] }
  0x35   : > { %s3132_s11 = sld [smem:[#allocation26_spill]] }
  0x36   : > { %2195 = vmatpush3.bf16.msra.mxu0 %v2346_v9 }
  0x37   : > { %2200 = vmatprep.subr.bf16.mxu0 %v2500_v2  ;;  %986 = vmatpush1.bf16.msra.mxu1 %v2358_v16 }
  0x38   : > { %2206 = vmatprep.subr.bf16.mxu1 %v2500_v2  ;;  %s806_s9 = scalar_lea.vmem %s3129_s0, %s2075_s6  ;;  %s2071_s6 = sshll.u32 %s2845_s4, 4 }
  0x39   : > { %2197 = vmatmul.mubr.msk.bf16.vlgmr.msra.gmra.mxu0 %vm862_vm1, %v822_v12  ;;  %s2856_s8 = scalar_lea.vmem [#allocation5], %s2071_s6 }
  0x3a   : > { %2202 = vmatprep.mubr.msk.bf16.mxu0 %vm2501_vm0, %v2500_v2 }
  0xf9   : > { %v900_v18 = vpop.f32.mrf.mxu0 }
  0xfa   : > { %v2751_v22 = vadd.f32 %v2080_v19, %v900_v18 }
  0xfb   : > { %v2198_v20 = vpop.f32.mrf.mxu0 }
  0xfc   : > { %v2097_v20 = vld [vmem:[%s3126_s2] ss:$0 sm:$0xff]  ;;  %s2942_s2 = scalar_lea.vmem [#allocation3], %s2071_s6 }
  0xfd   : > { %v903_v21 = vpop.f32.mrf.mxu0 }
  0xfe   : > { %v2753_v23 = vadd.f32 %v2080_v19, %v903_v21 }
  0xff   : > { %v2199_v24 = vpop.f32.mrf.mxu0 }
 0x100   : > { %v907_v25 = vpack.c.bf16 %v2753_v23, %v2751_v22 }
 0x102   : > { %2094 = vmatmul.mubr.msk.bf16.vlgmr.msra.gmra.mxu1 %vm862_vm1, %v907_v25 }
 0x103   : > { %2208 = vmatprep.mubr.msk.bf16.mxu1 %vm2501_vm0, %v2500_v2 }
 0x1c2   : > { %v1005_v31 = vpop.f32.mrf.mxu1 }
 0x1c3   : > { %v1006_v36 = vadd.f32 %v1005_v31, %v921_v32 }
 0x1c4   : > { %v1007_v33 = vpop.f32.mrf.mxu1 }
 0x1c5   : > { %v1008_v41 = vadd.f32 %v1007_v33, %v925_v34 }
 0x1c6   : > { %v1009_v35 = vpop.f32.mrf.mxu1 }
 0x1c7   : > { %v1010_v37 = vadd.f32 %v1009_v35, %v921_v32 }
 0x1c8   : > { %v1011_v40 = vpop.f32.mrf.mxu1 }
 0x1c9   : > { %v1012_v42 = vadd.f32 %v1011_v40, %v925_v34  ;;  %v1014_v43 = vpack.c.bf16 %v1010_v37, %v1006_v36 }
 0x1cb   : > { %v1015_v45 = vpack.c.bf16 %v1012_v42, %v1008_v41  ;;  %1017 = vrot.lane.b32.xlu0 %v1014_v43, %s3094_s27  ;;  %v2364_v42 = vld [vmem:[%s3127_s12 + $0x10] sm:$0xff]   ;;  %s816_s27 = scalar_lea.vmem %s3083_s24, %s2714_s1 }
 0x1cd   : > { %v1101_v46 = vand.u32 %v1099_v44, %v1015_v45  ;;  %v2366_v44 = vld [vmem:[%s3128_s10 + $0x18] sm:$0xff]   ;;  %v2367_v45 = vld [vmem:[%s3127_s12] sm:$0xff]  }
 0x1cf   : > { %2207 = vmatpush3.bf16.msra.mxu1 %v1101_v46  ;;  %v2368_v46 = vld [vmem:[%s3128_s10 + $0x10] sm:$0xff]  }
 0x1d0   : > { %2224 = vmatprep.subr.bf16.mxu1 %v2500_v2 }
 0x23d   : > { %v1018_v47 = vpop.permute.xlu0 %1017 }
 0x23e   : > { %v1023_v48 = vsel %vm862_vm1, %v1018_v47, 0  ;;  %v820_v47 = vld [vmem:[%s806_s9] sm:$0xff]  ;;  %s3097_s9 = sshll.u32 %s2663_s21, 8 }
 0x23f   : > { %2201 = vmatpush3.bf16.xpose.msra.mxu0 %v1023_v48  ;;  %v821_v48 = vpack.c.bf16 %v820_v47, %v820_v47 }
 0x240   : > { %2212 = vmatprep.subr.bf16.mxu0 %v2500_v2 }
 0x246   : > { %2203 = vmatmul.mubr.msk.bf16.vlgmr.msra.gmra.mxu0 %vm862_vm1, %v1014_v43  ;;  %v2365_v43 = vld [vmem:[%s3127_s12 + $0x8] sm:$0xff]  }
 0x247   : > { %2220 = vmatprep.mubr.msk.bf16.mxu0 %vm2501_vm0, %v2500_v2  ;;  %2213 = vmatpush3.bf16.msra.mxu0 %v2359_v4 }
 0x248   : > { %2214 = vmatprep.subr.bf16.mxu0 %v2500_v2 }
 0x24b   : > { %2215 = vmatpush3.bf16.msra.mxu0 %v2360_v5  ;;  %v2111_v5 = vld [vmem:[%s3072_s13] ss:$0 sm:$0xff] }
 0x24c   : > { %2216 = vmatprep.subr.bf16.mxu0 %v2500_v2 }
 0x24f   : > { %2217 = vmatpush3.bf16.msra.mxu0 %v2361_v13 }
 0x250   : > { %2218 = vmatprep.subr.bf16.mxu0 %v2500_v2 }
 0x253   : > { %2219 = vmatpush3.bf16.msra.mxu0 %v2362_v14  ;;  %v2105_v14 = vld [vmem:[%s3132_s11] ss:$0 sm:$0xff] }
 0x254   : > { %2236 = vmatprep.subr.bf16.mxu0 %v2500_v2 }
 0x306   : > { %v1059_v49 = vpop.f32.mrf.mxu0 }
 0x307   : > { %v1066_v50 = vmul.f32 0.125, %v1059_v49  ;;  %v2369_v49 = vld [vmem:[%s3128_s10 + $0x8] sm:$0xff]  }
 0x308   : > { %v2204_v51 = vpop.f32.mrf.mxu0 }
 0x309   : > { %v1069_v52 = vsel %vm1068_vm4, %v1066_v50, -inf }
 0x30a   : > { %1070 = vmax.xlane.f32.xlu0 %v1069_v52  ;;  %v1062_v53 = vpop.f32.mrf.mxu0 }
 0x30b   : > { %v1067_v54 = vmul.f32 0.125, %v1062_v53 }
 0x30c   : > { %v2205_v55 = vpop.f32.mrf.mxu0 }
 0x30d   : > { %v1073_v56 = vsel %vm1072_vm5, %v1067_v54, -inf }
 0x30e   : > { %1074 = vmax.xlane.f32.xlu1 %v1073_v56 }
 0x393   : > { %v1071_v57 = vpop.xlane.xlu0 %1070 }
 0x394   : > { %v1076_v58 = vsub.f32 %v1066_v50, %v1071_v57  ;;  %v2370_v50 = vld [vmem:[%s3128_s10] sm:$0xff]  }
 0x396   : > { %v1078_v59 = vmul.f32 1.442695, %v1076_v58  ;;  %v2103_v58 = vld [vmem:[%s3130_s23] ss:$0 sm:$0xff]  ;;  %s2505_s23 = smov [#allocation3]  }
 0x397   : > { %v1075_v60 = vpop.xlane.xlu1 %1074  ;;  %s2412_s3 = sshll.u32 %s2505_s23, 4  ;;  %s2413_s3 = int_to_ptr.vmem [resolvable:$false] %s2412_s3 }
 0x398   : > { %2380 = vpow2.f32 %v1078_v59  ;;  %v1077_v61 = vsub.f32 %v1067_v54, %v1075_v60  ;;  %v2104_v60 = vld [vmem:[%s3131_s5] ss:$0 sm:$0xff]  ;;  %s1889_s5 = sshll.u32 %s2942_s2, 4  ;;  %s2972_s5 = int_to_ptr.vmem [resolvable:$true] %s1889_s5 }
 0x399   : > { %p2415_p0 = scmp.lt.s32.totalorder %s2972_s5, %s2413_s3 }
 0x39a   : > { %v1080_v62 = vmul.f32 1.442695, %v1077_v61 }
 0x39c   : > { %2382 = vpow2.f32 %v1080_v62 }
 0x3a5   : > { %v2381_v63 = vpop.eup %2380 }
 0x3a6   : > { %v1082_v0 = vsel %vm1068_vm4, %v2381_v63, 0.0 }
 0x3a7   : > { %1083 = vadd.xlane.f32.xlu1 %v1082_v0 }
 0x3a9   : > { %v2383_v1 = vpop.eup %2382 }
 0x3aa   : > { %v1085_v3 = vsel %vm1072_vm5, %v2383_v1, 0.0 }
 0x3ab   : > { %1086 = vadd.xlane.f32.xlu1 %v1085_v3 }
 0x430   : > { %v1084_v6 = vpop.xlane.xlu1 %1083 }
 0x431   : > { %2384 = vrcp.f32 %v1084_v6 }
 0x434   : > { %v1087_v7 = vpop.xlane.xlu1 %1086 }
 0x435   : > { %2386 = vrcp.f32 %v1087_v7 }
 0x43e   : > { %v2385_v8 = vpop.eup %2384 }
 0x43f   : > { %v1090_v10 = vmul.f32 %v2385_v8, %v2381_v63 }
 0x442   : > { %v2387_v9 = vpop.eup %2386 }
 0x443   : > { %v1091_v11 = vmul.f32 %v2387_v9, %v2383_v1 }
 0x445   : > { %v1092_v12 = vpack.c.bf16 %v1091_v11, %v1090_v10 }
 0x447   : > { %2209 = vmatmul.mubr.msk.bf16.vlgmr.msra.gmra.mxu1 %vm1068_vm4, %v1092_v12 }
 0x448   : > { %2232 = vmatprep.mubr.msk.bf16.mxu1 %vm2501_vm0, %v2500_v2  ;;  %2225 = vmatpush3.bf16.msra.mxu1 %v2366_v44 }
 0x449   : > { %2226 = vmatprep.subr.bf16.mxu1 %v2500_v2 }
 0x44c   : > { %2227 = vmatpush3.bf16.msra.mxu1 %v2368_v46 }
 0x44d   : > { %2228 = vmatprep.subr.bf16.mxu1 %v2500_v2 }
 0x450   : > { %2229 = vmatpush3.bf16.msra.mxu1 %v2369_v49 }
 0x451   : > { %2230 = vmatprep.subr.bf16.mxu1 %v2500_v2 }
 0x454   : > { %2231 = vmatpush3.bf16.msra.mxu1 %v2370_v50  ;;  %v2373_v50 = vld [vmem:[%s3073_s14 + $0x8] sm:$0xff]  }
 0x455   : > { %2248 = vmatprep.subr.bf16.mxu1 %v2500_v2 }
 0x507   : > { %v1137_v15 = vpop.f32.mrf.mxu1 }
 0x509   : > { %v2210_v16 = vpop.f32.mrf.mxu1 }
 0x50b   : > { %v1140_v17 = vpop.f32.mrf.mxu1 }
 0x50c   : > { %v1144_v18 = vpack.c.bf16 %v1140_v17, %v1137_v15 }
 0x50d   : > { %v2211_v19 = vpop.f32.mrf.mxu1 }
 0x50e   : > { %2221 = vmatmul.mubr.msk.bf16.vlgmr.msra.gmra.mxu0 %vm862_vm1, %v1144_v18 }
 0x50f   : > { %2244 = vmatprep.mubr.msk.bf16.mxu0 %vm2501_vm0, %v2500_v2 }
 0x5ce   : > { %v1221_v21 = vpop.f32.mrf.mxu0 }
 0x5cf   : > { %v1222_v24 = vadd.f32 %v2097_v20, %v1221_v21 }
 0x5d0   : > { %v2222_v25 = vpop.f32.mrf.mxu0 }
 0x5d1   : > { %v1228_v26 = vadd.f32 %v1222_v24, %v2751_v22 }
 0x5d2   : > { %v1224_v27 = vpop.f32.mrf.mxu0 }
 0x5d3   : > { %v1225_v28 = vadd.f32 %v2097_v20, %v1224_v27  ;;  %v1232_v29 = vsel %vm862_vm1, %v1228_v26, 0.0 }
 0x5d4   : > { %1233 = vadd.xlane.f32.xlu1 %v1232_v29  ;;  %v2223_v30 = vpop.f32.mrf.mxu0 }
 0x5d5   : > { %v1229_v31 = vadd.f32 %v1225_v28, %v2753_v23  ;;  %v2363_v23 = vld [vmem:[%s3127_s12 + $0x18] sm:$0xff]  }
 0x5d6   : > { %2237 = vmatpush3.bf16.msra.mxu0 %v2363_v23 }
 0x5d7   : > { %v1236_v32 = vsel %vm1235_vm6, %v1229_v31, 0.0  ;;  %2238 = vmatprep.subr.bf16.mxu0 %v2500_v2 }
 0x5d8   : > { %1237 = vadd.xlane.f32.xlu1 %v1236_v32 }
 0x5da   : > { %2239 = vmatpush3.bf16.msra.mxu0 %v2364_v42 }
 0x5db   : > { %2240 = vmatprep.subr.bf16.mxu0 %v2500_v2 }
 0x5de   : > { %2241 = vmatpush3.bf16.msra.mxu0 %v2365_v43 }
 0x5df   : > { %2242 = vmatprep.subr.bf16.mxu0 %v2500_v2 }
 0x5e2   : > { %2243 = vmatpush3.bf16.msra.mxu0 %v2367_v45 }
 0x5e3   : > { %2260 = vmatprep.subr.bf16.mxu0 %v2500_v2 }
 0x5e5   : > { %2245 = vmatmul.mubr.msk.bf16.vlgmr.msra.gmra.mxu0 %vm862_vm1, %v821_v48 }
 0x5e6   : > { %2268 = vmatprep.mubr.msk.bf16.mxu0 %vm2501_vm0, %v2500_v2 }
 0x65d   : > { %v1234_v33 = vpop.xlane.xlu1 %1233 }
 0x65e   : > { %v1240_v34 = vmul.f32 0.015625, %v1234_v33 }
 0x660   : > { %v1242_v35 = vsub.f32 %v1228_v26, %v1240_v34 }
 0x661   : > { %v1238_v36 = vpop.xlane.xlu1 %1237 }
 0x662   : > { %v1241_v37 = vmul.f32 0.015625, %v1238_v36  ;;  %v1244_v38 = vmul.f32 %v1242_v35, %v1242_v35 }
 0x664   : > { %v1243_v39 = vsub.f32 %v1229_v31, %v1241_v37  ;;  %v1246_v22 = vsel %vm862_vm1, %v1244_v38, 0.0 }
 0x665   : > { %1247 = vadd.xlane.f32.xlu1 %v1246_v22 }
 0x666   : > { %v1245_v40 = vmul.f32 %v1243_v39, %v1243_v39 }
 0x668   : > { %v1249_v41 = vsel %vm1235_vm6, %v1245_v40, 0.0  ;;  %v2371_v40 = vld [vmem:[%s3073_s14 + $0x18] sm:$0xff]  }
 0x669   : > { %1250 = vadd.xlane.f32.xlu1 %v1249_v41  ;;  %2261 = vmatpush3.bf16.msra.mxu0 %v2371_v40  ;;  %v2372_v41 = vld [vmem:[%s3073_s14 + $0x10] sm:$0xff]  }
 0x66a   : > { %2262 = vmatprep.subr.bf16.mxu0 %v2500_v2 }
 0x66d   : > { %2263 = vmatpush3.bf16.msra.mxu0 %v2372_v41 }
 0x66e   : > { %2264 = vmatprep.subr.bf16.mxu0 %v2500_v2 }
 0x671   : > { %2265 = vmatpush3.bf16.msra.mxu0 %v2373_v50 }
 0x672   : > { %2266 = vmatprep.subr.bf16.mxu0 %v2500_v2 }
 0x6a5   : > { %v1438_v6 = vpop.f32.mrf.mxu0 }
 0x6a6   : > { %v1439_v7 = vadd.f32 %v2111_v5, %v1438_v6 }
 0x6a7   : > { %v2246_v8 = vpop.f32.mrf.mxu0 }
 0x6a8   : > { %v1445_v9 = vpack.c.bf16 %v1439_v7, %v1439_v7 }
 0x6a9   : > { %v1441_v10 = vpop.f32.mrf.mxu0 }
 0x6aa   : > { %v1450_v11 = vsel %vm862_vm1, %v1445_v9, 0 }
 0x6ab   : > { %v2247_v12 = vpop.f32.mrf.mxu0 }
 0x6ee   : > { %v1248_v51 = vpop.xlane.xlu1 %1247 }
 0x6ef   : > { %v1252_v52 = vmul.f32 0.015625, %v1248_v51  ;;  %v2374_v51 = vld [vmem:[%s3073_s14] sm:$0xff]  }
 0x6f0   : > { %2267 = vmatpush3.bf16.msra.mxu0 %v2374_v51 }
 0x6f1   : > { %v1254_v53 = vadd.f32 1e-05, %v1252_v52  ;;  %2284 = vmatprep.subr.bf16.mxu0 %v2500_v2 }
 0x6f2   : > { %v1251_v54 = vpop.xlane.xlu1 %1250 }
 0x6f3   : > { %2388 = vrsqrt.f32 %v1254_v53  ;;  %v1253_v55 = vmul.f32 0.015625, %v1251_v54 }
 0x6f5   : > { %v1255_v56 = vadd.f32 1e-05, %v1253_v55 }
 0x6f7   : > { %2390 = vrsqrt.f32 %v1255_v56 }
 0x700   : > { %v2389_v57 = vpop.eup %2388 }
 0x701   : > { %v1258_v59 = vmul.f32 %v2389_v57, %v1242_v35  ;;  %v2119_v57 = vld [vmem:[%s3074_s15] ss:$0 sm:$0xff] }
 0x703   : > { %v1266_v61 = vmul.f32 %v2103_v58, %v1258_v59 }
 0x704   : > { %v2391_v62 = vpop.eup %2390 }
 0x705   : > { %v1259_v63 = vmul.f32 %v2391_v62, %v1243_v39  ;;  %v1274_v0 = vadd.f32 %v2104_v60, %v1266_v61 }
 0x707   : > { %v1267_v1 = vmul.f32 %v2103_v58, %v1259_v63  ;;  %1276 = vst.msk [vmem:[%s2856_s8] sm:$0xff] %vm862_vm1, %v1274_v0 }
 0x709   : > { %v1275_v3 = vadd.f32 %v2104_v60, %v1267_v1 }
 0x70b   : > { %v1278_v4 = vpack.c.bf16 %v1275_v3, %v1274_v0  ;;  %1277 = vst.msk [vmem:[%s2856_s8 + $0x8] sm:$0x7] %vm1235_vm6, %v1275_v3 }
 0x70d   : > { %2233 = vmatmul.mubr.msk.bf16.vlgmr.msra.gmra.mxu1 %vm862_vm1, %v1278_v4 }
 0x70e   : > { %2250 = vmatprep.mubr.msk.bf16.mxu1 %vm2501_vm0, %v2500_v2  ;;  %2249 = vmatpush3.bf16.xpose.msra.mxu1 %v1450_v11 }
 0x70f   : > { %2254 = vmatprep.subr.bf16.mxu1 %v2500_v2 }
 0x7cd   : > { %v1355_v13 = vpop.f32.mrf.mxu1 }
 0x7ce   : > { %v1356_v17 = vadd.f32 %v2105_v14, %v1355_v13  ;;  %v2375_v13 = vld [vmem:[%s3077_s18 + $0x18] sm:$0xff]  }
 0x7cf   : > { %v2234_v15 = vpop.f32.mrf.mxu1 }
 0x7d0   : > { %v2377_v15 = vld [vmem:[%s3077_s18 + $0x8] sm:$0xff]  }
 0x7d1   : > { %v1358_v16 = vpop.f32.mrf.mxu1 }
 0x7d2   : > { %v1359_v18 = vadd.f32 %v2105_v14, %v1358_v16  ;;  %v2376_v14 = vld [vmem:[%s3077_s18 + $0x10] sm:$0xff]   ;;  %v2378_v16 = vld [vmem:[%s3077_s18] sm:$0xff]  }
 0x7d3   : > { %v2235_v19 = vpop.f32.mrf.mxu1 }
 0x7d4   : > { %v1444_v20 = vpack.c.bf16 %v1359_v18, %v1356_v17 }
 0x7d6   : > { %2251 = vmatmul.mubr.msk.bf16.vlgmr.msra.gmra.mxu1 %vm862_vm1, %v1444_v20 }
 0x7d7   : > { %2256 = vmatprep.mubr.msk.bf16.mxu1 %vm2501_vm0, %v2500_v2 }
 0x896   : > { %v1486_v21 = vpop.f32.mrf.mxu1 }
 0x897   : > { %v1493_v24 = vmul.f32 0.125, %v1486_v21 }
 0x898   : > { %v2252_v25 = vpop.f32.mrf.mxu1 }
 0x899   : > { %v1496_v26 = vsel %vm1495_vm7, %v1493_v24, -inf }
 0x89a   : > { %1497 = vmax.xlane.f32.xlu1 %v1496_v26  ;;  %v1489_v27 = vpop.f32.mrf.mxu1  ;;  %v2125_v26 = vld [vmem:[%s3075_s16] ss:$0 sm:$0xff] }
 0x89b   : > { %v1494_v28 = vmul.f32 0.125, %v1489_v27 }
 0x89c   : > { %v2253_v29 = vpop.f32.mrf.mxu1 }
 0x89d   : > { %v1500_v30 = vsel %vm1499_vm8, %v1494_v28, -inf }
 0x89e   : > { %1501 = vmax.xlane.f32.xlu1 %v1500_v30 }
 0x923   : > { %v1498_v31 = vpop.xlane.xlu1 %1497 }
 0x924   : > { %v1503_v32 = vsub.f32 %v1493_v24, %v1498_v31 }
 0x926   : > { %v1505_v33 = vmul.f32 1.442695, %v1503_v32 }
 0x927   : > { %v1502_v34 = vpop.xlane.xlu1 %1501 }
 0x928   : > { %2392 = vpow2.f32 %v1505_v33  ;;  %v1504_v35 = vsub.f32 %v1494_v28, %v1502_v34 }
 0x92a   : > { %v1507_v36 = vmul.f32 1.442695, %v1504_v35 }
 0x92c   : > { %2394 = vpow2.f32 %v1507_v36 }
 0x935   : > { %v2393_v37 = vpop.eup %2392 }
 0x936   : > { %v1509_v38 = vsel %vm1495_vm7, %v2393_v37, 0.0 }
 0x937   : > { %1510 = vadd.xlane.f32.xlu0 %v1509_v38 }
 0x939   : > { %v2395_v39 = vpop.eup %2394 }
 0x93a   : > { %v1512_v22 = vsel %vm1499_vm8, %v2395_v39, 0.0 }
 0x93b   : > { %1513 = vadd.xlane.f32.xlu1 %v1512_v22 }
 0x94d   : > { %1521 = vrot.lane.b32.xlu0 %v1445_v9, %s3133_s26  ;;  %s2408_s26 = scalar_lea.vmem %s2972_s5, 256 }
 0x94e   : > { %p2409_p11 = scmp.ne.s32.totalorder %s2972_s5, %s2408_s26 }
 0x950   : > { %p2410_p12 = pnand %p2409_p11, %p2680_p5 }
 0x952   : > { %p2411_p13 = pneg %p2410_p12 }
 0x9c0   : > { %v1511_v23 = vpop.xlane.xlu0 %1510 }
 0x9c1   : > { %2396 = vrcp.f32 %v1511_v23 }
 0x9c4   : > { %v1522_v42 = vpop.permute.xlu0 %1521  ;;  %v1514_v43 = vpop.xlane.xlu1 %1513 }
 0x9c5   : > { %v1528_v44 = vsel %vm1526_vm9, %v1522_v42, 0  ;;  %2398 = vrcp.f32 %v1514_v43  ;;  %v2379_v43 = vld [vmem:[%s3079_s20] sm:$0xff]  }
 0x9c6   : > { %2255 = vmatpush3.bf16.msra.mxu1 %v1528_v44  ;;  %v1723_v44 = vld [vmem:[%s3078_s19] sm:$0x1] }
 0x9c7   : > { %2272 = vmatprep.subr.bf16.mxu1 %v2500_v2 }
 0x9ce   : > { %v2397_v45 = vpop.eup %2396 }
 0x9cf   : > { %v1516_v46 = vmul.f32 %v2397_v45, %v2393_v37 }
 0x9d1   : > { %1571 = vst.msk [vmem:[%s816_s27] sm:$0xff] %vm1495_vm7, %v1516_v46 }
 0x9d2   : > { %v2399_v47 = vpop.eup %2398 }
 0x9d3   : > { %v1518_v48 = vmul.f32 %v2399_v47, %v2395_v39 }
 0x9d5   : > { %v1519_v49 = vpack.c.bf16 %v1518_v48, %v1516_v46  ;;  %1572 = vst.msk [vmem:[%s816_s27 + $0x8] sm:$0x7] %vm1499_vm8, %v1518_v48  ;;  %s2970_s27 = scalar_lea.hbm %s3081_s22, %s3097_s9 }
 0x9d7   : > { %2257 = vmatmul.mubr.msk.bf16.vlgmr.msra.gmra.mxu1 %vm1495_vm7, %v1519_v49 }
 0x9d8   : > { %2280 = vmatprep.mubr.msk.bf16.mxu1 %vm2501_vm0, %v2500_v2  ;;  %2273 = vmatpush3.bf16.msra.mxu1 %v2375_v13 }
 0x9d9   : > { %2274 = vmatprep.subr.bf16.mxu1 %v2500_v2 }
 0x9dc   : > { %2275 = vmatpush3.bf16.msra.mxu1 %v2376_v14 }
 0x9dd   : > { %2276 = vmatprep.subr.bf16.mxu1 %v2500_v2 }
 0x9e0   : > { %2277 = vmatpush3.bf16.msra.mxu1 %v2377_v15 }
 0x9e1   : > { %2278 = vmatprep.subr.bf16.mxu1 %v2500_v2 }
 0x9e4   : > { %2279 = vmatpush3.bf16.msra.mxu1 %v2378_v16 }
 0xa97   : > { %v1564_v52 = vpop.f32.mrf.mxu1 }
 0xa99   : > { %v2258_v53 = vpop.f32.mrf.mxu1 }
 0xa9b   : > { %v1567_v54 = vpop.f32.mrf.mxu1 }
 0xa9c   : > { %v1573_v55 = vpack.c.bf16 %v1567_v54, %v1564_v52 }
 0xa9d   : > { %v2259_v56 = vpop.f32.mrf.mxu1 }
 0xa9e   : > { %2269 = vmatmul.mubr.msk.bf16.vlgmr.msra.gmra.mxu0 %vm862_vm1, %v1573_v55 }
 0xa9f   : > { %2286 = vmatprep.mubr.msk.bf16.mxu0 %vm2501_vm0, %v2500_v2  ;;  %v2126_v2 = vld [vmem:[%s3076_s17] ss:$0 sm:$0xff]  ;;  %2285 = vmatpush3.bf16.msra.mxu0 %v2379_v43 }
 0xb5e   : > { %v1650_v58 = vpop.f32.mrf.mxu0 }
 0xb5f   : > { %v1651_v59 = vadd.f32 %v2119_v57, %v1650_v58 }
 0xb60   : > { %v2270_v60 = vpop.f32.mrf.mxu0 }
 0xb61   : > { %v1659_v61 = vsel %vm862_vm1, %v1651_v59, 0.0 }
 0xb62   : > { %1660 = vadd.xlane.f32.xlu1 %v1659_v61  ;;  %v1653_v62 = vpop.f32.mrf.mxu0 }
 0xb63   : > { %v1654_v63 = vadd.f32 %v2119_v57, %v1653_v62 }
 0xb64   : > { %v2271_v0 = vpop.f32.mrf.mxu0 }
 0xb65   : > { %v1662_v1 = vsel %vm1235_vm6, %v1654_v63, 0.0 }
 0xb66   : > { %1663 = vadd.xlane.f32.xlu1 %v1662_v1 }
 0xbeb   : > { %v1661_v3 = vpop.xlane.xlu1 %1660 }
 0xbec   : > { %v1665_v4 = vmul.f32 0.015625, %v1661_v3 }
 0xbee   : > { %v1667_v5 = vsub.f32 %v1651_v59, %v1665_v4 }
 0xbef   : > { %v1664_v6 = vpop.xlane.xlu1 %1663 }
 0xbf0   : > { %v1666_v7 = vmul.f32 0.015625, %v1664_v6  ;;  %v1669_v8 = vmul.f32 %v1667_v5, %v1667_v5 }
 0xbf2   : > { %v1668_v9 = vsub.f32 %v1654_v63, %v1666_v7  ;;  %v1671_v10 = vsel %vm862_vm1, %v1669_v8, 0.0 }
 0xbf3   : > { %1672 = vadd.xlane.f32.xlu1 %v1671_v10 }
 0xbf4   : > { %v1670_v11 = vmul.f32 %v1668_v9, %v1668_v9 }
 0xbf6   : > { %v1674_v12 = vsel %vm1235_vm6, %v1670_v11, 0.0 }
 0xbf7   : > { %1675 = vadd.xlane.f32.xlu1 %v1674_v12 }
 0xc7c   : > { %v1673_v17 = vpop.xlane.xlu1 %1672 }
 0xc7d   : > { %v1677_v18 = vmul.f32 0.015625, %v1673_v17 }
 0xc7f   : > { %v1679_v19 = vadd.f32 1e-05, %v1677_v18 }
 0xc80   : > { %v1676_v20 = vpop.xlane.xlu1 %1675 }
 0xc81   : > { %2400 = vrsqrt.f32 %v1679_v19  ;;  %v1678_v21 = vmul.f32 0.015625, %v1676_v20 }
 0xc83   : > { %v1680_v24 = vadd.f32 1e-05, %v1678_v21 }
 0xc85   : > { %2402 = vrsqrt.f32 %v1680_v24 }
 0xc8e   : > { %v2401_v25 = vpop.eup %2400 }
 0xc8f   : > { %v1683_v27 = vmul.f32 %v2401_v25, %v1667_v5 }
 0xc91   : > { %v1691_v28 = vmul.f32 %v2125_v26, %v1683_v27 }
 0xc92   : > { %v2403_v29 = vpop.eup %2402 }
 0xc93   : > { %v2938_v30 = vadd.f32 %v2126_v2, %v1691_v28  ;;  %v1684_v31 = vmul.f32 %v2403_v29, %v1668_v9 }
 0xc95   : > { %v1692_v32 = vmul.f32 %v2125_v26, %v1684_v31  ;;  %1701 = vst.msk [vmem:[%s2942_s2] sm:$0xff] %vm862_vm1, %v2938_v30  ;;  %v1703_v34 = vsel %vm862_vm1, %v2938_v30, 0.0 }
 0xc97   : > { %v2947_v33 = vadd.f32 %v2126_v2, %v1692_v32 }
 0xc99   : > { %v1704_v35 = vsel %vm1235_vm6, %v2947_v33, 0.0  ;;  %1702 = vst.msk [vmem:[%s2942_s2 + $0x8] sm:$0x7] %vm1235_vm6, %v2947_v33  ;;  %s2414_s2 = scalar_lea.vmem %s2413_s3, 512 }
 0xc9a   : > { %v1705_v36 = vadd.f32 %v1704_v35, %v1703_v34  ;;  %p2416_p1 = scmp.lt.s32.totalorder %s2414_s2, %s2408_s26 }
 0xc9c   : > { %v1706_v37 = vrot.slane %v1705_v36, 4  ;;  %p2417_p2 = por %p2416_p1, %p2415_p0 }
 0xc9e   : > { %v1707_v38 = vadd.f32 %v1706_v37, %v1705_v36  ;;  %p2418_p3 = pnand %p2417_p2, %p2411_p13 }
 0xca0   : > { %v1708_v39 = vrot.slane %v1707_v38, 2 }
 0xca2   : > { %v1709_v22 = vadd.f32 %v1708_v39, %v1707_v38 }
 0xca4   : > { %v1710_v40 = vrot.slane %v1709_v22, 1 }
 0xca6   : > { %v1711_v41 = vadd.f32 %v1710_v40, %v1709_v22 }
 0xca8   : > { %v1713_v23 = vmul.f32 0.09090909, %v1711_v41 }
 0xcaa   : > { %v1714_v42 = vpack.c.bf16 %v1713_v23, %v1713_v23 }
 0xcac   : > { %2281 = vmatmul.mubr.msk.bf16.vlgmr.msra.gmra.mxu1 %vm862_vm1, %v1714_v42 }
 0xd6c   : > { %v1785_v45 = vpop.f32.mrf.mxu1 }
 0xd6d   : > { %v1786_v46 = vadd.f32 %v1785_v45, %v1723_v44 }
 0xd6e   : > { %v2282_v47 = vpop.f32.mrf.mxu1 }
 0xd6f   : > { %v1791_v48 = vmax.f32 %v1786_v46, 0.0 }
 0xd70   : > { %v1788_v49 = vpop.f32.mrf.mxu1 }
 0xd71   : > { %v1792_v50 = vpack.c.bf16 %v1791_v48, %v1791_v48 }
 0xd72   : > { %v2283_v51 = vpop.f32.mrf.mxu1 }
 0xd73   : > { %2287 = vmatmul.mubr.msk.bf16.vlgmr.msra.gmra.mxu0 %vm1802_vm10, %v1792_v50 }
 0xd74   : > { %2421 = shalt.err (!%p2418_p3)
}
 0xd75   : > { %s2422_s7 = scalar_lea.hbm %s2970_s27, 256  ;;  %s2426_s23 = scalar_lea.hbm %s3081_s22, 512 }
 0xd76   : > { %p2423_p4 = scmp.ne.s32.totalorder %s2970_s27, %s2422_s7  ;;  %p2427_p9 = scmp.lt.s32.totalorder %s2970_s27, %s3081_s22 }
 0xd77   : > { %p2428_p10 = scmp.lt.s32.totalorder %s2426_s23, %s2422_s7 }
 0xd78   : > { %p2424_p7 = pnand %p2423_p4, %p2680_p5 }
 0xd79   : > { %p2429_p11 = por %p2428_p10, %p2427_p9 }
 0xd7a   : > { %p2425_p8 = pneg %p2424_p7 }
 0xd7c   : > { %p2430_p12 = pnand %p2429_p11, %p2425_p8 }
 0xd7e   : > { %2433 = shalt.err (!%p2430_p12)
}
 0xd7f   : > { %s2506_s26 = smov 128   ;;  %s2507_s3 = smov 8  }
 0xd80   : > { %s3134_s10 = scalar_lea.sflag [#allocation4], %s2845_s4  ;;  %s3135_s9 = sshll.u32 %s2663_s21, 8 }
 0xd81   : > { %2292 = dma.vmem_to_hbm [thread:$0]  (%p2680_p5), %s2972_s5, 256, %s2970_s27, %s3134_s10, %s2506_s26, %s2506_s26, %s2507_s3  }
 0xd82   : > { %s3005_s7 = scalar_lea.hbm %s3084_s25, %s3135_s9  ;;  %s1911_s0 = sshll.u32 %s2856_s8, 4  ;;  %s3008_s0 = int_to_ptr.vmem [resolvable:$true] %s1911_s0 }
 0xd83   : > { %s1876_s23 = scalar_lea.sflag [#allocation6], %s2845_s4  ;;  %s2434_s11 = scalar_lea.vmem %s3008_s0, 256 }
 0xd84   : > { %p2435_p13 = scmp.ne.s32.totalorder %s3008_s0, %s2434_s11  ;;  %s2508_s12 = smov [#allocation5]  }
 0xd85   : > { %s2438_s5 = sshll.u32 %s2508_s12, 4  ;;  %s2439_s5 = int_to_ptr.vmem [resolvable:$false] %s2438_s5 }
 0xd86   : > { %p2436_p0 = pnand %p2435_p13, %p2680_p5  ;;  %s2440_s21 = scalar_lea.vmem %s2439_s5, 512 }
 0xd87   : > { %p2441_p2 = scmp.lt.s32.totalorder %s3008_s0, %s2439_s5  ;;  %p2442_p3 = scmp.lt.s32.totalorder %s2440_s21, %s2434_s11 }
 0xd88   : > { %p2437_p1 = pneg %p2436_p0 }
 0xd89   : > { %p2443_p4 = por %p2442_p3, %p2441_p2 }
 0xd8b   : > { %p2444_p7 = pnand %p2443_p4, %p2437_p1 }
 0xd8d   : > { %2447 = shalt.err (!%p2444_p7)
}
 0xd8e   : > { %s2448_s8 = scalar_lea.hbm %s3005_s7, 256  ;;  %s2452_s12 = scalar_lea.hbm %s3084_s25, 512 }
 0xd8f   : > { %p2449_p8 = scmp.ne.s32.totalorder %s3005_s7, %s2448_s8  ;;  %p2453_p11 = scmp.lt.s32.totalorder %s3005_s7, %s3084_s25 }
 0xd90   : > { %p2454_p12 = scmp.lt.s32.totalorder %s2452_s12, %s2448_s8 }
 0xd91   : > { %p2450_p9 = pnand %p2449_p8, %p2680_p5 }
 0xd92   : > { %p2455_p13 = por %p2454_p12, %p2453_p11 }
 0xd93   : > { %p2451_p10 = pneg %p2450_p9 }
 0xd95   : > { %p2456_p0 = pnand %p2455_p13, %p2451_p10 }
 0xd97   : > { %2459 = shalt.err (!%p2456_p0)
}
 0xd98   : > { %2293 = dma.vmem_to_hbm [thread:$0]  (%p2680_p5), %s3008_s0, 256, %s3005_s7, %s1876_s23, %s2506_s26, %s2506_s26, %s2507_s3   ;;  %v1795_v52 = vld [vmem:[#allocation2] sm:$0x1] }
 0xd99   : > { %s3136_s2 = sld [smem:[#allocation28_spill]] }
 0xd9f   : > { %s811_s5 = scalar_lea.vmem %s3136_s2, %s2714_s1 }
 0xe33   : > { %v1840_v53 = vpop.f32.mrf.mxu0 }
 0xe34   : > { %v1841_v54 = vadd.f32 %v1840_v53, %v1795_v52 }
 0xe35   : > { %v2288_v55 = vpop.f32.mrf.mxu0 }
 0xe36   : > { %v2134_v56 = vmul.f32 -1.442695, %v1841_v54 }
 0xe37   : > { %v1843_v57 = vpop.f32.mrf.mxu0 }
 0xe38   : > { %2404 = vpow2.f32 %v2134_v56 }
 0xe39   : > { %v2289_v58 = vpop.f32.mrf.mxu0 }
 0xe45   : > { %v2405_v59 = vpop.eup %2404 }
 0xe46   : > { %v1849_v60 = vadd.f32 1.0, %v2405_v59 }
 0xe48   : > { %2406 = vrcp.f32 %v1849_v60 }
 0xe55   : > { %v2407_v61 = vpop.eup %2406 }
 0xe56   : > { %2290 = vpush %v2407_v61 }
 0xe87   : > { %s2291_s11 = spop %2290 }
 0xe88   : > { %v1854_v62 = vstv %s2291_s11 }
 0xe89   : > { %v1856_v63 = vmul.f32 %v1854_v62, %v2938_v30  ;;  %v1857_v0 = vmul.f32 %v1854_v62, %v2947_v33 }
 0xe8b   : > { %1858 = vst.msk [vmem:[%s811_s5] sm:$0xff] %vm862_vm1, %v1856_v63 }
 0xe8c   : > { %1859 = vst.msk [vmem:[%s811_s5 + $0x8] sm:$0x7] %vm1235_vm6, %v1857_v0 }
 0xe8d PF: > { %s3137_s26 = sld [smem:[#allocation11_spill]] }
 0xe8e   : > { %s3138_s3 = sld [smem:[#allocation9_spill]] }
 0xe93   : > { %p2303_p5 = scmp.ge.s32.totalorder %s3137_s26, 2 }
 0xe94   : > { %s1926_s0 = sand.u32 1, %s3138_s3  }
 0xe95   : > { %p2297_p1 = pnand %p2303_p5, %p2684_p6  ;;  %s1927_s23 = scalar_lea.sflag [#allocation4], %s1926_s0 }
 0xe97   : > { %p2298_p2 = pneg %p2297_p1 }
 0xe99   : > { %2477 = dma.done.wait (%p2298_p2), %s1927_s23, 256  }
 0xe9a   : > { %2479 = vsyncadd (%p2298_p2), %s1927_s23, 4294967040  ;;  %s1952_s1 = scalar_lea.sflag [#allocation6], %s1926_s0 }
 0xe9b   : > { %2481 = dma.done.wait (%p2298_p2), %s1952_s1, 256  }
 0xe9c   : > { %2483 = vsyncadd (%p2298_p2), %s1952_s1, 4294967040  ;;  %s3140_s3 = sld [smem:[#allocation12_spill]]  ;;  %s3143_s6 = smov %s2490_s30 }
 0xe9d   : > { %s3141_s21 = sld [smem:[#allocation10_spill]] }
 0xe9e   : > { %s3142_s7 = sld [smem:[#allocation13_spill]] }
 0xea2   : > { %p41_p3 = scmp.ge.s32.totalorder %s3140_s3, 4  }
 0xea3   : > { %s3144_s30 = smov %s3141_s21 }
 0xea4   :  { %43 = sbr.rel (!%p41_p3) target bundleno = 20 (0x14), region = 187 }
 0xea9   :  { %1957 = vsyncpa [#allocation4], 1 }
 0xeaa   :  { %1959 = vsyncpa [#allocation4 + $0x1], 1 }
 0xeab   :  { %1960 = vsyncpa [#allocation6], 1 }
 0xeac   :  { %1962 = vsyncpa [#allocation6 + $0x1], 1 }

</bundles_post_ra>
